<compile_context>
chip_gen: v5e
topology: v5e:2x2
jax: 0.10.0
libtpu: 0.0.40
codegen_flags: <defaults>
</compile_context>

<pallas_src>
import functools

import jax
import jax.numpy as jnp
from jax.experimental import pallas as pl
from jax.experimental.pallas import tpu as pltpu


def _leaky_relu(x, negative_slope=0.2):
    # max(x, 0.2*x) == leaky_relu(x, 0.2); one mul + one max on the VPU.
    return jnp.maximum(x, negative_slope * x)


def mlp_kernel(x_ref, w1_ref, b1_ref, w2_ref, b2_ref, w3_ref, b3_ref, o_ref):
    x = x_ref[...].astype(jnp.float32)          # (TM, D)   D tiny (e.g. 3)
    w1 = w1_ref[...].astype(jnp.float32)        # (D, H)
    data_dim = x.shape[1]

    if data_dim <= 8:
        # Layer 1 as VPU broadcast-FMAs: a K=3 MXU contraction would use ~2%
        # of the systolic array; the VALU slots are otherwise idle here.
        h = x[:, 0:1] * w1[0:1, :]
        for d in range(1, data_dim):
            h = h + x[:, d:d + 1] * w1[d:d + 1, :]
    else:
        h = jnp.dot(x, w1, preferred_element_type=jnp.float32)
    h = _leaky_relu(h + b1_ref[...])            # (TM, H) f32

    # Hidden layer: the dominant matmul -> MXU (bf16 weights, f32 accumulation).
    h = jnp.dot(h.astype(w2_ref.dtype), w2_ref[...],
                preferred_element_type=jnp.float32) + b2_ref[...]
    h = _leaky_relu(h)

    # Output layer against a lane-padded (H, 128) W3 (keeps the known-good MXU
    # lowering); only the first `network_dim` columns are real, so slice before
    # the store -> HBM writeback is the narrow (TM, network_dim) block only.
    out_full = jnp.dot(h.astype(w3_ref.dtype), w3_ref[...],
                       preferred_element_type=jnp.float32)
    nd = o_ref.shape[1]
    o_ref[...] = (out_full[:, :nd] + b3_ref[...]).astype(o_ref.dtype)


@functools.partial(jax.jit, static_argnames=("tile_target", "use_bf16"))
def mlp_forward(x, params, *, tile_target=2048, use_bf16=True):
    """x: (N, data_dim) float32. params: weights already transposed to
    (in_features, out_features); biases shaped (1, out_features)."""
    n, data_dim = x.shape
    hidden = params["w1"].shape[1]
    network_dim = params["w3"].shape[1]
    assert params["w3"].shape[0] == hidden

    w1, b1 = params["w1"], params["b1"]
    w2, b2 = params["w2"], params["b2"]
    w3, b3 = params["w3"], params["b3"]

    # Lane-pad W3 columns for the MXU only; the kernel stores just the first
    # network_dim columns, so the output array itself stays narrow.
    w3_cols = max(128, ((network_dim + 127) // 128) * 128)
    if w3_cols != network_dim:
        w3 = jnp.pad(w3, ((0, 0), (0, w3_cols - network_dim)))

    if use_bf16:
        # The MXU is a bf16 unit on v5e/v6e/v7x; accumulation stays f32.
        w2 = w2.astype(jnp.bfloat16)
        w3 = w3.astype(jnp.bfloat16)

    # ---- batch tiling: big tiles amortize per-step overhead, but keep the
    # grid >= 2 so both v7x TensorCores get work under "parallel". ----
    num_tiles = max(2, -(-n // tile_target))                 # cdiv, floor 2
    tile_m = max(8, ((-(-n // num_tiles) + 7) // 8) * 8)     # rows per tile, /8
    pad_n = tile_m * num_tiles
    xp = x if pad_n == n else jnp.pad(x, ((0, pad_n - n), (0, 0)))

    full = lambda i: (0, 0)  # constant index_map -> weights stay VMEM-resident

    wbytes = sum(int(a.size) * a.dtype.itemsize
                 for a in (w1, w2, w3, b1, b2, b3))
    cost = pl.CostEstimate(
        flops=2 * pad_n * (data_dim * hidden + hidden * hidden
                           + hidden * network_dim),
        transcendentals=0,
        bytes_accessed=pad_n * (data_dim + network_dim) * 4 + wbytes,
    )

    out = pl.pallas_call(
        mlp_kernel,
        out_shape=jax.ShapeDtypeStruct((pad_n, network_dim), jnp.float32),
        grid_spec=pltpu.PrefetchScalarGridSpec(
            num_scalar_prefetch=0,
            grid=(num_tiles,),
            in_specs=[
                pl.BlockSpec((tile_m, data_dim), lambda i: (i, 0)),  # x tile
                pl.BlockSpec((data_dim, hidden), full),              # W1^T
                pl.BlockSpec((1, hidden), full),                     # b1
                pl.BlockSpec((hidden, hidden), full),                # W2^T
                pl.BlockSpec((1, hidden), full),                     # b2
                pl.BlockSpec((hidden, w3_cols), full),               # W3^T (lane-padded)
                pl.BlockSpec((1, network_dim), full),                # b3 (narrow)
            ],
            out_specs=pl.BlockSpec((tile_m, network_dim), lambda i: (i, 0)),
        ),
        compiler_params=pltpu.CompilerParams(
            dimension_semantics=("parallel",),
            vmem_limit_bytes=32 * 1024 * 1024,
        ),
        cost_estimate=cost,
    )(xp, w1, b1, w2, b2, w3, b3)

    return out if pad_n == n else out[:n]


def init_params(key, data_dim, network_dim, hidden_features=256):
    """Deterministic init mimicking nn.Linear's U(-1/sqrt(fan_in), 1/sqrt(fan_in)).
    Weights stored already transposed: (in_features, out_features)."""
    # PyTorch module hard-codes outlayer = nn.Linear(256, network_dim).
    assert hidden_features == 256, "outlayer fan-in is hard-coded to 256 in `A`"
    ks = jax.random.split(key, 6)

    def lin(kw, kb, fan_in, fan_out):
        bound = 1.0 / jnp.sqrt(fan_in)
        w = jax.random.uniform(kw, (fan_in, fan_out), jnp.float32, -bound, bound)
        b = jax.random.uniform(kb, (1, fan_out), jnp.float32, -bound, bound)
        return w, b

    w1, b1 = lin(ks[0], ks[1], data_dim, hidden_features)
    w2, b2 = lin(ks[2], ks[3], hidden_features, hidden_features)
    w3, b3 = lin(ks[4], ks[5], 256, network_dim)
    return {"w1": w1, "b1": b1, "w2": w2, "b2": b2, "w3": w3, "b3": b3}


def reference_forward(x, p):
    h = jax.nn.leaky_relu(x @ p["w1"] + p["b1"], negative_slope=0.2)
    h = jax.nn.leaky_relu(h @ p["w2"] + p["b2"], negative_slope=0.2)
    return h @ p["w3"] + p["b3"]


if __name__ == "__main__":
    key = jax.random.PRNGKey(0)
    k_param, k_x = jax.random.split(key)

    data_dim = 3        # 3-D spatial coordinates
    network_dim = 3     # 3-D vector field output
    hidden_features = 256
    batch = 1024        # -> grid of 2 tiles of 512 rows (both v7x TCs busy)

    params = init_params(k_param, data_dim, network_dim, hidden_features)
    x = jax.random.normal(k_x, (batch, data_dim), jnp.float32)
    ref = reference_forward(x, params)

    # Exact-precision path (f32 weights): tight check vs reference.
    out_f32 = jax.block_until_ready(mlp_forward(x, params, use_bf16=False))
    assert out_f32.shape == (batch, network_dim)
    assert jnp.allclose(out_f32, ref, atol=1e-4, rtol=1e-4), "f32 mismatch"

    # Default fast path: bf16 matmul weights, f32 accumulation (all TPU gens).
    out_bf16 = jax.block_until_ready(mlp_forward(x, params))
    assert out_bf16.shape == (batch, network_dim)
    assert jnp.allclose(out_bf16, ref, atol=2e-2, rtol=2e-2), "bf16 mismatch"

    # Non-aligned batch exercises the row-padding / tile-clamp path.
    out_small = jax.block_until_ready(mlp_forward(x[:100], params))
    assert out_small.shape == (100, network_dim)
    assert jnp.allclose(out_small, ref[:100], atol=2e-2, rtol=2e-2), "pad mismatch"

    print("KERNEL_OK")
</pallas_src>

<mosaic_0001>
module attributes {stable_mosaic.version = 11 : i64} {
  func.func @mlp_kernel(%arg0: i32, %arg1: memref<512x3xf32, #tpu.memory_space<vmem>>, %arg2: memref<3x256xf32, #tpu.memory_space<vmem>>, %arg3: memref<1x256xf32, #tpu.memory_space<vmem>>, %arg4: memref<256x256xf32, #tpu.memory_space<vmem>>, %arg5: memref<1x256xf32, #tpu.memory_space<vmem>>, %arg6: memref<256x128xf32, #tpu.memory_space<vmem>>, %arg7: memref<1x3xf32, #tpu.memory_space<vmem>>, %arg8: memref<512x3xf32, #tpu.memory_space<vmem>>) attributes {dimension_semantics = [#tpu.dimension_semantics<parallel>], iteration_bounds = array<i64: 2>, scalar_prefetch = 0 : i64, scratch_operands = 0 : i64, tpu.core_type = #tpu.core_type<tc>, window_params = [{transform_indices = @transform_0, window_bounds = array<i64: 512, 3>}, {pipeline_mode = #tpu.pipeline_mode<synchronous>, transform_indices = @transform_1, window_bounds = array<i64: 3, 256>}, {pipeline_mode = #tpu.pipeline_mode<synchronous>, transform_indices = @transform_2, window_bounds = array<i64: 1, 256>}, {pipeline_mode = #tpu.pipeline_mode<synchronous>, transform_indices = @transform_3, window_bounds = array<i64: 256, 256>}, {pipeline_mode = #tpu.pipeline_mode<synchronous>, transform_indices = @transform_4, window_bounds = array<i64: 1, 256>}, {pipeline_mode = #tpu.pipeline_mode<synchronous>, transform_indices = @transform_5, window_bounds = array<i64: 256, 128>}, {pipeline_mode = #tpu.pipeline_mode<synchronous>, transform_indices = @transform_6, window_bounds = array<i64: 1, 3>}, {transform_indices = @transform_7, window_bounds = array<i64: 512, 3>}]} {
    %c0 = arith.constant 0 : index
    %c0_0 = arith.constant 0 : index
    %0 = vector.load %arg1[%c0, %c0_0] : memref<512x3xf32, #tpu.memory_space<vmem>>, vector<512x3xf32>
    %c0_1 = arith.constant 0 : index
    %c0_2 = arith.constant 0 : index
    %1 = vector.load %arg2[%c0_1, %c0_2] : memref<3x256xf32, #tpu.memory_space<vmem>>, vector<3x256xf32>
    %2 = vector.extract_strided_slice %0 {offsets = [0, 0], sizes = [512, 1], strides = [1, 1]} : vector<512x3xf32> to vector<512x1xf32>
    %3 = vector.extract_strided_slice %1 {offsets = [0, 0], sizes = [1, 256], strides = [1, 1]} : vector<3x256xf32> to vector<1x256xf32>
    %4 = vector.broadcast %2 : vector<512x1xf32> to vector<512x256xf32>
    %5 = vector.broadcast %3 : vector<1x256xf32> to vector<512x256xf32>
    %6 = arith.mulf %4, %5 : vector<512x256xf32>
    %7 = vector.extract_strided_slice %0 {offsets = [0, 1], sizes = [512, 1], strides = [1, 1]} : vector<512x3xf32> to vector<512x1xf32>
    %8 = vector.extract_strided_slice %1 {offsets = [1, 0], sizes = [1, 256], strides = [1, 1]} : vector<3x256xf32> to vector<1x256xf32>
    %9 = vector.broadcast %7 : vector<512x1xf32> to vector<512x256xf32>
    %10 = vector.broadcast %8 : vector<1x256xf32> to vector<512x256xf32>
    %11 = arith.mulf %9, %10 : vector<512x256xf32>
    %12 = arith.addf %6, %11 : vector<512x256xf32>
    %13 = vector.extract_strided_slice %0 {offsets = [0, 2], sizes = [512, 1], strides = [1, 1]} : vector<512x3xf32> to vector<512x1xf32>
    %14 = vector.extract_strided_slice %1 {offsets = [2, 0], sizes = [1, 256], strides = [1, 1]} : vector<3x256xf32> to vector<1x256xf32>
    %15 = vector.broadcast %13 : vector<512x1xf32> to vector<512x256xf32>
    %16 = vector.broadcast %14 : vector<1x256xf32> to vector<512x256xf32>
    %17 = arith.mulf %15, %16 : vector<512x256xf32>
    %18 = arith.addf %12, %17 : vector<512x256xf32>
    %c0_3 = arith.constant 0 : index
    %c0_4 = arith.constant 0 : index
    %19 = vector.load %arg3[%c0_3, %c0_4] : memref<1x256xf32, #tpu.memory_space<vmem>>, vector<1x256xf32>
    %20 = vector.broadcast %19 : vector<1x256xf32> to vector<512x256xf32>
    %21 = arith.addf %18, %20 : vector<512x256xf32>
    %cst = arith.constant 2.000000e-01 : f32
    %22 = vector.broadcast %cst : f32 to vector<512x256xf32>
    %23 = arith.mulf %22, %21 : vector<512x256xf32>
    %24 = arith.maximumf %21, %23 : vector<512x256xf32>
    %c0_5 = arith.constant 0 : index
    %c0_6 = arith.constant 0 : index
    %25 = vector.load %arg4[%c0_5, %c0_6] : memref<256x256xf32, #tpu.memory_space<vmem>>, vector<256x256xf32>
    %cst_7 = arith.constant dense<0.000000e+00> : vector<512x256xf32>
    %26 = tpu.matmul %24, %25, %cst_7 {dimension_numbers = #tpu.dot_dimension_numbers<[1], [0], [0], [1], [0, 0, 1, 1], [], []>} : vector<512x256xf32>, vector<256x256xf32>, vector<512x256xf32> -> vector<512x256xf32>
    %c0_8 = arith.constant 0 : index
    %c0_9 = arith.constant 0 : index
    %27 = vector.load %arg5[%c0_8, %c0_9] : memref<1x256xf32, #tpu.memory_space<vmem>>, vector<1x256xf32>
    %28 = vector.broadcast %27 : vector<1x256xf32> to vector<512x256xf32>
    %29 = arith.addf %26, %28 : vector<512x256xf32>
    %cst_10 = arith.constant 2.000000e-01 : f32
    %30 = vector.broadcast %cst_10 : f32 to vector<512x256xf32>
    %31 = arith.mulf %30, %29 : vector<512x256xf32>
    %32 = arith.maximumf %29, %31 : vector<512x256xf32>
    %c0_11 = arith.constant 0 : index
    %c0_12 = arith.constant 0 : index
    %33 = vector.load %arg6[%c0_11, %c0_12] : memref<256x128xf32, #tpu.memory_space<vmem>>, vector<256x128xf32>
    %cst_13 = arith.constant dense<0.000000e+00> : vector<512x128xf32>
    %34 = tpu.matmul %32, %33, %cst_13 {dimension_numbers = #tpu.dot_dimension_numbers<[1], [0], [0], [1], [0, 0, 1, 1], [], []>} : vector<512x256xf32>, vector<256x128xf32>, vector<512x128xf32> -> vector<512x128xf32>
    %35 = vector.extract_strided_slice %34 {offsets = [0, 0], sizes = [512, 3], strides = [1, 1]} : vector<512x128xf32> to vector<512x3xf32>
    %c0_14 = arith.constant 0 : index
    %c0_15 = arith.constant 0 : index
    %36 = vector.load %arg7[%c0_14, %c0_15] : memref<1x3xf32, #tpu.memory_space<vmem>>, vector<1x3xf32>
    %37 = vector.broadcast %36 : vector<1x3xf32> to vector<512x3xf32>
    %38 = arith.addf %35, %37 : vector<512x3xf32>
    %c0_16 = arith.constant 0 : index
    %c0_17 = arith.constant 0 : index
    %39 = vector.load %arg8[%c0_16, %c0_17] : memref<512x3xf32, #tpu.memory_space<vmem>>, vector<512x3xf32>
    tpu.vector_store %arg8[%c0_16, %c0_17], %38 {strides = array<i32>} : memref<512x3xf32, #tpu.memory_space<vmem>>, vector<512x3xf32>,
    return
  }
  func.func @transform_0(%arg0: i32) -> (i32, i32) {
    %c0_i32 = arith.constant 0 : i32
    %c0_i32_0 = arith.constant 0 : i32
    return %arg0, %c0_i32 : i32, i32
  }
  func.func @transform_1(%arg0: i32) -> (i32, i32) {
    %c0_i32 = arith.constant 0 : i32
    %c0_i32_0 = arith.constant 0 : i32
    %c0_i32_1 = arith.constant 0 : i32
    return %c0_i32, %c0_i32_0 : i32, i32
  }
  func.func @transform_2(%arg0: i32) -> (i32, i32) {
    %c0_i32 = arith.constant 0 : i32
    %c0_i32_0 = arith.constant 0 : i32
    %c0_i32_1 = arith.constant 0 : i32
    return %c0_i32, %c0_i32_0 : i32, i32
  }
  func.func @transform_3(%arg0: i32) -> (i32, i32) {
    %c0_i32 = arith.constant 0 : i32
    %c0_i32_0 = arith.constant 0 : i32
    %c0_i32_1 = arith.constant 0 : i32
    return %c0_i32, %c0_i32_0 : i32, i32
  }
  func.func @transform_4(%arg0: i32) -> (i32, i32) {
    %c0_i32 = arith.constant 0 : i32
    %c0_i32_0 = arith.constant 0 : i32
    %c0_i32_1 = arith.constant 0 : i32
    return %c0_i32, %c0_i32_0 : i32, i32
  }
  func.func @transform_5(%arg0: i32) -> (i32, i32) {
    %c0_i32 = arith.constant 0 : i32
    %c0_i32_0 = arith.constant 0 : i32
    %c0_i32_1 = arith.constant 0 : i32
    return %c0_i32, %c0_i32_0 : i32, i32
  }
  func.func @transform_6(%arg0: i32) -> (i32, i32) {
    %c0_i32 = arith.constant 0 : i32
    %c0_i32_0 = arith.constant 0 : i32
    %c0_i32_1 = arith.constant 0 : i32
    return %c0_i32, %c0_i32_0 : i32, i32
  }
  func.func @transform_7(%arg0: i32) -> (i32, i32) {
    %c0_i32 = arith.constant 0 : i32
    %c0_i32_0 = arith.constant 0 : i32
    return %arg0, %c0_i32 : i32, i32
  }
}

</mosaic_0001>

<bundles_post_ra>
// kernel: mlp_forward.1
= control target key start
LH: loop header
LB: loop body
LE: loop exit
PB: predicated region body
PF: predicated region fallthrough
CT: control target
= control target key end

     0   :  { %s4179_s24 = smov 0   ;;  %s6914_s0 = inlined_call_operand.vmem [shape: f32[1024,3], index: 0, kind: input, shape index: {}]   ;;  %s6915_s1 = inlined_call_operand.vmem [shape: f32[3,256], index: 1, kind: input, shape index: {}]   ;;  %s6916_s2 = inlined_call_operand.vmem [shape: f32[1,256], index: 2, kind: input, shape index: {}]   ;;  %s6917_s3 = inlined_call_operand.vmem [shape: f32[256,256], index: 3, kind: input, shape index: {}]   ;;  %s6918_s4 = inlined_call_operand.vmem [shape: f32[1,256], index: 4, kind: input, shape index: {}]   ;;  %s6919_s5 = inlined_call_operand.vmem [shape: f32[256,128], index: 5, kind: input, shape index: {}]   ;;  %s6920_s6 = inlined_call_operand.vmem [shape: f32[1,3], index: 6, kind: input, shape index: {}]   ;;  %s6921_s7 = inlined_call_operand.vmem [shape: f32[1024,3], index: 7, kind: output, shape index: {}]  }
   0x1 LB: > { %s4029_s25 = sadd.s32 4294967295, %s4134_s24   ;;  %p4033_p0 = scmp.ge.s32.totalorder %s4134_s24, 1  ;;  %s4134_s24 = sphi %s4179_s24, %s17_s24  }
   0x2   : > { %p238_p1 = scmp.lt.s32.totalorder %s4134_s24, 3 }
   0x4   : > { %p239_p2 = pnand %p4033_p0, %p238_p1 }
   0x6   : > { %242 = sbr.rel (%p239_p2) target bundleno = 1326 (0x52e), region = 48 }
   0xb   : > { %s4034_s26 = sshll.u32 %s4029_s25, 6  ;;  %v6926_v0 = vmov 0   ;;  %v6924_v14 = vmov 2   ;;  %v6922_v15 = vmov 1   ;;  %v2258_v25 = vld [vmem:[%s6917_s3 + $0xf0] sm:$0xff]  ;;  %v2256_v28 = vld [vmem:[%s6917_s3 + $0xe0] sm:$0xff] }
   0xc   : > { %4085 = vset.pattern.permute.xlu2 %v6926_v0  ;;  %4084 = vset.pattern.permute.xlu1 %v6926_v0  ;;  %p271_p3 = scmp.lt.s32.totalorder %s4034_s26, 127  ;;  %v2290_v26 = vld [vmem:[%s6917_s3 + $0x1f0] sm:$0xff]  ;;  %v2288_v29 = vld [vmem:[%s6917_s3 + $0x1e0] sm:$0xff]  ;;  %vm3908_vm0 = vcmask 23552  }
   0xd   : > { %4083 = vset.pattern.permute.xlu0 %v6926_v0  ;;  %4040 = vmatpush.msra.mxu2 %v2258_v25  ;;  %v2254_v30 = vld [vmem:[%s6917_s3 + $0xd0] sm:$0xff]  ;;  %v2252_v32 = vld [vmem:[%s6917_s3 + $0xc0] sm:$0xff] }
   0xe   : > { %s7304_s26 = smov (!%p271_p3, %s4034_s26), 127  ;;  %4056 = vmatpush.msra.mxu3 %v2290_v26  ;;  %2298 = vmatpush.msra.mxu0 %v2258_v25  ;;  %v2286_v31 = vld [vmem:[%s6917_s3 + $0x1d0] sm:$0xff]  ;;  %v2284_v34 = vld [vmem:[%s6917_s3 + $0x1c0] sm:$0xff] }
   0xf   : > { %s4035_s27 = sshll.u32 %s7304_s26, 3  ;;  %4041 = vmatpush.msra.mxu2 %v2256_v28  ;;  %2507 = vmatpush.msra.mxu1 %v2290_v26  ;;  %v2250_v35 = vld [vmem:[%s6917_s3 + $0xb0] sm:$0xff]  ;;  %v2248_v38 = vld [vmem:[%s6917_s3 + $0xa0] sm:$0xff] }
  0x10   : > { %s4198_s30 = scalar_lea.vmem %s6914_s0, %s4035_s27  ;;  %4057 = vmatpush.msra.mxu3 %v2288_v29  ;;  %2299 = vmatpush.msra.mxu0 %v2256_v28  ;;  %v2282_v36 = vld [vmem:[%s6917_s3 + $0x1b0] sm:$0xff]  ;;  %v2280_v39 = vld [vmem:[%s6917_s3 + $0x1a0] sm:$0xff]  ;;  %s6469_s17 = scalar_lea.vmem %s6921_s7, %s4035_s27 }
  0x11   : > { %v4201_v1 = vld [vmem:[%s4198_s30 + $0x20] sm:$0xff]  ;;  %v4204_v2 = vld [vmem:[%s4198_s30 + $0x10] sm:$0xff]  ;;  %v287_v4 = vld [vmem:[%s4198_s30 + $0x28] sm:$0xff]  ;;  %4042 = vmatpush.msra.mxu2 %v2254_v30  ;;  %2508 = vmatpush.msra.mxu1 %v2288_v29 }
  0x12   : > { %v4207_v3 = vld [vmem:[%s4198_s30] sm:$0xff]  ;;  %369 = vperm.xlu2 %4085, %v4201_v1   ;;  %359 = vperm.xlu1 %4084, %v4204_v2   ;;  %v4214_v5 = vld [vmem:[%s4198_s30 + $0x18] sm:$0xff]  ;;  %v4217_v6 = vld [vmem:[%s4198_s30 + $0x8] sm:$0xff] }
  0x13   : > { %349 = vperm.xlu0 %4083, %v4207_v3   ;;  %v290_v7 = vld [vmem:[%s4198_s30 + $0x40] sm:$0xff]  ;;  %v4223_v8 = vld [vmem:[%s4198_s30 + $0x38] sm:$0xff]  ;;  %v4226_v9 = vld [vmem:[%s4198_s30 + $0x30] sm:$0xff]  ;;  %4058 = vmatpush.msra.mxu3 %v2286_v31 }
  0x14   : > { %v293_v10 = vld [vmem:[%s4198_s30 + $0x58] sm:$0xff]  ;;  %v292_v11 = vld [vmem:[%s4198_s30 + $0x50] sm:$0xff]  ;;  %v291_v12 = vld [vmem:[%s4198_s30 + $0x48] sm:$0xff]  ;;  %2300 = vmatpush.msra.mxu0 %v2254_v30  ;;  %4043 = vmatpush.msra.mxu2 %v2252_v32 }
  0x15   : > { %v314_v13 = vld [vmem:[%s4198_s30 + $0x100] sm:$0xff]  ;;  %v315_v16 = vld [vmem:[%s4198_s30 + $0x108] sm:$0xff]  ;;  %v316_v17 = vld [vmem:[%s4198_s30 + $0x110] sm:$0xff]  ;;  %2509 = vmatpush.msra.mxu1 %v2286_v31  ;;  %4059 = vmatpush.msra.mxu3 %v2284_v34 }
  0x16   : > { %v317_v18 = vld [vmem:[%s4198_s30 + $0x118] sm:$0xff]  ;;  %v318_v19 = vld [vmem:[%s4198_s30 + $0x120] sm:$0xff]  ;;  %v319_v20 = vld [vmem:[%s4198_s30 + $0x128] sm:$0xff]  ;;  %4044 = vmatpush.msra.mxu2 %v2250_v35  ;;  %2301 = vmatpush.msra.mxu0 %v2252_v32 }
  0x17   : > { %v320_v21 = vld [vmem:[%s4198_s30 + $0x130] sm:$0xff]  ;;  %v321_v22 = vld [vmem:[%s4198_s30 + $0x138] sm:$0xff]  ;;  %v322_v24 = vld [vmem:[%s4198_s30 + $0x140] sm:$0xff]  ;;  %4060 = vmatpush.msra.mxu3 %v2282_v36  ;;  %2510 = vmatpush.msra.mxu1 %v2284_v34 }
  0x18   : > { %v323_v33 = vld [vmem:[%s4198_s30 + $0x148] sm:$0xff]  ;;  %v2246_v40 = vld [vmem:[%s6917_s3 + $0x90] sm:$0xff]  ;;  %4045 = vmatpush.msra.mxu2 %v2248_v38  ;;  %2302 = vmatpush.msra.mxu0 %v2250_v35  ;;  %v2244_v43 = vld [vmem:[%s6917_s3 + $0x80] sm:$0xff] }
  0x19   : > { %v2278_v41 = vld [vmem:[%s6917_s3 + $0x190] sm:$0xff]  ;;  %4061 = vmatpush.msra.mxu3 %v2280_v39  ;;  %2511 = vmatpush.msra.mxu1 %v2282_v36  ;;  %v2276_v44 = vld [vmem:[%s6917_s3 + $0x180] sm:$0xff]  ;;  %v325_v53 = vld [vmem:[%s4198_s30 + $0x158] sm:$0xff] }
  0x1a   : > { %374 = vperm.xlu2 %4085, %v287_v4   ;;  %364 = vperm.xlu1 %4084, %v4214_v5   ;;  %v324_v42 = vld [vmem:[%s4198_s30 + $0x150] sm:$0xff]  ;;  %v2240_v50 = vld [vmem:[%s6917_s3 + $0x60] sm:$0xff] }
  0x1b   : > { %354 = vperm.xlu0 %4083, %v4217_v6   ;;  %4046 = vmatpush.msra.mxu2 %v2246_v40  ;;  %v2242_v45 = vld [vmem:[%s6917_s3 + $0x70] sm:$0xff]  ;;  %v2272_v51 = vld [vmem:[%s6917_s3 + $0x160] sm:$0xff] }
  0x1c   : > { %2303 = vmatpush.msra.mxu0 %v2248_v38  ;;  %4062 = vmatpush.msra.mxu3 %v2278_v41  ;;  %v2274_v48 = vld [vmem:[%s6917_s3 + $0x170] sm:$0xff]  ;;  %v2236_v55 = vld [vmem:[%s6917_s3 + $0x40] sm:$0xff] }
  0x1d   : > { %2512 = vmatpush.msra.mxu1 %v2280_v39  ;;  %4047 = vmatpush.msra.mxu2 %v2244_v43  ;;  %v2238_v52 = vld [vmem:[%s6917_s3 + $0x50] sm:$0xff]  ;;  %v2268_v56 = vld [vmem:[%s6917_s3 + $0x140] sm:$0xff] }
  0x1e   : > { %4063 = vmatpush.msra.mxu3 %v2276_v44  ;;  %2304 = vmatpush.msra.mxu0 %v2246_v40  ;;  %v2270_v54 = vld [vmem:[%s6917_s3 + $0x150] sm:$0xff]  ;;  %v2232_v62 = vld [vmem:[%s6917_s3 + $0x20] sm:$0xff] }
  0x1f   : > { %4048 = vmatpush.msra.mxu2 %v2242_v45  ;;  %2513 = vmatpush.msra.mxu1 %v2278_v41  ;;  %v2234_v58 = vld [vmem:[%s6917_s3 + $0x30] sm:$0xff]  ;;  %v2264_v63 = vld [vmem:[%s6917_s3 + $0x120] sm:$0xff] }
  0x20   : > { %4064 = vmatpush.msra.mxu3 %v2274_v48  ;;  %2305 = vmatpush.msra.mxu0 %v2244_v43  ;;  %v2266_v61 = vld [vmem:[%s6917_s3 + $0x130] sm:$0xff]  ;;  %v326_v4 = vld [vmem:[%s4198_s30 + $0x160] sm:$0xff] }
  0x21   : > { %4049 = vmatpush.msra.mxu2 %v2240_v50  ;;  %2514 = vmatpush.msra.mxu1 %v2276_v44  ;;  %v328_v31 = vld [vmem:[%s4198_s30 + $0x170] sm:$0xff]  ;;  %v1838_v44 = vld [vmem:[%s6916_s2] sm:$0x3] }
  0x22   : > { %389 = vperm.xlu2 %4085, %v290_v7   ;;  %384 = vperm.xlu1 %4084, %v4223_v8   ;;  %v2230_v7 = vld [vmem:[%s6917_s3 + $0x10] sm:$0xff] }
  0x23   : > { %379 = vperm.xlu0 %4083, %v4226_v9   ;;  %4065 = vmatpush.msra.mxu3 %v2272_v51 }
  0x24   : > { %4050 = vmatpush.msra.mxu2 %v2238_v52  ;;  %2306 = vmatpush.msra.mxu0 %v2242_v45 }
  0x25   : > { %4066 = vmatpush.msra.mxu3 %v2270_v54  ;;  %2515 = vmatpush.msra.mxu1 %v2274_v48 }
  0x26   : > { %4051 = vmatpush.msra.mxu2 %v2236_v55  ;;  %2307 = vmatpush.msra.mxu0 %v2240_v50 }
  0x27   : > { %4067 = vmatpush.msra.mxu3 %v2268_v56  ;;  %2516 = vmatpush.msra.mxu1 %v2272_v51 }
  0x28   : > { %4052 = vmatpush.msra.mxu2 %v2234_v58  ;;  %2308 = vmatpush.msra.mxu0 %v2238_v52  ;;  %v329_v52 = vld [vmem:[%s4198_s30 + $0x178] sm:$0xff] }
  0x29   : > { %4068 = vmatpush.msra.mxu3 %v2266_v61  ;;  %2517 = vmatpush.msra.mxu1 %v2270_v54 }
  0x2a   : > { %404 = vperm.xlu2 %4085, %v293_v10   ;;  %399 = vperm.xlu1 %4084, %v292_v11   ;;  %v2262_v10 = vld [vmem:[%s6917_s3 + $0x110] sm:$0xff]  ;;  %v2228_v11 = vld [vmem:[%s6917_s3] sm:$0xff] }
  0x2b   : > { %394 = vperm.xlu0 %4083, %v291_v12   ;;  %4053 = vmatpush.msra.mxu2 %v2232_v62 }
  0x2c   : > { %4069 = vmatpush.msra.mxu3 %v2264_v63  ;;  %2309 = vmatpush.msra.mxu0 %v2236_v55  ;;  %v4405_v55 = vperm.slane %v1838_v44, 0 }
  0x2d   : > { %4054 = vmatpush.msra.mxu2 %v2230_v7  ;;  %2518 = vmatpush.msra.mxu1 %v2268_v56  ;;  %v4407_v56 = vperm.slane %v1838_v44, 1 }
  0x2e   : > { %4070 = vmatpush.msra.mxu3 %v2262_v10  ;;  %2310 = vmatpush.msra.mxu0 %v2234_v58 }
  0x2f   : > { %4055 = vmatpush.msra.mxu2 %v2228_v11  ;;  %2519 = vmatpush.msra.mxu1 %v2266_v61 }
  0x30   : > { %2311 = vmatpush.msra.mxu0 %v2232_v62 }
  0x31   : > { %2520 = vmatpush.msra.mxu1 %v2264_v63 }
  0x32   : > { %4087 = vset.pattern.permute.xlu2 %v6924_v14  ;;  %4086 = vset.pattern.permute.xlu1 %v6922_v15 }
  0x33   : > { %509 = vperm.xlu0 %4083, %v314_v13   ;;  %1449 = vperm.xlu2 %4087, %v314_v13  }
  0x34   : > { %931 = vperm.xlu1 %4086, %v314_v13   ;;  %v2260_v13 = vld [vmem:[%s6917_s3 + $0x100] sm:$0xff]  ;;  %2312 = vmatpush.msra.mxu0 %v2230_v7 }
  0x35   : > { %4071 = vmatpush.msra.mxu3 %v2260_v13  ;;  %2521 = vmatpush.msra.mxu1 %v2262_v10 }
  0x36   : > { %2313 = vmatpush.msra.mxu0 %v2228_v11 }
  0x37   : > { %2522 = vmatpush.msra.mxu1 %v2260_v13 }
  0x3b   : > { %514 = vperm.xlu0 %4083, %v315_v16   ;;  %1453 = vperm.xlu2 %4087, %v315_v16  }
  0x3c   : > { %935 = vperm.xlu1 %4086, %v315_v16  }
  0x43   : > { %519 = vperm.xlu0 %4083, %v316_v17   ;;  %1457 = vperm.xlu2 %4087, %v316_v17  }
  0x44   : > { %939 = vperm.xlu1 %4086, %v316_v17  }
  0x4b   : > { %524 = vperm.xlu0 %4083, %v317_v18   ;;  %1461 = vperm.xlu2 %4087, %v317_v18  }
  0x4c   : > { %943 = vperm.xlu1 %4086, %v317_v18   ;;  %v327_v18 = vld [vmem:[%s4198_s30 + $0x168] sm:$0xff] }
  0x53   : > { %529 = vperm.xlu0 %4083, %v318_v19   ;;  %1465 = vperm.xlu2 %4087, %v318_v19  }
  0x54   : > { %947 = vperm.xlu1 %4086, %v318_v19  }
  0x5b   : > { %534 = vperm.xlu0 %4083, %v319_v20   ;;  %1469 = vperm.xlu2 %4087, %v319_v20  }
  0x5c   : > { %951 = vperm.xlu1 %4086, %v319_v20   ;;  %v346_v20 = vld [vmem:[%s6915_s1] sm:$0x77] }
  0x5d   : > { %v1577_v25 = vperm.slane %v346_v20, 6  ;;  %v1058_v26 = vperm.slane %v346_v20, 1  ;;  %v1059_v28 = vperm.slane %v346_v20, 5  ;;  %v668_v29 = vperm.slane %v346_v20, 0 }
  0x5e   : > { %v669_v30 = vperm.slane %v346_v20, 4 }
  0x5f   : > { %v4383_v34 = vperm.slane %v1058_v26, 1  ;;  %v4385_v35 = vperm.slane %v1059_v28, 1  ;;  %v4387_v36 = vperm.slane %v668_v29, 0  ;;  %v330_v28 = vld [vmem:[%s4198_s30 + $0x180] sm:$0xff] }
  0x60   : > { %v4389_v38 = vperm.slane %v669_v30, 0 }
  0x63   : > { %539 = vperm.xlu0 %4083, %v320_v21   ;;  %1473 = vperm.xlu2 %4087, %v320_v21  }
  0x64   : > { %955 = vperm.xlu1 %4086, %v320_v21  }
  0x6b   : > { %544 = vperm.xlu0 %4083, %v321_v22   ;;  %1477 = vperm.xlu2 %4087, %v321_v22  }
  0x6c   : > { %959 = vperm.xlu1 %4086, %v321_v22   ;;  %v4243_v23 = vpop.permute.xlu2 %369 }
  0x73   : > { %549 = vperm.xlu0 %4083, %v322_v24   ;;  %1481 = vperm.xlu2 %4087, %v322_v24  }
  0x74   : > { %963 = vperm.xlu1 %4086, %v322_v24   ;;  %v4252_v27 = vpop.permute.xlu2 %374  ;;  %v1576_v24 = vperm.slane %v346_v20, 2 }
  0x76   : > { %v4379_v32 = vperm.slane %v1576_v24, 2 }
  0x7b   : > { %554 = vperm.xlu0 %4083, %v323_v33   ;;  %1485 = vperm.xlu2 %4087, %v323_v33  }
  0x7c   : > { %967 = vperm.xlu1 %4086, %v323_v33   ;;  %v4279_v37 = vpop.permute.xlu2 %389  ;;  %v4381_v33 = vperm.slane %v1577_v25, 2 }
  0x83   : > { %559 = vperm.xlu0 %4083, %v324_v42   ;;  %1489 = vperm.xlu2 %4087, %v324_v42  }
  0x84   : > { %971 = vperm.xlu1 %4086, %v324_v42   ;;  %v4303_v46 = vpop.permute.xlu1 %359  ;;  %v4305_v47 = vpop.permute.xlu2 %404 }
  0x85   : > { %v4310_v49 = vpop.permute.xlu0 %349 }
  0x8b   : > { %564 = vperm.xlu0 %4083, %v325_v53   ;;  %1493 = vperm.xlu2 %4087, %v325_v53  }
  0x8c   : > { %975 = vperm.xlu1 %4086, %v325_v53   ;;  %v4331_v57 = vpop.permute.xlu1 %364 }
  0x8d   : > { %v4336_v59 = vpop.permute.xlu0 %354  ;;  %v4338_v60 = vpop.permute.xlu2 %1449 }
  0x8e   : > { %v1646_v45 = vmul.f32 %v4379_v32, %v4338_v60  ;;  %v1647_v48 = vmul.f32 %v4381_v33, %v4338_v60 }
  0x93   : > { %569 = vperm.xlu0 %4083, %v326_v4   ;;  %1497 = vperm.xlu2 %4087, %v326_v4  }
  0x94   : > { %979 = vperm.xlu1 %4086, %v326_v4   ;;  %v4359_v12 = vpop.permute.xlu1 %384 }
  0x95   : > { %v4364_v16 = vpop.permute.xlu0 %379  ;;  %v4366_v17 = vpop.permute.xlu2 %1453 }
  0x96   : > { %v1648_v25 = vmul.f32 %v4379_v32, %v4366_v17  ;;  %v1649_v26 = vmul.f32 %v4381_v33, %v4366_v17 }
  0x9b   : > { %574 = vperm.xlu0 %4083, %v327_v18   ;;  %1501 = vperm.xlu2 %4087, %v327_v18  }
  0x9c   : > { %983 = vperm.xlu1 %4086, %v327_v18   ;;  %v4369_v19 = vpop.permute.xlu1 %399 }
  0x9d   : > { %v4374_v21 = vpop.permute.xlu0 %394  ;;  %v4376_v22 = vpop.permute.xlu2 %1457 }
  0xa3   : > { %579 = vperm.xlu0 %4083, %v328_v31   ;;  %1505 = vperm.xlu2 %4087, %v328_v31  }
  0xa4   : > { %987 = vperm.xlu1 %4086, %v328_v31  }
  0xa5   : > { %v510_v39 = vpop.permute.xlu0 %509  ;;  %v4391_v40 = vpop.permute.xlu2 %1461 }
  0xa6   : > { %v738_v41 = vmul.f32 %v4387_v36, %v510_v39  ;;  %v739_v42 = vmul.f32 %v4389_v38, %v510_v39  ;;  %v932_v43 = vpop.permute.xlu1 %931 }
  0xa7   : > { %v1128_v50 = vmul.f32 %v4383_v34, %v932_v43  ;;  %v1129_v51 = vmul.f32 %v4385_v35, %v932_v43 }
  0xa9   : > { %v1256_v53 = vadd.f32 %v1128_v50, %v738_v41  ;;  %v1257_v54 = vadd.f32 %v1129_v51, %v739_v42 }
  0xab   : > { %584 = vperm.xlu0 %4083, %v329_v52   ;;  %1509 = vperm.xlu2 %4087, %v329_v52   ;;  %v1774_v58 = vadd.f32 %v1646_v45, %v1256_v53  ;;  %v1775_v61 = vadd.f32 %v1647_v48, %v1257_v54 }
  0xac   : > { %991 = vperm.xlu1 %4086, %v329_v52  }
  0xad   : > { %v515_v62 = vpop.permute.xlu0 %514  ;;  %v4409_v63 = vpop.permute.xlu2 %1465  ;;  %v1908_v60 = vadd.f32 %v4405_v55, %v1774_v58  ;;  %v1909_v4 = vadd.f32 %v4407_v56, %v1775_v61  ;;  %v1650_v61 = vmul.f32 %v4379_v32, %v4376_v22 }
  0xae   : > { %v740_v7 = vmul.f32 %v4387_v36, %v515_v62  ;;  %v741_v10 = vmul.f32 %v4389_v38, %v515_v62  ;;  %v936_v11 = vpop.permute.xlu1 %935  ;;  %v1651_v62 = vmul.f32 %v4381_v33, %v4376_v22 }
  0xaf   : > { %v1130_v13 = vmul.f32 %v4383_v34, %v936_v11  ;;  %v1131_v18 = vmul.f32 %v4385_v35, %v936_v11  ;;  %v2036_v20 = vmul.f32 0.2, %v1908_v60  ;;  %v2037_v24 = vmul.f32 0.2, %v1909_v4 }
  0xb1   : > { %v1258_v29 = vadd.f32 %v1130_v13, %v740_v7  ;;  %v1259_v30 = vadd.f32 %v1131_v18, %v741_v10  ;;  %v4422_v31 = vmax.f32 %v1908_v60, %v2036_v20  ;;  %v4424_v39 = vmax.f32 %v1909_v4, %v2037_v24  ;;  %v331_v60 = vld [vmem:[%s4198_s30 + $0x188] sm:$0xff] }
  0xb3   : > { %6998 = vst [vmem:[#allocation2_spill] sm:$0xff] %v4422_v31  ;;  %589 = vperm.xlu0 %4083, %v330_v28   ;;  %2410 = vmatmul.f32.vlgmr.msra.gmra.mxu2 %v4422_v31  ;;  %v1776_v41 = vadd.f32 %v1648_v25, %v1258_v29  ;;  %v1777_v42 = vadd.f32 %v1649_v26, %v1259_v30 }
  0xb4   : > { %6999 = vst [vmem:[#allocation3_spill] sm:$0xff] %v4424_v39  ;;  %2619 = vmatmul.f32.vlgmr.msra.gmra.mxu3 %v4424_v39  ;;  %1513 = vperm.xlu2 %4087, %v330_v28  }
  0xb5   : > { %995 = vperm.xlu1 %4086, %v330_v28   ;;  %v520_v43 = vpop.permute.xlu0 %519  ;;  %v4428_v44 = vpop.permute.xlu2 %1469  ;;  %v1910_v17 = vadd.f32 %v4405_v55, %v1776_v41  ;;  %v1911_v45 = vadd.f32 %v4407_v56, %v1777_v42 }
  0xb6   : > { %v742_v48 = vmul.f32 %v4387_v36, %v520_v43  ;;  %v743_v50 = vmul.f32 %v4389_v38, %v520_v43  ;;  %v940_v51 = vpop.permute.xlu1 %939 }
  0xb7   : > { %v1132_v52 = vmul.f32 %v4383_v34, %v940_v51  ;;  %v1133_v53 = vmul.f32 %v4385_v35, %v940_v51  ;;  %v2038_v54 = vmul.f32 0.2, %v1910_v17  ;;  %v2039_v58 = vmul.f32 0.2, %v1911_v45 }
  0xb9   : > { %v1260_v4 = vadd.f32 %v1132_v52, %v742_v48  ;;  %v1261_v7 = vadd.f32 %v1133_v53, %v743_v50  ;;  %v4441_v10 = vmax.f32 %v1910_v17, %v2038_v54  ;;  %v4443_v11 = vmax.f32 %v1911_v45, %v2039_v58  ;;  %v4460_v48 = vld [vmem:[%s4198_s30 + $0x1b0] sm:$0xff] }
  0xba   : > { %v1652_v17 = vmul.f32 %v4379_v32, %v4391_v40  ;;  %v1653_v45 = vmul.f32 %v4381_v33, %v4391_v40  ;;  %v332_v54 = vld [vmem:[%s4198_s30 + $0x190] sm:$0xff] }
  0xbb   : > { %7000 = vst [vmem:[#allocation4_spill] sm:$0xff] %v4441_v10  ;;  %594 = vperm.xlu0 %4083, %v331_v60   ;;  %2413 = vmatmul.f32.gmra.mxu2 %v4441_v10  ;;  %v1778_v13 = vadd.f32 %v1650_v61, %v1260_v4  ;;  %v1779_v18 = vadd.f32 %v1651_v62, %v1261_v7 }
  0xbc   : > { %7001 = vst [vmem:[#allocation5_spill] sm:$0xff] %v4443_v11  ;;  %2622 = vmatmul.f32.gmra.mxu3 %v4443_v11  ;;  %1517 = vperm.xlu2 %4087, %v331_v60  }
  0xbd   : > { %999 = vperm.xlu1 %4086, %v331_v60   ;;  %v525_v20 = vpop.permute.xlu0 %524  ;;  %v4447_v24 = vpop.permute.xlu2 %1473  ;;  %v1912_v22 = vadd.f32 %v4405_v55, %v1778_v13  ;;  %v1913_v25 = vadd.f32 %v4407_v56, %v1779_v18 }
  0xbe   : > { %v744_v26 = vmul.f32 %v4387_v36, %v525_v20  ;;  %v745_v28 = vmul.f32 %v4389_v38, %v525_v20  ;;  %v944_v29 = vpop.permute.xlu1 %943 }
  0xbf   : > { %v1134_v30 = vmul.f32 %v4383_v34, %v944_v29  ;;  %v1135_v41 = vmul.f32 %v4385_v35, %v944_v29  ;;  %v2040_v42 = vmul.f32 0.2, %v1912_v22  ;;  %v2041_v43 = vmul.f32 0.2, %v1913_v25 }
  0xc0   : > { %v1655_v29 = vmul.f32 %v4381_v33, %v4409_v63 }
  0xc1   : > { %v1262_v50 = vadd.f32 %v1134_v30, %v744_v26  ;;  %v1263_v51 = vadd.f32 %v1135_v41, %v745_v28  ;;  %v4462_v52 = vmax.f32 %v1912_v22, %v2040_v42  ;;  %v4464_v53 = vmax.f32 %v1913_v25, %v2041_v43  ;;  %v4486_v30 = vld [vmem:[%s4198_s30 + $0x1b8] sm:$0xff] }
  0xc2   : > { %v1654_v28 = vmul.f32 %v4379_v32, %v4409_v63 }
  0xc3   : > { %7002 = vst [vmem:[#allocation6_spill] sm:$0xff] %v4462_v52  ;;  %619 = vperm.xlu0 %4083, %v4460_v48   ;;  %2416 = vmatmul.f32.gmra.mxu2 %v4462_v52  ;;  %v1780_v58 = vadd.f32 %v1652_v17, %v1262_v50  ;;  %v1781_v61 = vadd.f32 %v1653_v45, %v1263_v51 }
  0xc4   : > { %7003 = vst [vmem:[#allocation7_spill] sm:$0xff] %v4464_v53  ;;  %2625 = vmatmul.f32.gmra.mxu3 %v4464_v53  ;;  %4089 = vset.pattern.permute.xlu2 %v6926_v0  ;;  %v5024_v53 = vld [vmem:[%s4198_s30 + $0x88] sm:$0xff] }
  0xc5   : > { %4088 = vset.pattern.permute.xlu1 %v6924_v14  ;;  %599 = vperm.xlu2 %4089, %v332_v54   ;;  %v530_v40 = vpop.permute.xlu0 %529  ;;  %v4472_v62 = vpop.permute.xlu2 %1477  ;;  %v1914_v60 = vadd.f32 %v4405_v55, %v1780_v58  ;;  %v1915_v4 = vadd.f32 %v4407_v56, %v1781_v61 }
  0xc6   : > { %1321 = vperm.xlu1 %4088, %v4207_v3   ;;  %v746_v7 = vmul.f32 %v4387_v36, %v530_v40  ;;  %v747_v13 = vmul.f32 %v4389_v38, %v530_v40  ;;  %v948_v18 = vpop.permute.xlu1 %947 }
  0xc7   : > { %v1136_v20 = vmul.f32 %v4383_v34, %v948_v18  ;;  %v1137_v22 = vmul.f32 %v4385_v35, %v948_v18  ;;  %v2042_v25 = vmul.f32 0.2, %v1914_v60  ;;  %v2043_v26 = vmul.f32 0.2, %v1915_v4 }
  0xc9   : > { %v1264_v41 = vadd.f32 %v1136_v20, %v746_v7  ;;  %v1265_v42 = vadd.f32 %v1137_v22, %v747_v13  ;;  %v4488_v43 = vmax.f32 %v1914_v60, %v2042_v25  ;;  %v4490_v17 = vmax.f32 %v1915_v4, %v2043_v26 }
  0xca   : > { %v1656_v20 = vmul.f32 %v4379_v32, %v4428_v44  ;;  %v1657_v25 = vmul.f32 %v4381_v33, %v4428_v44 }
  0xcb   : > { %7004 = vst [vmem:[#allocation8_spill] sm:$0xff] %v4488_v43  ;;  %624 = vperm.xlu0 %4083, %v4486_v30   ;;  %2419 = vmatmul.f32.gmra.mxu2 %v4488_v43  ;;  %v1782_v45 = vadd.f32 %v1654_v28, %v1264_v41  ;;  %v1783_v50 = vadd.f32 %v1655_v29, %v1265_v42 }
  0xcc   : > { %7005 = vst [vmem:[#allocation9_spill] sm:$0xff] %v4490_v17  ;;  %2628 = vmatmul.f32.gmra.mxu3 %v4490_v17 }
  0xcd   : > { %4091 = vset.pattern.permute.xlu2 %v6924_v14  ;;  %v535_v51 = vpop.permute.xlu0 %534  ;;  %v4496_v63 = vpop.permute.xlu2 %1481  ;;  %v1916_v58 = vadd.f32 %v4405_v55, %v1782_v45  ;;  %v1917_v61 = vadd.f32 %v4407_v56, %v1783_v50  ;;  %v333_v45 = vld [vmem:[%s4198_s30 + $0x198] sm:$0xff] }
  0xce   : > { %4090 = vset.pattern.permute.xlu1 %v6922_v15  ;;  %v748_v40 = vmul.f32 %v4387_v36, %v535_v51  ;;  %v749_v60 = vmul.f32 %v4389_v38, %v535_v51  ;;  %1521 = vperm.xlu2 %4091, %v332_v54   ;;  %v952_v4 = vpop.permute.xlu1 %951 }
  0xcf   : > { %v1138_v7 = vmul.f32 %v4383_v34, %v952_v4  ;;  %v1139_v13 = vmul.f32 %v4385_v35, %v952_v4  ;;  %1003 = vperm.xlu1 %4090, %v332_v54   ;;  %v2044_v18 = vmul.f32 0.2, %v1916_v58  ;;  %v2045_v22 = vmul.f32 0.2, %v1917_v61 }
  0xd1   : > { %v1266_v26 = vadd.f32 %v1138_v7, %v748_v40  ;;  %v1267_v28 = vadd.f32 %v1139_v13, %v749_v60  ;;  %v4509_v29 = vmax.f32 %v1916_v58, %v2044_v18  ;;  %v4511_v41 = vmax.f32 %v1917_v61, %v2045_v22 }
  0xd2   : > { %v1658_v18 = vmul.f32 %v4379_v32, %v4447_v24 }
  0xd3   : > { %7006 = vst [vmem:[#allocation10_spill] sm:$0xff] %v4509_v29  ;;  %4100 = vset.pattern.permute.xlu0 %v6922_v15  ;;  %2422 = vmatmul.f32.gmra.mxu2 %v4509_v29  ;;  %v1784_v42 = vadd.f32 %v1656_v20, %v1266_v26  ;;  %v1785_v54 = vadd.f32 %v1657_v25, %v1267_v28 }
  0xd4   : > { %7007 = vst [vmem:[#allocation11_spill] sm:$0xff] %v4511_v41  ;;  %2631 = vmatmul.f32.gmra.mxu3 %v4511_v41  ;;  %803 = vperm.xlu0 %4100, %v4207_v3   ;;  %v1659_v20 = vmul.f32 %v4381_v33, %v4447_v24  ;;  %v4935_v41 = vld [vmem:[%s4198_s30 + $0x1f8] sm:$0xff] }
  0xd5   : > { %v540_v50 = vpop.permute.xlu0 %539  ;;  %v4518_v51 = vpop.permute.xlu2 %1485  ;;  %v1918_v44 = vadd.f32 %v4405_v55, %v1784_v42  ;;  %v1919_v58 = vadd.f32 %v4407_v56, %v1785_v54 }
  0xd6   : > { %v750_v61 = vmul.f32 %v4387_v36, %v540_v50  ;;  %v751_v40 = vmul.f32 %v4389_v38, %v540_v50  ;;  %4093 = vset.pattern.permute.xlu2 %v6926_v0  ;;  %v956_v60 = vpop.permute.xlu1 %955 }
  0xd7   : > { %v1140_v4 = vmul.f32 %v4383_v34, %v956_v60  ;;  %v1141_v7 = vmul.f32 %v4385_v35, %v956_v60  ;;  %4092 = vset.pattern.permute.xlu1 %v6924_v14  ;;  %604 = vperm.xlu2 %4093, %v333_v45   ;;  %v2046_v3 = vmul.f32 0.2, %v1918_v44  ;;  %v2047_v13 = vmul.f32 0.2, %v1919_v58 }
  0xd8   : > { %1325 = vperm.xlu1 %4092, %v4217_v6  }
  0xd9   : > { %v1268_v22 = vadd.f32 %v1140_v4, %v750_v61  ;;  %v1269_v25 = vadd.f32 %v1141_v7, %v751_v40  ;;  %v4533_v26 = vmax.f32 %v1918_v44, %v2046_v3  ;;  %v4535_v28 = vmax.f32 %v1919_v58, %v2047_v13 }
  0xda   : > { %v1660_v13 = vmul.f32 %v4379_v32, %v4472_v62 }
  0xdb   : > { %7008 = vst [vmem:[#allocation12_spill] sm:$0xff] %v4533_v26  ;;  %2425 = vmatmul.f32.gmra.mxu2 %v4533_v26  ;;  %v1786_v42 = vadd.f32 %v1658_v18, %v1268_v22  ;;  %v1787_v54 = vadd.f32 %v1659_v20, %v1269_v25  ;;  %v1661_v18 = vmul.f32 %v4381_v33, %v4472_v62  ;;  %v334_v62 = vld [vmem:[%s4198_s30 + $0x1a0] sm:$0xff]  ;;  %v4879_v26 = vld [vmem:[%s4198_s30 + $0x1f0] sm:$0xff] }
  0xdc   : > { %7009 = vst [vmem:[#allocation13_spill] sm:$0xff] %v4535_v28  ;;  %2634 = vmatmul.f32.gmra.mxu3 %v4535_v28  ;;  %807 = vperm.xlu0 %4100, %v4217_v6  }
  0xdd   : > { %v545_v50 = vpop.permute.xlu0 %544  ;;  %v4540_v60 = vpop.permute.xlu2 %1489  ;;  %v1920_v24 = vadd.f32 %v4405_v55, %v1786_v42  ;;  %v1921_v61 = vadd.f32 %v4407_v56, %v1787_v54 }
  0xde   : > { %v752_v44 = vmul.f32 %v4387_v36, %v545_v50  ;;  %v753_v58 = vmul.f32 %v4389_v38, %v545_v50  ;;  %v960_v40 = vpop.permute.xlu1 %959 }
  0xdf   : > { %v1142_v4 = vmul.f32 %v4383_v34, %v960_v40  ;;  %v1143_v7 = vmul.f32 %v4385_v35, %v960_v40  ;;  %4094 = vset.pattern.permute.xlu2 %v6922_v15  ;;  %v2048_v3 = vmul.f32 0.2, %v1920_v24  ;;  %v2049_v6 = vmul.f32 0.2, %v1921_v61 }
  0xe0   : > { %1525 = vperm.xlu1 %4092, %v333_v45   ;;  %811 = vperm.xlu2 %4094, %v4204_v2  }
  0xe1   : > { %v1270_v20 = vadd.f32 %v1142_v4, %v752_v44  ;;  %v1271_v22 = vadd.f32 %v1143_v7, %v753_v58  ;;  %v4554_v25 = vmax.f32 %v1920_v24, %v2048_v3  ;;  %v4556_v42 = vmax.f32 %v1921_v61, %v2049_v6 }
  0xe2   : > { %v1663_v6 = vmul.f32 %v4381_v33, %v4496_v63 }
  0xe3   : > { %7010 = vst [vmem:[#allocation14_spill] sm:$0xff] %v4554_v25  ;;  %2428 = vmatmul.f32.gmra.mxu2 %v4554_v25  ;;  %v1788_v54 = vadd.f32 %v1660_v13, %v1270_v20  ;;  %v1789_v50 = vadd.f32 %v1661_v18, %v1271_v22 }
  0xe4   : > { %7011 = vst [vmem:[#allocation15_spill] sm:$0xff] %v4556_v42  ;;  %2637 = vmatmul.f32.gmra.mxu3 %v4556_v42  ;;  %1007 = vperm.xlu0 %4100, %v333_v45   ;;  %v1662_v45 = vmul.f32 %v4379_v32, %v4496_v63 }
  0xe5   : > { %v550_v40 = vpop.permute.xlu0 %549  ;;  %v4560_v15 = vpop.permute.xlu2 %1493  ;;  %v1922_v14 = vadd.f32 %v4405_v55, %v1788_v54  ;;  %v1923_v2 = vadd.f32 %v4407_v56, %v1789_v50 }
  0xe6   : > { %v754_v24 = vmul.f32 %v4387_v36, %v550_v40  ;;  %v755_v61 = vmul.f32 %v4389_v38, %v550_v40  ;;  %v964_v44 = vpop.permute.xlu1 %963 }
  0xe7   : > { %v1144_v58 = vmul.f32 %v4383_v34, %v964_v44  ;;  %v1145_v4 = vmul.f32 %v4385_v35, %v964_v44  ;;  %v2050_v7 = vmul.f32 0.2, %v1922_v14  ;;  %v2051_v3 = vmul.f32 0.2, %v1923_v2 }
  0xe8   : > { %4095 = vset.pattern.permute.xlu1 %v6926_v0  ;;  %1011 = vperm.xlu2 %4094, %v334_v62  }
  0xe9   : > { %v1272_v13 = vadd.f32 %v1144_v58, %v754_v24  ;;  %v1273_v18 = vadd.f32 %v1145_v4, %v755_v61  ;;  %609 = vperm.xlu1 %4095, %v334_v62   ;;  %v4574_v20 = vmax.f32 %v1922_v14, %v2050_v7  ;;  %v4576_v22 = vmax.f32 %v1923_v2, %v2051_v3 }
  0xeb   : > { %7012 = vst [vmem:[#allocation16_spill] sm:$0xff] %v4574_v20  ;;  %2431 = vmatmul.f32.gmra.mxu2 %v4574_v20  ;;  %v1790_v54 = vadd.f32 %v1662_v45, %v1272_v13  ;;  %v1791_v50 = vadd.f32 %v1663_v6, %v1273_v18  ;;  %v1665_v45 = vmul.f32 %v4381_v33, %v4518_v51  ;;  %v7014_v18 = vmov 2  }
  0xec   : > { %7013 = vst [vmem:[#allocation17_spill] sm:$0xff] %v4576_v22  ;;  %2640 = vmatmul.f32.gmra.mxu3 %v4576_v22  ;;  %827 = vperm.xlu0 %4100, %v4226_v9   ;;  %v1664_v9 = vmul.f32 %v4379_v32, %v4518_v51  ;;  %v4117_v22 = vld [vmem:[%s4198_s30 + $0x20] sm:$0xff] }
  0xed   : > { %v555_v40 = vpop.permute.xlu0 %554  ;;  %v4581_v63 = vpop.permute.xlu2 %1497  ;;  %v1924_v44 = vadd.f32 %v4405_v55, %v1790_v54  ;;  %v1925_v24 = vadd.f32 %v4407_v56, %v1791_v50 }
  0xee   : > { %v756_v14 = vmul.f32 %v4387_v36, %v555_v40  ;;  %v757_v2 = vmul.f32 %v4389_v38, %v555_v40  ;;  %v968_v61 = vpop.permute.xlu1 %967 }
  0xef   : > { %v1146_v58 = vmul.f32 %v4383_v34, %v968_v61  ;;  %v1147_v4 = vmul.f32 %v4385_v35, %v968_v61  ;;  %v2052_v7 = vmul.f32 0.2, %v1924_v44  ;;  %v2053_v3 = vmul.f32 0.2, %v1925_v24 }
  0xf0   : > { %815 = vperm.xlu2 %4094, %v4214_v5   ;;  %v4605_v5 = vld [vmem:[%s4198_s30 + $0x1a8] sm:$0xff] }
  0xf1   : > { %v1274_v6 = vadd.f32 %v1146_v58, %v756_v14  ;;  %v1275_v13 = vadd.f32 %v1147_v4, %v757_v2  ;;  %4096 = vset.pattern.permute.xlu1 %v7014_v18  ;;  %v4595_v54 = vmax.f32 %v1924_v44, %v2052_v7  ;;  %v4597_v50 = vmax.f32 %v1925_v24, %v2053_v3 }
  0xf2   : > { %1529 = vperm.xlu1 %4096, %v334_v62   ;;  %v1666_v3 = vmul.f32 %v4379_v32, %v4540_v60 }
  0xf3   : > { %7015 = vst [vmem:[#allocation18_spill] sm:$0xff] %v4595_v54  ;;  %2434 = vmatmul.f32.gmra.mxu2 %v4595_v54  ;;  %v1792_v40 = vadd.f32 %v1664_v9, %v1274_v6  ;;  %v1793_v61 = vadd.f32 %v1665_v45, %v1275_v13  ;;  %v1667_v9 = vmul.f32 %v4381_v33, %v4540_v60 }
  0xf4   : > { %7016 = vst [vmem:[#allocation19_spill] sm:$0xff] %v4597_v50  ;;  %2643 = vmatmul.f32.gmra.mxu3 %v4597_v50  ;;  %831 = vperm.xlu0 %4100, %v4223_v8  }
  0xf5   : > { %v560_v51 = vpop.permute.xlu0 %559  ;;  %v4602_v0 = vpop.permute.xlu2 %1501  ;;  %v1926_v14 = vadd.f32 %v4405_v55, %v1792_v40  ;;  %v1927_v44 = vadd.f32 %v4407_v56, %v1793_v61  ;;  %v4623_v61 = vld [vmem:[%s4198_s30 + $0x1c8] sm:$0xff] }
  0xf6   : > { %v758_v62 = vmul.f32 %v4387_v36, %v560_v51  ;;  %v759_v24 = vmul.f32 %v4389_v38, %v560_v51  ;;  %v972_v2 = vpop.permute.xlu1 %971  ;;  %v7019_v51 = vmov 0  }
  0xf7   : > { %v1148_v58 = vmul.f32 %v4383_v34, %v972_v2  ;;  %v1149_v4 = vmul.f32 %v4385_v35, %v972_v2  ;;  %v2054_v8 = vmul.f32 0.2, %v1926_v14  ;;  %v2055_v7 = vmul.f32 0.2, %v1927_v44 }
  0xf8   : > { %1015 = vperm.xlu2 %4094, %v4605_v5  }
  0xf9   : > { %v1276_v45 = vadd.f32 %v1148_v58, %v758_v62  ;;  %v1277_v6 = vadd.f32 %v1149_v4, %v759_v24  ;;  %v4618_v13 = vmax.f32 %v1926_v14, %v2054_v8  ;;  %v4620_v40 = vmax.f32 %v1927_v44, %v2055_v7 }
  0xfa   : > { %4097 = vset.pattern.permute.xlu1 %v7019_v51 }
  0xfb   : > { %7017 = vst [vmem:[#allocation20_spill] sm:$0xff] %v4618_v13  ;;  %614 = vperm.xlu1 %4097, %v4605_v5   ;;  %2437 = vmatmul.f32.gmra.mxu2 %v4618_v13  ;;  %v1794_v2 = vadd.f32 %v1666_v3, %v1276_v45  ;;  %v1795_v50 = vadd.f32 %v1667_v9, %v1277_v6 }
  0xfc   : > { %7018 = vst [vmem:[#allocation21_spill] sm:$0xff] %v4620_v40  ;;  %2646 = vmatmul.f32.gmra.mxu3 %v4620_v40  ;;  %1031 = vperm.xlu0 %4100, %v4623_v61   ;;  %v1668_v45 = vmul.f32 %v4379_v32, %v4560_v15  ;;  %v1669_v6 = vmul.f32 %v4381_v33, %v4560_v15 }
  0xfd   : > { %v565_v60 = vpop.permute.xlu0 %564  ;;  %v4630_v62 = vpop.permute.xlu2 %1505  ;;  %v1928_v14 = vadd.f32 %v4405_v55, %v1794_v2  ;;  %v1929_v44 = vadd.f32 %v4407_v56, %v1795_v50 }
  0xfe   : > { %v760_v24 = vmul.f32 %v4387_v36, %v565_v60  ;;  %v761_v58 = vmul.f32 %v4389_v38, %v565_v60  ;;  %v976_v4 = vpop.permute.xlu1 %975 }
  0xff   : > { %v1150_v8 = vmul.f32 %v4383_v34, %v976_v4  ;;  %v1151_v7 = vmul.f32 %v4385_v35, %v976_v4  ;;  %v2056_v3 = vmul.f32 0.2, %v1928_v14  ;;  %v2057_v9 = vmul.f32 0.2, %v1929_v44 }
 0x100   : > { %4099 = vset.pattern.permute.xlu2 %v7014_v18  ;;  %v7022_v4 = vmov 1  }
 0x101   : > { %v1278_v50 = vadd.f32 %v1150_v8, %v760_v24  ;;  %v1279_v2 = vadd.f32 %v1151_v7, %v761_v58  ;;  %1337 = vperm.xlu2 %4099, %v4201_v1   ;;  %v4644_v60 = vmax.f32 %v1928_v14, %v2056_v3  ;;  %v4646_v40 = vmax.f32 %v1929_v44, %v2057_v9  ;;  %v2259_v44 = vld [vmem:[%s6917_s3 + $0xf8] sm:$0xff]  ;;  %v4118_v58 = vld [vmem:[%s4198_s30 + $0x10] sm:$0xff] }
 0x102   : > { %2716 = vmatpush.msrb.mxu2 %v2259_v44 }
 0x103   : > { %7020 = vst [vmem:[#allocation22_spill] sm:$0xff] %v4644_v60  ;;  %4098 = vset.pattern.permute.xlu1 %v7022_v4  ;;  %2440 = vmatmul.f32.gmra.mxu2 %v4644_v60  ;;  %v1796_v13 = vadd.f32 %v1668_v45, %v1278_v50  ;;  %v1797_v54 = vadd.f32 %v1669_v6, %v1279_v2 }
 0x104   : > { %7021 = vst [vmem:[#allocation23_spill] sm:$0xff] %v4646_v40  ;;  %819 = vperm.xlu1 %4098, %v4117_v22   ;;  %2649 = vmatmul.f32.gmra.mxu3 %v4646_v40 }
 0x105   : > { %4107 = vset.pattern.permute.xlu0 %v7014_v18  ;;  %v570_v15 = vpop.permute.xlu0 %569  ;;  %v4653_v24 = vpop.permute.xlu2 %1509  ;;  %v1930_v1 = vadd.f32 %v4405_v55, %v1796_v13  ;;  %v1931_v14 = vadd.f32 %v4407_v56, %v1797_v54  ;;  %v1670_v54 = vmul.f32 %v4379_v32, %v4581_v63  ;;  %v1671_v13 = vmul.f32 %v4381_v33, %v4581_v63 }
 0x106   : > { %1329 = vperm.xlu0 %4107, %v4118_v58   ;;  %v762_v8 = vmul.f32 %v4387_v36, %v570_v15  ;;  %v763_v22 = vmul.f32 %v4389_v38, %v570_v15  ;;  %v980_v7 = vpop.permute.xlu1 %979 }
 0x107   : > { %v1152_v3 = vmul.f32 %v4383_v34, %v980_v7  ;;  %v1153_v9 = vmul.f32 %v4385_v35, %v980_v7  ;;  %v2058_v45 = vmul.f32 0.2, %v1930_v1  ;;  %v2059_v6 = vmul.f32 0.2, %v1931_v14  ;;  %v2291_v7 = vld [vmem:[%s6917_s3 + $0x1f8] sm:$0xff] }
 0x108   : > { %2925 = vmatpush.msrb.mxu3 %v2291_v7 }
 0x109   : > { %v1280_v50 = vadd.f32 %v1152_v3, %v762_v8  ;;  %v1281_v2 = vadd.f32 %v1153_v9, %v763_v22  ;;  %1537 = vperm.xlu2 %4099, %v4460_v48   ;;  %v4670_v15 = vmax.f32 %v1930_v1, %v2058_v45  ;;  %v4672_v58 = vmax.f32 %v1931_v14, %v2059_v6  ;;  %v4119_v14 = vld [vmem:[%s4198_s30 + $0x18] sm:$0xff] }
 0x10b   : > { %7023 = vst [vmem:[#allocation24_spill] sm:$0xff] %v4670_v15  ;;  %2443 = vmatmul.f32.gmra.mxu2 %v4670_v15  ;;  %v1798_v44 = vadd.f32 %v1670_v54, %v1280_v50  ;;  %v1799_v40 = vadd.f32 %v1671_v13, %v1281_v2  ;;  %v1672_v50 = vmul.f32 %v4379_v32, %v4602_v0 }
 0x10c   : > { %7024 = vst [vmem:[#allocation25_spill] sm:$0xff] %v4672_v58  ;;  %1019 = vperm.xlu1 %4098, %v4460_v48   ;;  %2652 = vmatmul.f32.gmra.mxu3 %v4672_v58 }
 0x10d   : > { %v575_v63 = vpop.permute.xlu0 %574  ;;  %v1932_v8 = vadd.f32 %v4405_v55, %v1798_v44  ;;  %v1933_v1 = vadd.f32 %v4407_v56, %v1799_v40  ;;  %v1673_v40 = vmul.f32 %v4381_v33, %v4602_v0  ;;  %v4120_v44 = vld [vmem:[%s4198_s30 + $0x28] sm:$0xff] }
 0x10e   : > { %1333 = vperm.xlu0 %4107, %v4119_v14   ;;  %v764_v22 = vmul.f32 %v4387_v36, %v575_v63  ;;  %v765_v3 = vmul.f32 %v4389_v38, %v575_v63  ;;  %v4685_v9 = vpop.permute.xlu2 %1513  ;;  %v984_v45 = vpop.permute.xlu1 %983 }
 0x10f   : > { %v1154_v6 = vmul.f32 %v4383_v34, %v984_v45  ;;  %v1155_v48 = vmul.f32 %v4385_v35, %v984_v45  ;;  %v2060_v54 = vmul.f32 0.2, %v1932_v8  ;;  %v2061_v13 = vmul.f32 0.2, %v1933_v1 }
 0x111   : > { %v1282_v2 = vadd.f32 %v1154_v6, %v764_v22  ;;  %v1283_v7 = vadd.f32 %v1155_v48, %v765_v3  ;;  %1341 = vperm.xlu2 %4099, %v4120_v44   ;;  %v4694_v63 = vmax.f32 %v1932_v8, %v2060_v54  ;;  %v4696_v14 = vmax.f32 %v1933_v1, %v2061_v13  ;;  %v2257_v22 = vld [vmem:[%s6917_s3 + $0xe8] sm:$0xff] }
 0x112   : > { %2717 = vmatpush.msrb.mxu2 %v2257_v22  ;;  %v1674_v13 = vmul.f32 %v4379_v32, %v4630_v62 }
 0x113   : > { %7025 = vst [vmem:[#allocation26_spill] sm:$0xff] %v4694_v63  ;;  %v1800_v58 = vadd.f32 %v1672_v50, %v1282_v2  ;;  %v1801_v15 = vadd.f32 %v1673_v40, %v1283_v7  ;;  %2446 = vmatmul.f32.gmra.mxu2 %v4694_v63 }
 0x114   : > { %7026 = vst [vmem:[#allocation27_spill] sm:$0xff] %v4696_v14  ;;  %823 = vperm.xlu1 %4098, %v4120_v44   ;;  %2655 = vmatmul.f32.gmra.mxu3 %v4696_v14 }
 0x115   : > { %v580_v45 = vpop.permute.xlu0 %579  ;;  %v1934_v60 = vadd.f32 %v4405_v55, %v1800_v58  ;;  %v1935_v0 = vadd.f32 %v4407_v56, %v1801_v15 }
 0x116   : > { %1533 = vperm.xlu0 %4107, %v4605_v5   ;;  %v766_v8 = vmul.f32 %v4387_v36, %v580_v45  ;;  %v767_v1 = vmul.f32 %v4389_v38, %v580_v45  ;;  %v988_v3 = vpop.permute.xlu1 %987  ;;  %v4708_v6 = vpop.permute.xlu2 %1517  ;;  %v1675_v5 = vmul.f32 %v4381_v33, %v4630_v62 }
 0x117   : > { %v1156_v48 = vmul.f32 %v4383_v34, %v988_v3  ;;  %v1157_v58 = vmul.f32 %v4385_v35, %v988_v3  ;;  %v2062_v54 = vmul.f32 0.2, %v1934_v60  ;;  %v2063_v15 = vmul.f32 0.2, %v1935_v0 }
 0x119   : > { %v1284_v50 = vadd.f32 %v1156_v48, %v766_v8  ;;  %v1285_v40 = vadd.f32 %v1157_v58, %v767_v1  ;;  %1541 = vperm.xlu2 %4099, %v4486_v30   ;;  %v4717_v2 = vmax.f32 %v1934_v60, %v2062_v54  ;;  %v4719_v7 = vmax.f32 %v1935_v0, %v2063_v15  ;;  %v2289_v60 = vld [vmem:[%s6917_s3 + $0x1e8] sm:$0xff]  ;;  %v4730_v0 = vld [vmem:[%s4198_s30 + $0x40] sm:$0xff] }
 0x11a   : > { %2926 = vmatpush.msrb.mxu3 %v2289_v60  ;;  %v338_v15 = vld [vmem:[%s4198_s30 + $0x1c0] sm:$0xff] }
 0x11b   : > { %7027 = vst [vmem:[#allocation28_spill] sm:$0xff] %v4717_v2  ;;  %v1802_v44 = vadd.f32 %v1674_v13, %v1284_v50  ;;  %v1803_v45 = vadd.f32 %v1675_v5, %v1285_v40  ;;  %2449 = vmatmul.f32.gmra.mxu2 %v4717_v2  ;;  %v1676_v50 = vmul.f32 %v4379_v32, %v4653_v24  ;;  %v4122_v2 = vld [vmem:[%s4198_s30 + $0x30] sm:$0xff] }
 0x11c   : > { %7028 = vst [vmem:[#allocation29_spill] sm:$0xff] %v4719_v7  ;;  %1023 = vperm.xlu1 %4098, %v4486_v30   ;;  %2658 = vmatmul.f32.gmra.mxu3 %v4719_v7  ;;  %v1677_v40 = vmul.f32 %v4381_v33, %v4653_v24 }
 0x11d   : > { %v585_v22 = vpop.permute.xlu0 %584  ;;  %v1936_v62 = vadd.f32 %v4405_v55, %v1802_v44  ;;  %v1937_v8 = vadd.f32 %v4407_v56, %v1803_v45 }
 0x11e   : > { %1353 = vperm.xlu0 %4107, %v4730_v0   ;;  %v768_v30 = vmul.f32 %v4387_v36, %v585_v22  ;;  %v769_v1 = vmul.f32 %v4389_v38, %v585_v22  ;;  %v992_v3 = vpop.permute.xlu1 %991 }
 0x11f   : > { %v1158_v48 = vmul.f32 %v4383_v34, %v992_v3  ;;  %v1159_v58 = vmul.f32 %v4385_v35, %v992_v3  ;;  %v4737_v54 = vpop.permute.xlu2 %599  ;;  %v2064_v13 = vmul.f32 0.2, %v1936_v62  ;;  %v2065_v5 = vmul.f32 0.2, %v1937_v8 }
 0x121   : > { %v1286_v44 = vadd.f32 %v1158_v48, %v768_v30  ;;  %v1287_v45 = vadd.f32 %v1159_v58, %v769_v1  ;;  %4102 = vset.pattern.permute.xlu2 %v7019_v51  ;;  %v4745_v22 = vmax.f32 %v1936_v62, %v2064_v13  ;;  %v4747_v60 = vmax.f32 %v1937_v8, %v2065_v5  ;;  %v2255_v62 = vld [vmem:[%s6917_s3 + $0xd8] sm:$0xff]  ;;  %v4759_v8 = vld [vmem:[%s4198_s30 + $0x48] sm:$0xff] }
 0x122   : > { %629 = vperm.xlu2 %4102, %v338_v15   ;;  %2718 = vmatpush.msrb.mxu2 %v2255_v62 }
 0x123   : > { %7029 = vst [vmem:[#allocation30_spill] sm:$0xff] %v4745_v22  ;;  %v1804_v3 = vadd.f32 %v1676_v50, %v1286_v44  ;;  %v1805_v7 = vadd.f32 %v1677_v40, %v1287_v45  ;;  %2452 = vmatmul.f32.gmra.mxu2 %v4745_v22  ;;  %v4778_v22 = vld [vmem:[%s4198_s30 + $0x1d8] sm:$0xff] }
 0x124   : > { %7030 = vst [vmem:[#allocation31_spill] sm:$0xff] %v4747_v60  ;;  %4101 = vset.pattern.permute.xlu1 %v7014_v18  ;;  %2661 = vmatmul.f32.gmra.mxu3 %v4747_v60 }
 0x125   : > { %1345 = vperm.xlu1 %4101, %v4122_v2   ;;  %v590_v24 = vpop.permute.xlu0 %589  ;;  %v1938_v30 = vadd.f32 %v4405_v55, %v1804_v3  ;;  %v1939_v1 = vadd.f32 %v4407_v56, %v1805_v7  ;;  %v1678_v3 = vmul.f32 %v4379_v32, %v4685_v9 }
 0x126   : > { %1357 = vperm.xlu0 %4107, %v4759_v8   ;;  %v770_v48 = vmul.f32 %v4387_v36, %v590_v24  ;;  %v771_v58 = vmul.f32 %v4389_v38, %v590_v24  ;;  %v1679_v24 = vmul.f32 %v4381_v33, %v4685_v9  ;;  %v2287_v9 = vld [vmem:[%s6917_s3 + $0x1d8] sm:$0xff] }
 0x127   : > { %v996_v2 = vpop.permute.xlu1 %995  ;;  %v2066_v13 = vmul.f32 0.2, %v1938_v30  ;;  %v2067_v5 = vmul.f32 0.2, %v1939_v1  ;;  %2927 = vmatpush.msrb.mxu3 %v2287_v9 }
 0x128   : > { %v1160_v50 = vmul.f32 %v4383_v34, %v996_v2  ;;  %v1161_v7 = vmul.f32 %v4385_v35, %v996_v2  ;;  %v4766_v40 = vpop.permute.xlu2 %1521 }
 0x129   : > { %v4768_v44 = vmax.f32 %v1938_v30, %v2066_v13  ;;  %v4770_v45 = vmax.f32 %v1939_v1, %v2067_v5 }
 0x12a   : > { %v1288_v62 = vadd.f32 %v1160_v50, %v770_v48  ;;  %v1289_v60 = vadd.f32 %v1161_v7, %v771_v58  ;;  %4104 = vset.pattern.permute.xlu2 %v7014_v18 }
 0x12b   : > { %7031 = vst [vmem:[#allocation32_spill] sm:$0xff] %v4768_v44  ;;  %1545 = vperm.xlu2 %4104, %v338_v15   ;;  %2455 = vmatmul.f32.gmra.mxu2 %v4768_v44 }
 0x12c   : > { %7032 = vst [vmem:[#allocation33_spill] sm:$0xff] %v4770_v45  ;;  %v1806_v2 = vadd.f32 %v1678_v3, %v1288_v62  ;;  %v1807_v30 = vadd.f32 %v1679_v24, %v1289_v60  ;;  %2664 = vmatmul.f32.gmra.mxu3 %v4770_v45  ;;  %v1680_v62 = vmul.f32 %v4379_v32, %v4708_v6 }
 0x12d   : > { %4103 = vset.pattern.permute.xlu1 %v7022_v4  ;;  %v595_v1 = vpop.permute.xlu0 %594 }
 0x12e   : > { %1027 = vperm.xlu1 %4103, %v338_v15   ;;  %1557 = vperm.xlu0 %4107, %v4778_v22   ;;  %v772_v48 = vmul.f32 %v4387_v36, %v595_v1  ;;  %v773_v58 = vmul.f32 %v4389_v38, %v595_v1  ;;  %v1940_v13 = vadd.f32 %v4405_v55, %v1806_v2 }
 0x12f   : > { %v1000_v5 = vpop.permute.xlu1 %999  ;;  %v1941_v60 = vadd.f32 %v4407_v56, %v1807_v30  ;;  %v1681_v1 = vmul.f32 %v4381_v33, %v4708_v6 }
 0x130   : > { %v1162_v50 = vmul.f32 %v4383_v34, %v1000_v5  ;;  %v1163_v7 = vmul.f32 %v4385_v35, %v1000_v5  ;;  %v2068_v3 = vmul.f32 0.2, %v1940_v13  ;;  %v4806_v5 = vld [vmem:[%s4198_s30 + $0x1e0] sm:$0xff] }
 0x131   : > { %v4793_v24 = vpop.permute.xlu2 %604  ;;  %v2069_v15 = vmul.f32 0.2, %v1941_v60 }
 0x132   : > { %v1290_v2 = vadd.f32 %v1162_v50, %v772_v48  ;;  %v1291_v45 = vadd.f32 %v1163_v7, %v773_v58  ;;  %v4800_v30 = vmax.f32 %v1940_v13, %v2068_v3  ;;  %v2253_v58 = vld [vmem:[%s6917_s3 + $0xc8] sm:$0xff]  ;;  %v4124_v13 = vld [vmem:[%s4198_s30 + $0x38] sm:$0xff] }
 0x133   : > { %4106 = vset.pattern.permute.xlu2 %v7019_v51  ;;  %v4802_v9 = vmax.f32 %v1941_v60, %v2069_v15  ;;  %2719 = vmatpush.msrb.mxu2 %v2253_v58 }
 0x134   : > { %7033 = vst [vmem:[#allocation34_spill] sm:$0xff] %v4800_v30  ;;  %634 = vperm.xlu2 %4106, %v4623_v61   ;;  %v1808_v44 = vadd.f32 %v1680_v62, %v1290_v2  ;;  %v1809_v14 = vadd.f32 %v1681_v1, %v1291_v45  ;;  %2458 = vmatmul.f32.gmra.mxu2 %v4800_v30  ;;  %v2285_v1 = vld [vmem:[%s6917_s3 + $0x1c8] sm:$0xff] }
 0x135   : > { %7034 = vst [vmem:[#allocation35_spill] sm:$0xff] %v4802_v9  ;;  %2667 = vmatmul.f32.gmra.mxu3 %v4802_v9  ;;  %v4810_v6 = vpop.permute.xlu0 %619  ;;  %v774_v2 = vmul.f32 %v4387_v36, %v4737_v54 }
 0x136   : > { %4105 = vset.pattern.permute.xlu1 %v7014_v18  ;;  %4114 = vset.pattern.permute.xlu0 %v7019_v51  ;;  %v1942_v48 = vadd.f32 %v4405_v55, %v1808_v44  ;;  %v1943_v45 = vadd.f32 %v4407_v56, %v1809_v14  ;;  %v4829_v44 = vld [vmem:[%s4198_s30 + $0x1e8] sm:$0xff] }
 0x137   : > { %1349 = vperm.xlu1 %4105, %v4124_v13   ;;  %649 = vperm.xlu0 %4114, %v4806_v5   ;;  %v1682_v13 = vmul.f32 %v4379_v32, %v4766_v40 }
 0x138   : > { %v1322_v60 = vpop.permute.xlu1 %1321  ;;  %v2070_v50 = vmul.f32 0.2, %v1942_v48  ;;  %v2071_v7 = vmul.f32 0.2, %v1943_v45  ;;  %2928 = vmatpush.msrb.mxu3 %v2285_v1 }
 0x139   : > { %v1583_v42 = vmul.f32 %v4381_v33, %v1322_v60 }
 0x13a   : > { %v4821_v3 = vpop.permute.xlu2 %811  ;;  %v4823_v15 = vmax.f32 %v1942_v48, %v2070_v50  ;;  %v4825_v62 = vmax.f32 %v1943_v45, %v2071_v7  ;;  %v775_v48 = vmul.f32 %v4389_v38, %v4737_v54  ;;  %v1683_v45 = vmul.f32 %v4381_v33, %v4766_v40  ;;  %v340_v7 = vld [vmem:[%s4198_s30 + $0x1d0] sm:$0xff] }
 0x13b   : > { %v674_v54 = vmul.f32 %v4387_v36, %v4310_v49  ;;  %v675_v40 = vmul.f32 %v4389_v38, %v4310_v49 }
 0x13c   : > { %7035 = vst [vmem:[#allocation36_spill] sm:$0xff] %v4823_v15  ;;  %4108 = vset.pattern.permute.xlu2 %v7022_v4  ;;  %2461 = vmatmul.f32.gmra.mxu2 %v4823_v15  ;;  %v4855_v15 = vld [vmem:[%s4198_s30 + $0x60] sm:$0xff] }
 0x13d   : > { %7036 = vst [vmem:[#allocation37_spill] sm:$0xff] %v4825_v62  ;;  %2670 = vmatmul.f32.gmra.mxu3 %v4825_v62  ;;  %v4833_v14 = vpop.permute.xlu0 %624  ;;  %835 = vperm.xlu2 %4108, %v4730_v0  }
 0x13f   : > { %1549 = vperm.xlu1 %4105, %v4623_v61   ;;  %654 = vperm.xlu0 %4114, %v4829_v44  }
 0x141   : > { %v1004_v58 = vpop.permute.xlu1 %1003 }
 0x142   : > { %v1164_v0 = vmul.f32 %v4383_v34, %v1004_v58  ;;  %v1165_v50 = vmul.f32 %v4385_v35, %v1004_v58  ;;  %v4851_v61 = vpop.permute.xlu2 %1011 }
 0x144   : > { %v1292_v1 = vadd.f32 %v1164_v0, %v774_v2  ;;  %v1293_v62 = vadd.f32 %v1165_v50, %v775_v48  ;;  %v2251_v48 = vld [vmem:[%s6917_s3 + $0xb8] sm:$0xff]  ;;  %v1582_v0 = vmul.f32 %v4379_v32, %v1322_v60 }
 0x145   : > { %1035 = vperm.xlu2 %4108, %v340_v7   ;;  %2720 = vmatpush.msrb.mxu2 %v2251_v48 }
 0x146   : > { %v804_v9 = vpop.permute.xlu0 %803  ;;  %v1810_v30 = vadd.f32 %v1682_v13, %v1292_v1  ;;  %v1811_v63 = vadd.f32 %v1683_v45, %v1293_v62 }
 0x147   : > { %4109 = vset.pattern.permute.xlu1 %v7019_v51  ;;  %409 = vperm.xlu0 %4114, %v4855_v15   ;;  %v1064_v58 = vmul.f32 %v4383_v34, %v804_v9  ;;  %v1065_v2 = vmul.f32 %v4385_v35, %v804_v9 }
 0x148   : > { %639 = vperm.xlu1 %4109, %v340_v7   ;;  %v1944_v13 = vadd.f32 %v4405_v55, %v1810_v30  ;;  %v1945_v62 = vadd.f32 %v4407_v56, %v1811_v63 }
 0x149   : > { %v1192_v49 = vadd.f32 %v1064_v58, %v674_v54  ;;  %v1193_v45 = vadd.f32 %v1065_v2, %v675_v40  ;;  %v2283_v54 = vld [vmem:[%s6917_s3 + $0x1b8] sm:$0xff]  ;;  %v676_v40 = vmul.f32 %v4387_v36, %v4336_v59  ;;  %v677_v58 = vmul.f32 %v4389_v38, %v4336_v59 }
 0x14a   : > { %v1326_v50 = vpop.permute.xlu1 %1325  ;;  %v4871_v1 = vpop.permute.xlu2 %815  ;;  %v2072_v20 = vmul.f32 0.2, %v1944_v13  ;;  %v2073_v9 = vmul.f32 0.2, %v1945_v62  ;;  %2929 = vmatpush.msrb.mxu3 %v2283_v54 }
 0x14b   : > { %v1710_v30 = vadd.f32 %v1582_v0, %v1192_v49  ;;  %v1711_v63 = vadd.f32 %v1583_v42, %v1193_v45  ;;  %v1584_v59 = vmul.f32 %v4379_v32, %v1326_v50  ;;  %v1585_v49 = vmul.f32 %v4381_v33, %v1326_v50 }
 0x14c   : > { %v4874_v25 = vmax.f32 %v1944_v13, %v2072_v20  ;;  %v4876_v28 = vmax.f32 %v1945_v62, %v2073_v9  ;;  %v776_v50 = vmul.f32 %v4387_v36, %v4793_v24  ;;  %v1070_v29 = vmul.f32 %v4383_v34, %v4871_v1 }
 0x14d   : > { %839 = vperm.xlu2 %4108, %v4759_v8   ;;  %v1844_v20 = vadd.f32 %v4405_v55, %v1710_v30  ;;  %v1845_v48 = vadd.f32 %v4407_v56, %v1711_v63 }
 0x14e   : > { %7037 = vst [vmem:[#allocation38_spill] sm:$0xff] %v4874_v25  ;;  %2464 = vmatmul.f32.gmra.mxu2 %v4874_v25  ;;  %v808_v60 = vpop.permute.xlu0 %807  ;;  %2673 = vmatmul.f32.gmra.mxu3 %v4876_v28 }
 0x14f   : > { %7038 = vst [vmem:[#allocation39_spill] sm:$0xff] %v4876_v28  ;;  %659 = vperm.xlu0 %4114, %v4879_v26   ;;  %v1066_v42 = vmul.f32 %v4383_v34, %v808_v60  ;;  %v1067_v2 = vmul.f32 %v4385_v35, %v808_v60  ;;  %v1972_v8 = vmul.f32 0.2, %v1844_v20  ;;  %v1973_v9 = vmul.f32 0.2, %v1845_v48  ;;  %v4907_v28 = vld [vmem:[%s4198_s30 + $0x68] sm:$0xff] }
 0x150   : > { %4110 = vset.pattern.permute.xlu1 %v7014_v18 }
 0x151   : > { %v1194_v13 = vadd.f32 %v1066_v42, %v676_v40  ;;  %v1195_v62 = vadd.f32 %v1067_v2, %v677_v58  ;;  %1553 = vperm.xlu1 %4110, %v340_v7   ;;  %v4899_v0 = vmax.f32 %v1844_v20, %v1972_v8  ;;  %v4904_v60 = vmax.f32 %v1845_v48, %v1973_v9  ;;  %v2249_v7 = vld [vmem:[%s6917_s3 + $0xa8] sm:$0xff] }
 0x152   : > { %v1526_v45 = vpop.permute.xlu1 %1525  ;;  %v4901_v30 = vpop.permute.xlu2 %1015  ;;  %v777_v42 = vmul.f32 %v4389_v38, %v4793_v24  ;;  %2721 = vmatpush.msrb.mxu2 %v2249_v7 }
 0x153   : > { %2314 = vmatmul.f32.vlgmr.msra.gmra.mxu0 %v4899_v0  ;;  %v1712_v63 = vadd.f32 %v1584_v59, %v1194_v13  ;;  %v1713_v54 = vadd.f32 %v1585_v49, %v1195_v62  ;;  %2523 = vmatmul.f32.vlgmr.msra.gmra.mxu1 %v4904_v60  ;;  %v1684_v62 = vmul.f32 %v4379_v32, %v1526_v45 }
 0x154   : > { %v1685_v59 = vmul.f32 %v4381_v33, %v1526_v45 }
 0x155   : > { %1039 = vperm.xlu2 %4108, %v4778_v22   ;;  %v1846_v20 = vadd.f32 %v4405_v55, %v1712_v63  ;;  %v1847_v58 = vadd.f32 %v4407_v56, %v1713_v54 }
 0x156   : > { %v1008_v40 = vpop.permute.xlu0 %1007 }
 0x157   : > { %414 = vperm.xlu0 %4114, %v4907_v28   ;;  %v1166_v2 = vmul.f32 %v4383_v34, %v1008_v40  ;;  %v1167_v8 = vmul.f32 %v4385_v35, %v1008_v40  ;;  %v1974_v48 = vmul.f32 0.2, %v1846_v20  ;;  %v1975_v13 = vmul.f32 0.2, %v1847_v58 }
 0x159   : > { %v1294_v49 = vadd.f32 %v1166_v2, %v776_v50  ;;  %v1295_v9 = vadd.f32 %v1167_v8, %v777_v42  ;;  %4111 = vset.pattern.permute.xlu1 %v7019_v51  ;;  %v4927_v24 = vmax.f32 %v1846_v20, %v1974_v48  ;;  %v4929_v63 = vmax.f32 %v1847_v58, %v1975_v13  ;;  %v4125_v20 = vld [vmem:[%s4198_s30 + $0x50] sm:$0xff] }
 0x15a   : > { %644 = vperm.xlu1 %4111, %v4778_v22   ;;  %v2281_v22 = vld [vmem:[%s6917_s3 + $0x1a8] sm:$0xff]  ;;  %v1168_v13 = vmul.f32 %v4383_v34, %v4851_v61 }
 0x15b   : > { %7039 = vst [vmem:[#allocation40_spill] sm:$0xff] %v4927_v24  ;;  %v610_v54 = vpop.permute.xlu1 %609  ;;  %v4931_v7 = vpop.permute.xlu2 %1337  ;;  %v1812_v40 = vadd.f32 %v1684_v62, %v1294_v49  ;;  %v1813_v25 = vadd.f32 %v1685_v59, %v1295_v9  ;;  %2317 = vmatmul.f32.gmra.mxu0 %v4927_v24  ;;  %2526 = vmatmul.f32.gmra.mxu1 %v4929_v63  ;;  %v4964_v9 = vld [vmem:[%s4198_s30 + $0x70] sm:$0xff] }
 0x15c   : > { %7040 = vst [vmem:[#allocation41_spill] sm:$0xff] %v4929_v63  ;;  %2930 = vmatpush.msrb.mxu3 %v2281_v22  ;;  %v779_v2 = vmul.f32 %v4389_v38, %v610_v54  ;;  %v1169_v62 = vmul.f32 %v4385_v35, %v4851_v61  ;;  %v2247_v61 = vld [vmem:[%s6917_s3 + $0x98] sm:$0xff] }
 0x15d   : > { %v1946_v45 = vadd.f32 %v4405_v55, %v1812_v40  ;;  %v1947_v51 = vadd.f32 %v4407_v56, %v1813_v25  ;;  %4113 = vset.pattern.permute.xlu2 %v7014_v18  ;;  %v778_v25 = vmul.f32 %v4387_v36, %v610_v54  ;;  %2722 = vmatpush.msrb.mxu2 %v2247_v61 }
 0x15e   : > { %v4944_v50 = vpop.permute.xlu0 %827  ;;  %1361 = vperm.xlu2 %4113, %v4125_v20  }
 0x15f   : > { %664 = vperm.xlu0 %4114, %v4935_v41   ;;  %v2074_v58 = vmul.f32 0.2, %v1946_v45  ;;  %v2075_v42 = vmul.f32 0.2, %v1947_v51  ;;  %v1296_v54 = vadd.f32 %v1168_v13, %v778_v25 }
 0x161   : > { %v4950_v8 = vmax.f32 %v1946_v45, %v2074_v58  ;;  %v4953_v48 = vmax.f32 %v1947_v51, %v2075_v42 }
 0x162   : > { %4112 = vset.pattern.permute.xlu1 %v7022_v4  ;;  %v1297_v4 = vadd.f32 %v1169_v62, %v779_v2  ;;  %v4981_v62 = vld [vmem:[%s4198_s30 + $0x78] sm:$0xff] }
 0x163   : > { %7041 = vst [vmem:[#allocation42_spill] sm:$0xff] %v4950_v8  ;;  %843 = vperm.xlu1 %4112, %v4125_v20   ;;  %2467 = vmatmul.f32.gmra.mxu2 %v4950_v8  ;;  %v4960_v59 = vpop.permute.xlu2 %1537 }
 0x164   : > { %7042 = vst [vmem:[#allocation43_spill] sm:$0xff] %v4953_v48  ;;  %v1530_v49 = vpop.permute.xlu1 %1529  ;;  %2676 = vmatmul.f32.gmra.mxu3 %v4953_v48 }
 0x165   : > { %v1686_v40 = vmul.f32 %v4379_v32, %v1530_v49  ;;  %v1687_v45 = vmul.f32 %v4381_v33, %v1530_v49 }
 0x166   : > { %v4971_v51 = vpop.permute.xlu0 %831  ;;  %1561 = vperm.xlu2 %4113, %v4806_v5  }
 0x167   : > { %v1814_v22 = vadd.f32 %v1686_v40, %v1296_v54  ;;  %v1815_v20 = vadd.f32 %v1687_v45, %v1297_v4  ;;  %419 = vperm.xlu0 %4114, %v4964_v9   ;;  %v2279_v40 = vld [vmem:[%s6917_s3 + $0x198] sm:$0xff] }
 0x168   : > { %2931 = vmatpush.msrb.mxu3 %v2279_v40  ;;  %v679_v40 = vmul.f32 %v4389_v38, %v4303_v46 }
 0x169   : > { %v1948_v58 = vadd.f32 %v4405_v55, %v1814_v22  ;;  %v1949_v42 = vadd.f32 %v4407_v56, %v1815_v20  ;;  %v5001_v22 = vld [vmem:[%s4198_s30 + $0x80] sm:$0xff]  ;;  %v1068_v20 = vmul.f32 %v4383_v34, %v4821_v3 }
 0x16b   : > { %1043 = vperm.xlu1 %4112, %v4806_v5   ;;  %v4978_v25 = vpop.permute.xlu2 %1341  ;;  %v2076_v2 = vmul.f32 0.2, %v1948_v58  ;;  %v2077_v13 = vmul.f32 0.2, %v1949_v42  ;;  %v4126_v5 = vld [vmem:[%s4198_s30 + $0x58] sm:$0xff] }
 0x16d   : > { %v4983_v49 = vpop.permute.xlu1 %614  ;;  %v4985_v54 = vmax.f32 %v1948_v58, %v2076_v2  ;;  %v4987_v4 = vmax.f32 %v1949_v42, %v2077_v13  ;;  %v1069_v58 = vmul.f32 %v4385_v35, %v4821_v3  ;;  %v2245_v2 = vld [vmem:[%s6917_s3 + $0x88] sm:$0xff]  ;;  %v678_v13 = vmul.f32 %v4387_v36, %v4303_v46 }
 0x16e   : > { %v4992_v45 = vpop.permute.xlu0 %1031  ;;  %1365 = vperm.xlu2 %4113, %v4126_v5   ;;  %2723 = vmatpush.msrb.mxu2 %v2245_v2 }
 0x16f   : > { %7043 = vst [vmem:[#allocation44_spill] sm:$0xff] %v4985_v54  ;;  %424 = vperm.xlu0 %4114, %v4981_v62   ;;  %2470 = vmatmul.f32.gmra.mxu2 %v4985_v54  ;;  %v1197_v54 = vadd.f32 %v1069_v58, %v679_v40  ;;  %v680_v58 = vmul.f32 %v4387_v36, %v4331_v57  ;;  %v5047_v40 = vpop.f32.mrf.mxu3 }
 0x170   : > { %7044 = vst [vmem:[#allocation45_spill] sm:$0xff] %v4987_v4  ;;  %2679 = vmatmul.f32.gmra.mxu3 %v4987_v4  ;;  %v1196_v4 = vadd.f32 %v1068_v20, %v678_v13 }
 0x171   : > { %7046 = vst [vmem:[#allocation47_spill] sm:$0xff] %v5047_v40 }
 0x173   : > { %847 = vperm.xlu1 %4112, %v4126_v5   ;;  %v4998_v61 = vpop.permute.xlu2 %1541 }
 0x176   : > { %v820_v42 = vpop.permute.xlu1 %819  ;;  %1565 = vperm.xlu2 %4113, %v4829_v44  }
 0x177   : > { %429 = vperm.xlu0 %4114, %v5001_v22   ;;  %v1072_v46 = vmul.f32 %v4383_v34, %v820_v42  ;;  %v1073_v20 = vmul.f32 %v4385_v35, %v820_v42  ;;  %v683_v42 = vmul.f32 %v4389_v38, %v4243_v23 }
 0x178   : > { %v1330_v5 = vpop.permute.xlu0 %1329 }
 0x179   : > { %v1586_v3 = vmul.f32 %v4379_v32, %v1330_v5  ;;  %v1587_v48 = vmul.f32 %v4381_v33, %v1330_v5  ;;  %v1198_v5 = vadd.f32 %v1070_v29, %v680_v58  ;;  %v1201_v10 = vadd.f32 %v1073_v20, %v683_v42  ;;  %v2243_v42 = vld [vmem:[%s6917_s3 + $0x78] sm:$0xff] }
 0x17a   : > { %v684_v58 = vmul.f32 %v4387_v36, %v4252_v27  ;;  %2724 = vmatpush.msrb.mxu2 %v2243_v42 }
 0x17b   : > { %v1714_v8 = vadd.f32 %v1586_v3, %v1196_v4  ;;  %1047 = vperm.xlu1 %4112, %v4829_v44   ;;  %v1715_v17 = vadd.f32 %v1587_v48, %v1197_v54  ;;  %v1071_v44 = vmul.f32 %v4385_v35, %v4871_v1  ;;  %v2277_v48 = vld [vmem:[%s6917_s3 + $0x188] sm:$0xff]  ;;  %v682_v54 = vmul.f32 %v4387_v36, %v4243_v23 }
 0x17c   : > { %v5021_v43 = vpop.permute.xlu2 %629  ;;  %v1590_v3 = vmul.f32 %v4379_v32, %v4931_v7  ;;  %2932 = vmatpush.msrb.mxu3 %v2277_v48  ;;  %v1591_v23 = vmul.f32 %v4381_v33, %v4931_v7  ;;  %v685_v48 = vmul.f32 %v4389_v38, %v4252_v27  ;;  %v780_v7 = vmul.f32 %v4387_v36, %v4983_v49 }
 0x17d   : > { %v1848_v2 = vadd.f32 %v4405_v55, %v1714_v8  ;;  %v1849_v13 = vadd.f32 %v4407_v56, %v1715_v17  ;;  %v5041_v8 = vpop.f32.mrf.mxu2  ;;  %v681_v17 = vmul.f32 %v4389_v38, %v4331_v57 }
 0x17e   : > { %v1020_v4 = vpop.permute.xlu1 %1019  ;;  %7045 = vst [vmem:[#allocation46_spill] sm:$0xff] %v5041_v8  ;;  %1369 = vperm.xlu2 %4113, %v4855_v15   ;;  %v1200_v8 = vadd.f32 %v1072_v46, %v682_v54  ;;  %v781_v46 = vmul.f32 %v4389_v38, %v4983_v49  ;;  %v1171_v49 = vmul.f32 %v4385_v35, %v4901_v30 }
 0x17f   : > { %434 = vperm.xlu0 %4114, %v5024_v53   ;;  %v1976_v1 = vmul.f32 0.2, %v1848_v2  ;;  %v1977_v11 = vmul.f32 0.2, %v1849_v13  ;;  %v1199_v31 = vadd.f32 %v1071_v44, %v681_v17  ;;  %v1172_v20 = vmul.f32 %v4383_v34, %v1020_v4 }
 0x180   : > { %v1334_v52 = vpop.permute.xlu0 %1333  ;;  %v782_v44 = vmul.f32 %v4387_v36, %v4810_v6 }
 0x181   : > { %v1588_v39 = vmul.f32 %v4379_v32, %v1334_v52  ;;  %v1589_v57 = vmul.f32 %v4381_v33, %v1334_v52  ;;  %v5055_v63 = vmax.f32 %v1848_v2, %v1976_v1  ;;  %v5057_v29 = vmax.f32 %v1849_v13, %v1977_v11  ;;  %v5071_v11 = vld [vmem:[%s4198_s30 + $0x90] sm:$0xff] }
 0x182   : > { %v1173_v1 = vmul.f32 %v4385_v35, %v1020_v4  ;;  %v1300_v4 = vadd.f32 %v1172_v20, %v782_v44 }
 0x183   : > { %7047 = vst [vmem:[#allocation48_spill] sm:$0xff] %v5055_v63  ;;  %v1716_v40 = vadd.f32 %v1588_v39, %v1198_v5  ;;  %851 = vperm.xlu1 %4112, %v4855_v15   ;;  %v1717_v52 = vadd.f32 %v1589_v57, %v1199_v31  ;;  %2320 = vmatmul.f32.gmra.mxu0 %v5055_v63  ;;  %v5099_v63 = vpop.f32.mrf.mxu3 }
 0x184   : > { %7048 = vst [vmem:[#allocation49_spill] sm:$0xff] %v5057_v29  ;;  %2529 = vmatmul.f32.gmra.mxu1 %v5057_v29  ;;  %v1718_v39 = vadd.f32 %v1590_v3, %v1200_v8  ;;  %v1719_v15 = vadd.f32 %v1591_v23, %v1201_v10  ;;  %v1170_v31 = vmul.f32 %v4383_v34, %v4901_v30 }
 0x185   : > { %v5074_v2 = vpop.permute.xlu2 %1545  ;;  %v1850_v27 = vadd.f32 %v4405_v55, %v1716_v40  ;;  %v1851_v54 = vadd.f32 %v4407_v56, %v1717_v52  ;;  %v783_v30 = vmul.f32 %v4389_v38, %v4810_v6  ;;  %v1299_v5 = vadd.f32 %v1171_v49, %v781_v46  ;;  %v5094_v57 = vpop.f32.mrf.mxu2  ;;  %7050 = vst [vmem:[#allocation51_spill] sm:$0xff] %v5099_v63 }
 0x186   : > { %v824_v13 = vpop.permute.xlu1 %823  ;;  %1569 = vperm.xlu2 %4113, %v4879_v26   ;;  %v1298_v40 = vadd.f32 %v1170_v31, %v780_v7  ;;  %7049 = vst [vmem:[#allocation50_spill] sm:$0xff] %v5094_v57  ;;  %v1853_v29 = vadd.f32 %v4407_v56, %v1719_v15  ;;  %v1690_v31 = vmul.f32 %v4379_v32, %v4960_v59 }
 0x187   : > { %v1074_v10 = vmul.f32 %v4383_v34, %v824_v13  ;;  %v1075_v8 = vmul.f32 %v4385_v35, %v824_v13  ;;  %439 = vperm.xlu0 %4114, %v5071_v11   ;;  %v1978_v17 = vmul.f32 0.2, %v1850_v27  ;;  %v1979_v23 = vmul.f32 0.2, %v1851_v54 }
 0x188   : > { %v1534_v3 = vpop.permute.xlu0 %1533  ;;  %v1852_v13 = vadd.f32 %v4405_v55, %v1718_v39  ;;  %v1301_v20 = vadd.f32 %v1173_v1, %v783_v30  ;;  %v1691_v39 = vmul.f32 %v4381_v33, %v4960_v59  ;;  %v1981_v59 = vmul.f32 0.2, %v1853_v29  ;;  %v2275_v30 = vld [vmem:[%s6917_s3 + $0x178] sm:$0xff] }
 0x189   : > { %v1688_v52 = vmul.f32 %v4379_v32, %v1534_v3  ;;  %v1202_v24 = vadd.f32 %v1074_v10, %v684_v58  ;;  %v1689_v6 = vmul.f32 %v4381_v33, %v1534_v3  ;;  %v5102_v7 = vmax.f32 %v1850_v27, %v1978_v17  ;;  %2933 = vmatpush.msrb.mxu3 %v2275_v30 }
 0x18a   : > { %v5104_v46 = vmax.f32 %v1851_v54, %v1979_v23  ;;  %v1203_v44 = vadd.f32 %v1075_v8, %v685_v48  ;;  %v1592_v58 = vmul.f32 %v4379_v32, %v4978_v25  ;;  %v1593_v27 = vmul.f32 %v4381_v33, %v4978_v25  ;;  %v5118_v54 = vld [vmem:[%s4198_s30 + $0x98] sm:$0xff] }
 0x18b   : > { %v1816_v49 = vadd.f32 %v1688_v52, %v1298_v40  ;;  %1051 = vperm.xlu1 %4112, %v4879_v26   ;;  %v1817_v15 = vadd.f32 %v1689_v6, %v1299_v5  ;;  %2323 = vmatmul.f32.gmra.mxu0 %v5102_v7  ;;  %v1980_v48 = vmul.f32 0.2, %v1852_v13  ;;  %v1818_v26 = vadd.f32 %v1690_v31, %v1300_v4 }
 0x18c   : > { %2532 = vmatmul.f32.gmra.mxu1 %v5104_v46  ;;  %v1720_v17 = vadd.f32 %v1592_v58, %v1202_v24  ;;  %v1721_v5 = vadd.f32 %v1593_v27, %v1203_v44  ;;  %v1819_v3 = vadd.f32 %v1691_v39, %v1301_v20  ;;  %v784_v23 = vmul.f32 %v4387_v36, %v4833_v14 }
 0x18d   : > { %v1950_v42 = vadd.f32 %v4405_v55, %v1816_v49  ;;  %v1951_v8 = vadd.f32 %v4407_v56, %v1817_v15  ;;  %v785_v24 = vmul.f32 %v4389_v38, %v4833_v14  ;;  %v1076_v6 = vmul.f32 %v4383_v34, %v4944_v50  ;;  %v5145_v15 = vpop.f32.mrf.mxu2 }
 0x18e   : > { %v1024_v1 = vpop.permute.xlu1 %1023  ;;  %v5121_v10 = vpop.permute.xlu2 %634  ;;  %1373 = vperm.xlu2 %4113, %v4907_v28   ;;  %v5137_v31 = vmax.f32 %v1852_v13, %v1980_v48  ;;  %v1952_v49 = vadd.f32 %v4405_v55, %v1818_v26  ;;  %v5142_v39 = vmax.f32 %v1853_v29, %v1981_v59  ;;  %v1854_v58 = vadd.f32 %v4405_v55, %v1720_v17  ;;  %v5167_v59 = vld [vmem:[%s4198_s30 + $0xa0] sm:$0xff] }
 0x18f   : > { %v1174_v40 = vmul.f32 %v4383_v34, %v1024_v1  ;;  %v1175_v25 = vmul.f32 %v4385_v35, %v1024_v1  ;;  %444 = vperm.xlu0 %4114, %v5118_v54   ;;  %v2078_v4 = vmul.f32 0.2, %v1950_v42  ;;  %v2079_v52 = vmul.f32 0.2, %v1951_v8  ;;  %7052 = vst [vmem:[#allocation53_spill] sm:$0xff] %v5145_v15  ;;  %v5152_v26 = vpop.f32.mrf.mxu3 }
 0x190   : > { %v1855_v13 = vadd.f32 %v4407_v56, %v1721_v5  ;;  %v1953_v48 = vadd.f32 %v4407_v56, %v1819_v3  ;;  %7054 = vst [vmem:[#allocation55_spill] sm:$0xff] %v5152_v26  ;;  %v1077_v29 = vmul.f32 %v4385_v35, %v4944_v50  ;;  %v1693_v1 = vmul.f32 %v4381_v33, %v4998_v61  ;;  %v5180_v3 = vpop.permute.xlu0 %1353 }
 0x191   : > { %v1302_v44 = vadd.f32 %v1174_v40, %v784_v23  ;;  %v5140_v20 = vmax.f32 %v1950_v42, %v2078_v4  ;;  %v1303_v27 = vadd.f32 %v1175_v25, %v785_v24  ;;  %v5148_v14 = vmax.f32 %v1951_v8, %v2079_v52  ;;  %v3405_v40 = vld [vmem:[%s6919_s5 + $0x78] sm:$0xff]  ;;  %v2241_v25 = vld [vmem:[%s6917_s3 + $0x68] sm:$0xff] }
 0x192   : > { %v1692_v42 = vmul.f32 %v4379_v32, %v4998_v61  ;;  %v2080_v50 = vmul.f32 0.2, %v1952_v49  ;;  %v687_v8 = vmul.f32 %v4389_v38, %v4364_v16  ;;  %v1982_v17 = vmul.f32 0.2, %v1854_v58  ;;  %v3421_v61 = vld [vmem:[%s6919_s5 + $0xf8] sm:$0xff]  ;;  %3422 = vmatpush.msrb.mxu0 %v3405_v40  ;;  %2725 = vmatpush.msrb.mxu2 %v2241_v25 }
 0x193   : > { %7051 = vst [vmem:[#allocation52_spill] sm:$0xff] %v5140_v20  ;;  %855 = vperm.xlu1 %4112, %v4907_v28   ;;  %2326 = vmatmul.f32.gmra.mxu0 %v5137_v31  ;;  %v686_v28 = vmul.f32 %v4387_v36, %v4364_v16  ;;  %v1983_v23 = vmul.f32 0.2, %v1855_v13  ;;  %v2081_v4 = vmul.f32 0.2, %v1953_v48  ;;  %v1821_v52 = vadd.f32 %v1693_v1, %v1303_v27 }
 0x194   : > { %7053 = vst [vmem:[#allocation54_spill] sm:$0xff] %v5148_v14  ;;  %2473 = vmatmul.f32.gmra.mxu2 %v5140_v20  ;;  %2535 = vmatmul.f32.gmra.mxu1 %v5142_v39  ;;  %v1820_v30 = vadd.f32 %v1692_v42, %v1302_v44  ;;  %v1205_v24 = vadd.f32 %v1077_v29, %v687_v8 }
 0x195   : > { %2682 = vmatmul.f32.gmra.mxu3 %v5148_v14  ;;  %v1204_v5 = vadd.f32 %v1076_v6, %v686_v28  ;;  %3631 = vmatpush.msrb.mxu1 %v3421_v61  ;;  %v5188_v6 = vmax.f32 %v1952_v49, %v2080_v50  ;;  %v5190_v26 = vmax.f32 %v1854_v58, %v1982_v17  ;;  %v5203_v58 = vpop.f32.mrf.mxu2 }
 0x196   : > { %1573 = vperm.xlu2 %4113, %v4935_v41   ;;  %v1954_v27 = vadd.f32 %v4405_v55, %v1820_v30  ;;  %v5194_v29 = vmax.f32 %v1855_v13, %v1983_v23  ;;  %v5196_v1 = vmax.f32 %v1953_v48, %v2081_v4  ;;  %v1955_v8 = vadd.f32 %v4407_v56, %v1821_v52 }
 0x197   : > { %v1346_v16 = vpop.permute.xlu1 %1345  ;;  %449 = vperm.xlu0 %4114, %v5167_v59   ;;  %v5186_v14 = vpop.permute.xlu2 %835  ;;  %7055 = vst [vmem:[#allocation56_spill] sm:$0xff] %v5188_v6  ;;  %v1694_v23 = vmul.f32 %v4379_v32, %v5074_v2 }
 0x198   : > { %v1594_v44 = vmul.f32 %v4379_v32, %v1346_v16  ;;  %v1595_v42 = vmul.f32 %v4381_v33, %v1346_v16  ;;  %7056 = vst [vmem:[#allocation57_spill] sm:$0xff] %v5196_v1  ;;  %v5210_v13 = vpop.f32.mrf.mxu3  ;;  %v2082_v17 = vmul.f32 0.2, %v1954_v27  ;;  %v2083_v40 = vmul.f32 0.2, %v1955_v8  ;;  %v5227_v4 = vpop.permute.xlu0 %1357 }
 0x199   : > { %7057 = vst [vmem:[#allocation58_spill] sm:$0xff] %v5203_v58  ;;  %v787_v16 = vmul.f32 %v4389_v38, %v5021_v43 }
 0x19a   : > { %v1722_v28 = vadd.f32 %v1594_v44, %v1204_v5  ;;  %v1723_v20 = vadd.f32 %v1595_v42, %v1205_v24  ;;  %7058 = vst [vmem:[#allocation59_spill] sm:$0xff] %v5210_v13  ;;  %v786_v5 = vmul.f32 %v4387_v36, %v5021_v43  ;;  %v1695_v44 = vmul.f32 %v4381_v33, %v5074_v2 }
 0x19b   : > { %1055 = vperm.xlu1 %4112, %v4935_v41   ;;  %2329 = vmatmul.f32.gmra.mxu0 %v5190_v26  ;;  %v5208_v41 = vld [vmem:[%s4198_s30 + $0xa8] sm:$0xff]  ;;  %v5238_v43 = vmax.f32 %v1955_v8, %v2083_v40  ;;  %v1079_v2 = vmul.f32 %v4385_v35, %v4971_v51  ;;  %v688_v40 = vmul.f32 %v4387_v36, %v4359_v12 }
 0x19c   : > { %2476 = vmatmul.f32.gmra.mxu2 %v5188_v6  ;;  %v1856_v49 = vadd.f32 %v4405_v55, %v1722_v28  ;;  %v1857_v50 = vadd.f32 %v4407_v56, %v1723_v20  ;;  %2538 = vmatmul.f32.gmra.mxu1 %v5194_v29  ;;  %v2273_v20 = vld [vmem:[%s6917_s3 + $0x168] sm:$0xff] }
 0x19d   : > { %2685 = vmatmul.f32.gmra.mxu3 %v5196_v1  ;;  %7060 = vst [vmem:[#allocation61_spill] sm:$0xff] %v5238_v43 }
 0x19e   : > { %v1984_v48 = vmul.f32 0.2, %v1856_v49  ;;  %v1985_v30 = vmul.f32 0.2, %v1857_v50  ;;  %1377 = vperm.xlu2 %4113, %v4964_v9   ;;  %2934 = vmatpush.msrb.mxu3 %v2273_v20 }
 0x19f   : > { %454 = vperm.xlu0 %4114, %v5208_v41   ;;  %v5217_v61 = vpop.permute.xlu2 %1035 }
 0x1a0   : > { %v5219_v25 = vmax.f32 %v1856_v49, %v1984_v48  ;;  %v1028_v52 = vpop.permute.xlu1 %1027  ;;  %v5229_v24 = vmax.f32 %v1857_v50, %v1985_v30  ;;  %v5235_v49 = vmax.f32 %v1954_v27, %v2082_v17  ;;  %v1078_v50 = vmul.f32 %v4383_v34, %v4971_v51  ;;  %v5249_v27 = vld [vmem:[%s4198_s30 + $0xb0] sm:$0xff] }
 0x1a1   : > { %v1176_v42 = vmul.f32 %v4383_v34, %v1028_v52  ;;  %v1177_v28 = vmul.f32 %v4385_v35, %v1028_v52  ;;  %v690_v30 = vmul.f32 %v4387_v36, %v4279_v37  ;;  %v689_v51 = vmul.f32 %v4389_v38, %v4359_v12  ;;  %v5268_v52 = vpop.f32.mrf.mxu3 }
 0x1a2   : > { %7059 = vst [vmem:[#allocation60_spill] sm:$0xff] %v5235_v49 }
 0x1a3   : > { %859 = vperm.xlu1 %4112, %v4964_v9   ;;  %v1304_v48 = vadd.f32 %v1176_v42, %v786_v5  ;;  %v1305_v20 = vadd.f32 %v1177_v28, %v787_v16  ;;  %2332 = vmatmul.f32.gmra.mxu0 %v5219_v25  ;;  %v1080_v9 = vmul.f32 %v4383_v34, %v5186_v14  ;;  %v5259_v5 = vpop.f32.mrf.mxu2  ;;  %v3404_v16 = vld [vmem:[%s6919_s5 + $0x70] sm:$0xff] }
 0x1a4   : > { %2479 = vmatmul.f32.gmra.mxu2 %v5235_v49  ;;  %2541 = vmatmul.f32.gmra.mxu1 %v5229_v24  ;;  %7061 = vst [vmem:[#allocation62_spill] sm:$0xff] %v5259_v5  ;;  %v1207_v49 = vadd.f32 %v1079_v2, %v689_v51  ;;  %v5289_v5 = vpop.permute.xlu0 %1557 }
 0x1a5   : > { %2688 = vmatmul.f32.gmra.mxu3 %v5238_v43  ;;  %v1822_v8 = vadd.f32 %v1694_v23, %v1304_v48  ;;  %v1823_v17 = vadd.f32 %v1695_v44, %v1305_v20  ;;  %v3420_v23 = vld [vmem:[%s6919_s5 + $0xf0] sm:$0xff]  ;;  %7062 = vst [vmem:[#allocation63_spill] sm:$0xff] %v5268_v52  ;;  %v1081_v44 = vmul.f32 %v4385_v35, %v5186_v14  ;;  %v2239_v48 = vld [vmem:[%s6917_s3 + $0x58] sm:$0xff] }
 0x1a6   : > { %1381 = vperm.xlu2 %4113, %v4981_v62   ;;  %3423 = vmatpush.msrb.mxu0 %v3404_v16  ;;  %v2271_v20 = vld [vmem:[%s6917_s3 + $0x158] sm:$0xff]  ;;  %v691_v43 = vmul.f32 %v4389_v38, %v4279_v37  ;;  %v1206_v14 = vadd.f32 %v1078_v50, %v688_v40  ;;  %v1599_v52 = vmul.f32 %v4381_v33, %v5180_v3 }
 0x1a7   : > { %459 = vperm.xlu0 %4114, %v5249_v27   ;;  %v840_v12 = vpop.permute.xlu2 %839  ;;  %v1956_v42 = vadd.f32 %v4405_v55, %v1822_v8  ;;  %v1957_v28 = vadd.f32 %v4407_v56, %v1823_v17  ;;  %3632 = vmatpush.msrb.mxu1 %v3420_v23  ;;  %v1598_v8 = vmul.f32 %v4379_v32, %v5180_v3  ;;  %v5301_v3 = vld [vmem:[%s4198_s30 + $0xb8] sm:$0xff] }
 0x1a8   : > { %2726 = vmatpush.msrb.mxu2 %v2239_v48  ;;  %v1208_v17 = vadd.f32 %v1080_v9, %v690_v30  ;;  %2935 = vmatpush.msrb.mxu3 %v2271_v20  ;;  %v1209_v50 = vadd.f32 %v1081_v44, %v691_v43  ;;  %v1178_v9 = vmul.f32 %v4383_v34, %v4992_v45 }
 0x1a9   : > { %v1350_v1 = vpop.permute.xlu1 %1349  ;;  %v2084_v37 = vmul.f32 0.2, %v1956_v42  ;;  %v2085_v51 = vmul.f32 0.2, %v1957_v28  ;;  %v788_v30 = vmul.f32 %v4387_v36, %v5121_v10  ;;  %v1179_v43 = vmul.f32 %v4385_v35, %v4992_v45 }
 0x1aa   : > { %v1596_v16 = vmul.f32 %v4379_v32, %v1350_v1  ;;  %v1597_v6 = vmul.f32 %v4381_v33, %v1350_v1  ;;  %v789_v1 = vmul.f32 %v4389_v38, %v5121_v10  ;;  %v1082_v44 = vmul.f32 %v4383_v34, %v840_v12 }
 0x1ab   : > { %863 = vperm.xlu1 %4112, %v4981_v62   ;;  %v5298_v23 = vmax.f32 %v1956_v42, %v2084_v37  ;;  %v5303_v48 = vmax.f32 %v1957_v28, %v2085_v51  ;;  %v1083_v20 = vmul.f32 %v4385_v35, %v840_v12  ;;  %v692_v10 = vmul.f32 %v4387_v36, %v4374_v21  ;;  %v5321_v12 = vpop.f32.mrf.mxu2 }
 0x1ac   : > { %v1724_v2 = vadd.f32 %v1596_v16, %v1206_v14  ;;  %v1725_v40 = vadd.f32 %v1597_v6, %v1207_v49  ;;  %v1726_v49 = vadd.f32 %v1598_v8, %v1208_v17  ;;  %v1727_v45 = vadd.f32 %v1599_v52, %v1209_v50  ;;  %7065 = vst [vmem:[#allocation66_spill] sm:$0xff] %v5321_v12  ;;  %v5338_v12 = vpop.permute.xlu0 %649 }
 0x1ad   : > { %7063 = vst [vmem:[#allocation64_spill] sm:$0xff] %v5298_v23  ;;  %2482 = vmatmul.f32.gmra.mxu2 %v5298_v23  ;;  %2691 = vmatmul.f32.gmra.mxu3 %v5303_v48  ;;  %v693_v8 = vmul.f32 %v4389_v38, %v4374_v21  ;;  %v1306_v17 = vadd.f32 %v1178_v9, %v788_v30 }
 0x1ae   : > { %7064 = vst [vmem:[#allocation65_spill] sm:$0xff] %v5303_v48  ;;  %v1858_v62 = vadd.f32 %v4405_v55, %v1724_v2  ;;  %v1859_v6 = vadd.f32 %v4407_v56, %v1725_v40  ;;  %1385 = vperm.xlu2 %4113, %v5001_v22   ;;  %v1307_v16 = vadd.f32 %v1179_v43, %v789_v1  ;;  %v5325_v40 = vpop.f32.mrf.mxu3 }
 0x1af   : > { %464 = vperm.xlu0 %4114, %v5301_v3   ;;  %v5317_v42 = vpop.permute.xlu2 %1039  ;;  %v1600_v37 = vmul.f32 %v4379_v32, %v5227_v4  ;;  %7066 = vst [vmem:[#allocation67_spill] sm:$0xff] %v5325_v40  ;;  %v1601_v51 = vmul.f32 %v4381_v33, %v5227_v4  ;;  %v1860_v21 = vadd.f32 %v4405_v55, %v1726_v49  ;;  %v5343_v4 = vld [vmem:[%s4198_s30 + $0xc0] sm:$0xff] }
 0x1b0   : > { %v1986_v28 = vmul.f32 0.2, %v1858_v62  ;;  %v1987_v14 = vmul.f32 0.2, %v1859_v6  ;;  %v1210_v50 = vadd.f32 %v1082_v44, %v692_v10  ;;  %v1211_v23 = vadd.f32 %v1083_v20, %v693_v8  ;;  %v2237_v8 = vld [vmem:[%s6917_s3 + $0x48] sm:$0xff] }
 0x1b1   : > { %v1550_v2 = vpop.permute.xlu1 %1549  ;;  %v1861_v40 = vadd.f32 %v4407_v56, %v1727_v45  ;;  %v3419_v45 = vld [vmem:[%s6919_s5 + $0xe8] sm:$0xff]  ;;  %2727 = vmatpush.msrb.mxu2 %v2237_v8 }
 0x1b2   : > { %v1696_v48 = vmul.f32 %v4379_v32, %v1550_v2  ;;  %v1697_v52 = vmul.f32 %v4381_v33, %v1550_v2  ;;  %v5333_v9 = vmax.f32 %v1858_v62, %v1986_v28  ;;  %v5335_v30 = vmax.f32 %v1859_v6, %v1987_v14  ;;  %v3403_v14 = vld [vmem:[%s6919_s5 + $0x68] sm:$0xff]  ;;  %3633 = vmatpush.msrb.mxu1 %v3419_v45 }
 0x1b3   : > { %867 = vperm.xlu1 %4112, %v5001_v22   ;;  %v1988_v62 = vmul.f32 0.2, %v1860_v21  ;;  %v1728_v6 = vadd.f32 %v1600_v37, %v1210_v50  ;;  %v1989_v20 = vmul.f32 0.2, %v1861_v40  ;;  %3424 = vmatpush.msrb.mxu0 %v3403_v14 }
 0x1b4   : > { %v1824_v1 = vadd.f32 %v1696_v48, %v1306_v17  ;;  %v1825_v43 = vadd.f32 %v1697_v52, %v1307_v16  ;;  %2335 = vmatmul.f32.gmra.mxu0 %v5333_v9  ;;  %2544 = vmatmul.f32.gmra.mxu1 %v5335_v30  ;;  %v1729_v48 = vadd.f32 %v1601_v51, %v1211_v23  ;;  %v5360_v17 = vpop.f32.mrf.mxu2 }
 0x1b5   : > { %7067 = vst [vmem:[#allocation68_spill] sm:$0xff] %v5360_v17  ;;  %v5363_v16 = vmax.f32 %v1860_v21, %v1988_v62  ;;  %v1862_v2 = vadd.f32 %v4405_v55, %v1728_v6  ;;  %v5371_v50 = vmax.f32 %v1861_v40, %v1989_v20  ;;  %v5381_v21 = vld [vmem:[%s4198_s30 + $0xc8] sm:$0xff]  ;;  %v5385_v40 = vpop.permute.xlu0 %654 }
 0x1b6   : > { %v1958_v49 = vadd.f32 %v4405_v55, %v1824_v1  ;;  %v1959_v22 = vadd.f32 %v4407_v56, %v1825_v43  ;;  %1389 = vperm.xlu2 %4113, %v5024_v53   ;;  %v1863_v51 = vadd.f32 %v4407_v56, %v1729_v48  ;;  %v5369_v52 = vpop.f32.mrf.mxu3  ;;  %v1180_v48 = vmul.f32 %v4383_v34, %v5217_v61 }
 0x1b7   : > { %469 = vperm.xlu0 %4114, %v5343_v4   ;;  %7069 = vst [vmem:[#allocation70_spill] sm:$0xff] %v5369_v52  ;;  %v1990_v43 = vmul.f32 0.2, %v1862_v2 }
 0x1b8   : > { %v2086_v44 = vmul.f32 0.2, %v1958_v49  ;;  %v2087_v10 = vmul.f32 0.2, %v1959_v22  ;;  %v5349_v28 = vpop.permute.xlu2 %1361 }
 0x1ba   : > { %v640_v23 = vpop.permute.xlu1 %639  ;;  %v5365_v37 = vmax.f32 %v1958_v49, %v2086_v44  ;;  %v5373_v1 = vmax.f32 %v1959_v22, %v2087_v10  ;;  %v1991_v49 = vmul.f32 0.2, %v1863_v51  ;;  %v1181_v44 = vmul.f32 %v4385_v35, %v5217_v61  ;;  %v3418_v61 = vld [vmem:[%s6919_s5 + $0xe0] sm:$0xff] }
 0x1bb   : > { %871 = vperm.xlu1 %4112, %v5024_v53   ;;  %v2269_v53 = vld [vmem:[%s6917_s3 + $0x148] sm:$0xff]  ;;  %v790_v22 = vmul.f32 %v4387_v36, %v640_v23  ;;  %v791_v62 = vmul.f32 %v4389_v38, %v640_v23  ;;  %v5398_v10 = vmax.f32 %v1862_v2, %v1990_v43  ;;  %v5414_v2 = vld [vmem:[%s4198_s30 + $0xd0] sm:$0xff]  ;;  %3634 = vmatpush.msrb.mxu1 %v3418_v61 }
 0x1bc   : > { %7068 = vst [vmem:[#allocation69_spill] sm:$0xff] %v5365_v37  ;;  %2338 = vmatmul.f32.gmra.mxu0 %v5363_v16  ;;  %2485 = vmatmul.f32.gmra.mxu2 %v5365_v37  ;;  %v5400_v14 = vmax.f32 %v1863_v51, %v1991_v49 }
 0x1bd   : > { %7070 = vst [vmem:[#allocation71_spill] sm:$0xff] %v5373_v1  ;;  %2547 = vmatmul.f32.gmra.mxu1 %v5371_v50  ;;  %2694 = vmatmul.f32.gmra.mxu3 %v5373_v1  ;;  %v1308_v45 = vadd.f32 %v1180_v48, %v790_v22  ;;  %v1309_v8 = vadd.f32 %v1181_v44, %v791_v62  ;;  %v3402_v1 = vld [vmem:[%s6919_s5 + $0x60] sm:$0xff]  ;;  %v2235_v48 = vld [vmem:[%s6917_s3 + $0x38] sm:$0xff]  ;;  %v5426_v44 = vpop.permute.xlu0 %409 }
 0x1be   : > { %1393 = vperm.xlu2 %4113, %v5071_v11   ;;  %2936 = vmatpush.msrb.mxu3 %v2269_v53  ;;  %v5416_v51 = vpop.f32.mrf.mxu3 }
 0x1bf   : > { %474 = vperm.xlu0 %4114, %v5381_v21   ;;  %7072 = vst [vmem:[#allocation73_spill] sm:$0xff] %v5416_v51  ;;  %3425 = vmatpush.msrb.mxu0 %v3402_v1  ;;  %v1700_v51 = vmul.f32 %v4379_v32, %v5289_v5 }
 0x1c0   : > { %v5391_v6 = vpop.permute.xlu2 %1561  ;;  %2728 = vmatpush.msrb.mxu2 %v2235_v48  ;;  %v5442_v48 = vld [vmem:[%s4198_s30 + $0xd8] sm:$0xff] }
 0x1c3   : > { %875 = vperm.xlu1 %4112, %v5071_v11   ;;  %v1554_v20 = vpop.permute.xlu1 %1553  ;;  %v5410_v11 = vpop.f32.mrf.mxu2 }
 0x1c4   : > { %v1698_v23 = vmul.f32 %v4379_v32, %v1554_v20  ;;  %v1699_v53 = vmul.f32 %v4381_v33, %v1554_v20  ;;  %7071 = vst [vmem:[#allocation72_spill] sm:$0xff] %v5410_v11  ;;  %2341 = vmatmul.f32.gmra.mxu0 %v5398_v10  ;;  %v1701_v11 = vmul.f32 %v4381_v33, %v5289_v5 }
 0x1c5   : > { %2550 = vmatmul.f32.gmra.mxu1 %v5400_v14 }
 0x1c6   : > { %v1826_v43 = vadd.f32 %v1698_v23, %v1308_v45  ;;  %v1827_v49 = vadd.f32 %v1699_v53, %v1309_v8  ;;  %1397 = vperm.xlu2 %4113, %v5118_v54   ;;  %v1182_v8 = vmul.f32 %v4383_v34, %v5317_v42  ;;  %v1183_v23 = vmul.f32 %v4385_v35, %v5317_v42 }
 0x1c7   : > { %479 = vperm.xlu0 %4114, %v5414_v2  }
 0x1c8   : > { %v1960_v22 = vadd.f32 %v4405_v55, %v1826_v43  ;;  %v1961_v62 = vadd.f32 %v4407_v56, %v1827_v49  ;;  %v5428_v20 = vpop.permute.xlu2 %1365 }
 0x1ca   : > { %v2088_v1 = vmul.f32 0.2, %v1960_v22  ;;  %v2089_v45 = vmul.f32 0.2, %v1961_v62 }
 0x1cb   : > { %879 = vperm.xlu1 %4112, %v5118_v54   ;;  %v2267_v54 = vld [vmem:[%s6917_s3 + $0x138] sm:$0xff]  ;;  %v5449_v42 = vpop.f32.mrf.mxu2 }
 0x1cc   : > { %v645_v53 = vpop.permute.xlu1 %644  ;;  %v5437_v49 = vmax.f32 %v1960_v22, %v2088_v1  ;;  %v5439_v37 = vmax.f32 %v1961_v62, %v2089_v45  ;;  %2937 = vmatpush.msrb.mxu3 %v2267_v54  ;;  %7075 = vst [vmem:[#allocation76_spill] sm:$0xff] %v5449_v42  ;;  %v5455_v62 = vpop.f32.mrf.mxu3 }
 0x1cd   : > { %v792_v61 = vmul.f32 %v4387_v36, %v645_v53  ;;  %v793_v43 = vmul.f32 %v4389_v38, %v645_v53  ;;  %7076 = vst [vmem:[#allocation77_spill] sm:$0xff] %v5455_v62  ;;  %v5461_v42 = vpop.permute.xlu0 %659 }
 0x1ce   : > { %7073 = vst [vmem:[#allocation74_spill] sm:$0xff] %v5437_v49  ;;  %2488 = vmatmul.f32.gmra.mxu2 %v5437_v49  ;;  %2697 = vmatmul.f32.gmra.mxu3 %v5439_v37 }
 0x1cf   : > { %7074 = vst [vmem:[#allocation75_spill] sm:$0xff] %v5439_v37  ;;  %v1310_v53 = vadd.f32 %v1182_v8, %v792_v61  ;;  %v1311_v22 = vadd.f32 %v1183_v23, %v793_v43  ;;  %1401 = vperm.xlu2 %4113, %v5167_v59   ;;  %484 = vperm.xlu0 %4114, %v5442_v48   ;;  %v5469_v43 = vld [vmem:[%s4198_s30 + $0xe0] sm:$0xff] }
 0x1d0   : > { %v5459_v54 = vpop.permute.xlu2 %1565  ;;  %v694_v23 = vmul.f32 %v4387_v36, %v4369_v19 }
 0x1d1   : > { %v1828_v1 = vadd.f32 %v1700_v51, %v1310_v53  ;;  %v1829_v45 = vadd.f32 %v1701_v11, %v1311_v22  ;;  %v695_v11 = vmul.f32 %v4389_v38, %v4369_v19  ;;  %v1602_v51 = vmul.f32 %v4379_v32, %v5349_v28 }
 0x1d2   : > { %v1603_v22 = vmul.f32 %v4381_v33, %v5349_v28 }
 0x1d3   : > { %883 = vperm.xlu1 %4112, %v5167_v59   ;;  %v1962_v5 = vadd.f32 %v4405_v55, %v1828_v1  ;;  %v1963_v8 = vadd.f32 %v4407_v56, %v1829_v45  ;;  %v5485_v19 = vpop.f32.mrf.mxu2 }
 0x1d4   : > { %7079 = vst [vmem:[#allocation80_spill] sm:$0xff] %v5485_v19  ;;  %v5491_v28 = vpop.f32.mrf.mxu3 }
 0x1d5   : > { %v844_v61 = vpop.permute.xlu1 %843  ;;  %v2090_v37 = vmul.f32 0.2, %v1962_v5  ;;  %v2091_v49 = vmul.f32 0.2, %v1963_v8  ;;  %7080 = vst [vmem:[#allocation81_spill] sm:$0xff] %v5491_v28 }
 0x1d6   : > { %v1084_v59 = vmul.f32 %v4383_v34, %v844_v61  ;;  %v1085_v53 = vmul.f32 %v4385_v35, %v844_v61  ;;  %v794_v61 = vmul.f32 %v4387_v36, %v5338_v12 }
 0x1d7   : > { %v5479_v1 = vmax.f32 %v1962_v5, %v2090_v37  ;;  %v5481_v45 = vmax.f32 %v1963_v8, %v2091_v49  ;;  %1405 = vperm.xlu2 %4113, %v5208_v41   ;;  %489 = vperm.xlu0 %4114, %v5469_v43   ;;  %v3401_v49 = vld [vmem:[%s6919_s5 + $0x58] sm:$0xff]  ;;  %v2233_v8 = vld [vmem:[%s6917_s3 + $0x28] sm:$0xff] }
 0x1d8   : > { %v1212_v62 = vadd.f32 %v1084_v59, %v694_v23  ;;  %v1213_v52 = vadd.f32 %v1085_v53, %v695_v11  ;;  %v5487_v17 = vpop.permute.xlu2 %1369  ;;  %v3417_v5 = vld [vmem:[%s6919_s5 + $0xd8] sm:$0xff]  ;;  %3426 = vmatpush.msrb.mxu0 %v3401_v49  ;;  %v795_v11 = vmul.f32 %v4389_v38, %v5338_v12  ;;  %v5511_v59 = vpop.permute.xlu0 %414  ;;  %2729 = vmatpush.msrb.mxu2 %v2233_v8 }
 0x1d9   : > { %7077 = vst [vmem:[#allocation78_spill] sm:$0xff] %v5479_v1  ;;  %2491 = vmatmul.f32.gmra.mxu2 %v5479_v1  ;;  %2700 = vmatmul.f32.gmra.mxu3 %v5481_v45  ;;  %v1702_v12 = vmul.f32 %v4379_v32, %v5391_v6 }
 0x1da   : > { %7078 = vst [vmem:[#allocation79_spill] sm:$0xff] %v5481_v45  ;;  %v1730_v37 = vadd.f32 %v1602_v51, %v1212_v62  ;;  %v1731_v23 = vadd.f32 %v1603_v22, %v1213_v52  ;;  %v2265_v62 = vld [vmem:[%s6917_s3 + $0x128] sm:$0xff]  ;;  %3635 = vmatpush.msrb.mxu1 %v3417_v5 }
 0x1db   : > { %887 = vperm.xlu1 %4112, %v5208_v41   ;;  %v5514_v45 = vld [vmem:[%s4198_s30 + $0xe8] sm:$0xff]  ;;  %2938 = vmatpush.msrb.mxu3 %v2265_v62  ;;  %v5531_v13 = vpop.f32.mrf.mxu2 }
 0x1dc   : > { %v1864_v51 = vadd.f32 %v4405_v55, %v1730_v37  ;;  %v1865_v41 = vadd.f32 %v4407_v56, %v1731_v23  ;;  %v1703_v37 = vmul.f32 %v4381_v33, %v5391_v6  ;;  %7081 = vst [vmem:[#allocation82_spill] sm:$0xff] %v5531_v13  ;;  %v5535_v6 = vpop.f32.mrf.mxu3 }
 0x1dd   : > { %v1044_v53 = vpop.permute.xlu1 %1043  ;;  %7082 = vst [vmem:[#allocation83_spill] sm:$0xff] %v5535_v6  ;;  %v3416_v6 = vld [vmem:[%s6919_s5 + $0xd0] sm:$0xff] }
 0x1de   : > { %v1184_v52 = vmul.f32 %v4383_v34, %v1044_v53  ;;  %v1185_v22 = vmul.f32 %v4385_v35, %v1044_v53  ;;  %v1992_v49 = vmul.f32 0.2, %v1864_v51  ;;  %v1993_v1 = vmul.f32 0.2, %v1865_v41  ;;  %3636 = vmatpush.msrb.mxu1 %v3416_v6 }
 0x1df   : > { %1409 = vperm.xlu2 %4113, %v5249_v27   ;;  %494 = vperm.xlu0 %4114, %v5514_v45   ;;  %v797_v6 = vmul.f32 %v4389_v38, %v5385_v40 }
 0x1e0   : > { %v1312_v5 = vadd.f32 %v1184_v52, %v794_v61  ;;  %v1313_v28 = vadd.f32 %v1185_v22, %v795_v11  ;;  %v5525_v8 = vpop.permute.xlu2 %1569  ;;  %v5527_v23 = vmax.f32 %v1864_v51, %v1992_v49  ;;  %v5529_v62 = vmax.f32 %v1865_v41, %v1993_v1  ;;  %v5545_v41 = vld [vmem:[%s4198_s30 + $0xf0] sm:$0xff] }
 0x1e1   : > { %v696_v1 = vmul.f32 %v4387_v36, %v4305_v47 }
 0x1e2   : > { %v1830_v53 = vadd.f32 %v1702_v12, %v1312_v5  ;;  %v1831_v19 = vadd.f32 %v1703_v37, %v1313_v28  ;;  %2344 = vmatmul.f32.gmra.mxu0 %v5527_v23  ;;  %2553 = vmatmul.f32.gmra.mxu1 %v5529_v62  ;;  %v697_v28 = vmul.f32 %v4389_v38, %v4305_v47  ;;  %v5553_v37 = vpop.permute.xlu0 %664 }
 0x1e3   : > { %891 = vperm.xlu1 %4112, %v5249_v27   ;;  %v1604_v27 = vmul.f32 %v4379_v32, %v5428_v20  ;;  %v5577_v13 = vpop.f32.mrf.mxu2 }
 0x1e4   : > { %v1964_v61 = vadd.f32 %v4405_v55, %v1830_v53  ;;  %v1965_v11 = vadd.f32 %v4407_v56, %v1831_v19  ;;  %v1605_v19 = vmul.f32 %v4381_v33, %v5428_v20  ;;  %v2231_v20 = vld [vmem:[%s6917_s3 + $0x18] sm:$0xff]  ;;  %7085 = vst [vmem:[#allocation86_spill] sm:$0xff] %v5577_v13 }
 0x1e5   : > { %v848_v51 = vpop.permute.xlu1 %847  ;;  %2730 = vmatpush.msrb.mxu2 %v2231_v20  ;;  %v1704_v20 = vmul.f32 %v4379_v32, %v5459_v54 }
 0x1e6   : > { %v1086_v52 = vmul.f32 %v4383_v34, %v848_v51  ;;  %v1087_v22 = vmul.f32 %v4385_v35, %v848_v51  ;;  %v2092_v49 = vmul.f32 0.2, %v1964_v61  ;;  %v2093_v12 = vmul.f32 0.2, %v1965_v11  ;;  %v3400_v51 = vld [vmem:[%s6919_s5 + $0x50] sm:$0xff] }
 0x1e7   : > { %1413 = vperm.xlu2 %4113, %v5301_v3   ;;  %499 = vperm.xlu0 %4114, %v5545_v41  }
 0x1e8   : > { %v1214_v5 = vadd.f32 %v1086_v52, %v696_v1  ;;  %v1215_v53 = vadd.f32 %v1087_v22, %v697_v28  ;;  %v5557_v47 = vmax.f32 %v1964_v61, %v2092_v49  ;;  %v5568_v1 = vpop.permute.xlu2 %1373  ;;  %v5570_v28 = vmax.f32 %v1965_v11, %v2093_v12  ;;  %3427 = vmatpush.msrb.mxu0 %v3400_v51 }
 0x1e9   : > { %v796_v11 = vmul.f32 %v4387_v36, %v5385_v40 }
 0x1ea   : > { %7083 = vst [vmem:[#allocation84_spill] sm:$0xff] %v5557_v47  ;;  %2494 = vmatmul.f32.gmra.mxu2 %v5557_v47  ;;  %v1732_v61 = vadd.f32 %v1604_v27, %v1214_v5  ;;  %v1733_v52 = vadd.f32 %v1605_v19, %v1215_v53  ;;  %2703 = vmatmul.f32.gmra.mxu3 %v5570_v28  ;;  %v5584_v27 = vld [vmem:[%s4198_s30 + $0xf8] sm:$0xff]  ;;  %v5586_v19 = vpop.f32.mrf.mxu3  ;;  %v5601_v47 = vpop.permute.xlu0 %419 }
 0x1eb   : > { %7084 = vst [vmem:[#allocation85_spill] sm:$0xff] %v5570_v28  ;;  %895 = vperm.xlu1 %4112, %v5301_v3  }
 0x1ec   : > { %v1866_v22 = vadd.f32 %v4405_v55, %v1732_v61  ;;  %v1867_v49 = vadd.f32 %v4407_v56, %v1733_v52  ;;  %7086 = vst [vmem:[#allocation87_spill] sm:$0xff] %v5586_v19  ;;  %v1705_v61 = vmul.f32 %v4381_v33, %v5459_v54 }
 0x1ed   : > { %v1048_v12 = vpop.permute.xlu1 %1047 }
 0x1ee   : > { %v1186_v5 = vmul.f32 %v4383_v34, %v1048_v12  ;;  %v1187_v3 = vmul.f32 %v4385_v35, %v1048_v12  ;;  %v1994_v53 = vmul.f32 0.2, %v1866_v22  ;;  %v1995_v51 = vmul.f32 0.2, %v1867_v49  ;;  %v2263_v12 = vld [vmem:[%s6917_s3 + $0x118] sm:$0xff] }
 0x1ef   : > { %1417 = vperm.xlu2 %4113, %v5343_v4   ;;  %504 = vperm.xlu0 %4114, %v5584_v27  }
 0x1f0   : > { %v1314_v52 = vadd.f32 %v1186_v5, %v796_v11  ;;  %v1315_v28 = vadd.f32 %v1187_v3, %v797_v6  ;;  %v5596_v40 = vmax.f32 %v1866_v22, %v1994_v53  ;;  %v5603_v19 = vpop.permute.xlu2 %1573  ;;  %v5605_v13 = vmax.f32 %v1867_v49, %v1995_v51  ;;  %2939 = vmatpush.msrb.mxu3 %v2263_v12 }
 0x1f1   : > { %v698_v6 = vmul.f32 %v4387_v36, %v5426_v44  ;;  %v699_v49 = vmul.f32 %v4389_v38, %v5426_v44  ;;  %v3399_v44 = vld [vmem:[%s6919_s5 + $0x48] sm:$0xff] }
 0x1f2   : > { %v1832_v54 = vadd.f32 %v1704_v20, %v1314_v52  ;;  %v1833_v11 = vadd.f32 %v1705_v61, %v1315_v28  ;;  %2347 = vmatmul.f32.gmra.mxu0 %v5596_v40  ;;  %2556 = vmatmul.f32.gmra.mxu1 %v5605_v13  ;;  %v5618_v20 = vpop.f32.mrf.mxu2  ;;  %v5622_v52 = vpop.f32.mrf.mxu3 }
 0x1f3   : > { %899 = vperm.xlu1 %4112, %v5343_v4   ;;  %7087 = vst [vmem:[#allocation88_spill] sm:$0xff] %v5618_v20  ;;  %v1606_v4 = vmul.f32 %v4379_v32, %v5487_v17  ;;  %v1607_v20 = vmul.f32 %v4381_v33, %v5487_v17  ;;  %3428 = vmatpush.msrb.mxu0 %v3399_v44 }
 0x1f4   : > { %v1966_v22 = vadd.f32 %v4405_v55, %v1832_v54  ;;  %v1967_v3 = vadd.f32 %v4407_v56, %v1833_v11  ;;  %7088 = vst [vmem:[#allocation89_spill] sm:$0xff] %v5622_v52  ;;  %v798_v17 = vmul.f32 %v4387_v36, %v5461_v42  ;;  %v1707_v44 = vmul.f32 %v4381_v33, %v5525_v8 }
 0x1f5   : > { %v852_v5 = vpop.permute.xlu1 %851 }
 0x1f6   : > { %v1088_v53 = vmul.f32 %v4383_v34, %v852_v5  ;;  %v1089_v28 = vmul.f32 %v4385_v35, %v852_v5  ;;  %v2094_v51 = vmul.f32 0.2, %v1966_v22  ;;  %v2095_v61 = vmul.f32 0.2, %v1967_v3  ;;  %v3415_v5 = vld [vmem:[%s6919_s5 + $0xc8] sm:$0xff] }
 0x1f7   : > { %1421 = vperm.xlu2 %4113, %v5381_v21   ;;  %4115 = vset.pattern.permute.xlu0 %v7014_v18 }
 0x1f8   : > { %v1216_v12 = vadd.f32 %v1088_v53, %v698_v6  ;;  %v1217_v54 = vadd.f32 %v1089_v28, %v699_v49  ;;  %v5625_v11 = vmax.f32 %v1966_v22, %v2094_v51  ;;  %v5636_v52 = vpop.permute.xlu2 %1377  ;;  %v5638_v6 = vmax.f32 %v1967_v3, %v2095_v61  ;;  %3637 = vmatpush.msrb.mxu1 %v3415_v5  ;;  %v5641_v49 = vpop.permute.xlu0 %424 }
 0x1f9   : > { %v799_v51 = vmul.f32 %v4389_v38, %v5461_v42 }
 0x1fa   : > { %7089 = vst [vmem:[#allocation90_spill] sm:$0xff] %v5625_v11  ;;  %2497 = vmatmul.f32.gmra.mxu2 %v5625_v11  ;;  %v1734_v22 = vadd.f32 %v1606_v4, %v1216_v12  ;;  %2706 = vmatmul.f32.gmra.mxu3 %v5638_v6  ;;  %v1735_v53 = vadd.f32 %v1607_v20, %v1217_v54  ;;  %v5670_v11 = vpop.f32.mrf.mxu3 }
 0x1fb   : > { %7090 = vst [vmem:[#allocation91_spill] sm:$0xff] %v5638_v6  ;;  %903 = vperm.xlu1 %4112, %v5381_v21   ;;  %v2229_v21 = vld [vmem:[%s6917_s3 + $0x8] sm:$0xff]  ;;  %v1706_v20 = vmul.f32 %v4379_v32, %v5525_v8 }
 0x1fc   : > { %v1868_v18 = vadd.f32 %v4405_v55, %v1734_v22  ;;  %v1869_v3 = vadd.f32 %v4407_v56, %v1735_v53  ;;  %2731 = vmatpush.msrb.mxu2 %v2229_v21  ;;  %v2261_v53 = vld [vmem:[%s6917_s3 + $0x108] sm:$0xff]  ;;  %7092 = vst [vmem:[#allocation93_spill] sm:$0xff] %v5670_v11 }
 0x1fd   : > { %v1052_v28 = vpop.permute.xlu1 %1051  ;;  %2940 = vmatpush.msrb.mxu3 %v2261_v53 }
 0x1fe   : > { %v1188_v4 = vmul.f32 %v4383_v34, %v1052_v28  ;;  %v1189_v61 = vmul.f32 %v4385_v35, %v1052_v28  ;;  %v1996_v12 = vmul.f32 0.2, %v1868_v18  ;;  %v1997_v54 = vmul.f32 0.2, %v1869_v3  ;;  %v5666_v28 = vpop.f32.mrf.mxu2 }
 0x1ff   : > { %1425 = vperm.xlu2 %4113, %v5414_v2   ;;  %7091 = vst [vmem:[#allocation92_spill] sm:$0xff] %v5666_v28 }
 0x200   : > { %v1316_v5 = vadd.f32 %v1188_v4, %v798_v17  ;;  %v1317_v22 = vadd.f32 %v1189_v61, %v799_v51  ;;  %v5661_v42 = vmax.f32 %v1868_v18, %v1996_v12  ;;  %v5668_v6 = vmax.f32 %v1869_v3, %v1997_v54  ;;  %v5672_v8 = vpop.permute.xlu2 %1381  ;;  %v5680_v3 = vpop.permute.xlu0 %429 }
 0x201   : > { %v700_v17 = vmul.f32 %v4387_v36, %v5511_v59  ;;  %v701_v61 = vmul.f32 %v4389_v38, %v5511_v59  ;;  %v3398_v59 = vld [vmem:[%s6919_s5 + $0x40] sm:$0xff] }
 0x202   : > { %v1834_v21 = vadd.f32 %v1706_v20, %v1316_v5  ;;  %v1835_v58 = vadd.f32 %v1707_v44, %v1317_v22  ;;  %2350 = vmatmul.f32.gmra.mxu0 %v5661_v42  ;;  %2559 = vmatmul.f32.gmra.mxu1 %v5668_v6  ;;  %v1609_v5 = vmul.f32 %v4381_v33, %v5568_v1 }
 0x203   : > { %907 = vperm.xlu1 %4112, %v5414_v2   ;;  %v1608_v2 = vmul.f32 %v4379_v32, %v5568_v1  ;;  %3429 = vmatpush.msrb.mxu0 %v3398_v59 }
 0x204   : > { %v1968_v18 = vadd.f32 %v4405_v55, %v1834_v21  ;;  %v1969_v4 = vadd.f32 %v4407_v56, %v1835_v58  ;;  %v3414_v21 = vld [vmem:[%s6919_s5 + $0xc0] sm:$0xff] }
 0x205   : > { %v856_v51 = vpop.permute.xlu1 %855  ;;  %3638 = vmatpush.msrb.mxu1 %v3414_v21  ;;  %v1709_v21 = vmul.f32 %v4381_v33, %v5603_v19 }
 0x206   : > { %v1090_v12 = vmul.f32 %v4383_v34, %v856_v51  ;;  %v1091_v20 = vmul.f32 %v4385_v35, %v856_v51  ;;  %v2096_v54 = vmul.f32 0.2, %v1968_v18  ;;  %v2097_v44 = vmul.f32 0.2, %v1969_v4 }
 0x207   : > { %1429 = vperm.xlu2 %4113, %v5442_v48  }
 0x208   : > { %v1218_v22 = vadd.f32 %v1090_v12, %v700_v17  ;;  %v1219_v53 = vadd.f32 %v1091_v20, %v701_v61  ;;  %v5692_v58 = vmax.f32 %v1968_v18, %v2096_v54  ;;  %v5700_v51 = vmax.f32 %v1969_v4, %v2097_v44  ;;  %v5702_v11 = vpop.permute.xlu2 %1385  ;;  %v5705_v18 = vpop.f32.mrf.mxu2 }
 0x209   : > { %7095 = vst [vmem:[#allocation96_spill] sm:$0xff] %v5705_v18  ;;  %v5708_v61 = vpop.f32.mrf.mxu3  ;;  %v800_v4 = vmul.f32 %v4387_v36, %v5553_v37 }
 0x20a   : > { %7093 = vst [vmem:[#allocation94_spill] sm:$0xff] %v5692_v58  ;;  %2500 = vmatmul.f32.gmra.mxu2 %v5692_v58  ;;  %v1736_v1 = vadd.f32 %v1608_v2, %v1218_v22  ;;  %v1737_v17 = vadd.f32 %v1609_v5, %v1219_v53  ;;  %2709 = vmatmul.f32.gmra.mxu3 %v5700_v51  ;;  %v3397_v58 = vld [vmem:[%s6919_s5 + $0x38] sm:$0xff] }
 0x20b   : > { %7094 = vst [vmem:[#allocation95_spill] sm:$0xff] %v5700_v51  ;;  %911 = vperm.xlu1 %4112, %v5442_v48   ;;  %v801_v2 = vmul.f32 %v4389_v38, %v5553_v37  ;;  %v1708_v53 = vmul.f32 %v4379_v32, %v5603_v19  ;;  %v5721_v48 = vpop.permute.xlu0 %434  ;;  %3430 = vmatpush.msrb.mxu0 %v3397_v58 }
 0x20c   : > { %7096 = vst [vmem:[#allocation97_spill] sm:$0xff] %v5708_v61  ;;  %v1870_v12 = vadd.f32 %v4405_v55, %v1736_v1  ;;  %v1871_v54 = vadd.f32 %v4407_v56, %v1737_v17 }
 0x20d   : > { %v1056_v20 = vpop.permute.xlu1 %1055 }
 0x20e   : > { %v1190_v44 = vmul.f32 %v4383_v34, %v1056_v20  ;;  %v1191_v5 = vmul.f32 %v4385_v35, %v1056_v20  ;;  %v1998_v22 = vmul.f32 0.2, %v1870_v12  ;;  %v1999_v59 = vmul.f32 0.2, %v1871_v54 }
 0x20f   : > { %1433 = vperm.xlu2 %4113, %v5469_v43  }
 0x210   : > { %v1318_v1 = vadd.f32 %v1190_v44, %v800_v4  ;;  %v1319_v61 = vadd.f32 %v1191_v5, %v801_v2  ;;  %v5726_v17 = vmax.f32 %v1870_v12, %v1998_v22  ;;  %v5728_v37 = vmax.f32 %v1871_v54, %v1999_v59  ;;  %v5730_v51 = vpop.permute.xlu2 %1389  ;;  %v5736_v4 = vpop.f32.mrf.mxu2 }
 0x211   : > { %7097 = vst [vmem:[#allocation98_spill] sm:$0xff] %v5736_v4  ;;  %v702_v12 = vmul.f32 %v4387_v36, %v5601_v47  ;;  %v5741_v44 = vpop.f32.mrf.mxu3  ;;  %v1611_v59 = vmul.f32 %v4381_v33, %v5636_v52 }
 0x212   : > { %v1836_v18 = vadd.f32 %v1708_v53, %v1318_v1  ;;  %v1837_v20 = vadd.f32 %v1709_v21, %v1319_v61  ;;  %2353 = vmatmul.f32.gmra.mxu0 %v5726_v17  ;;  %2562 = vmatmul.f32.gmra.mxu1 %v5728_v37  ;;  %7098 = vst [vmem:[#allocation99_spill] sm:$0xff] %v5741_v44 }
 0x213   : > { %915 = vperm.xlu1 %4112, %v5469_v43   ;;  %v703_v61 = vmul.f32 %v4389_v38, %v5601_v47 }
 0x214   : > { %v1970_v19 = vadd.f32 %v4405_v55, %v1836_v18  ;;  %v1971_v54 = vadd.f32 %v4407_v56, %v1837_v20  ;;  %v1610_v18 = vmul.f32 %v4379_v32, %v5636_v52  ;;  %v5752_v20 = vpop.permute.xlu0 %439  ;;  %v3413_v52 = vld [vmem:[%s6919_s5 + $0xb8] sm:$0xff] }
 0x215   : > { %v860_v2 = vpop.permute.xlu1 %859  ;;  %3639 = vmatpush.msrb.mxu1 %v3413_v52  ;;  %v5788_v52 = vpop.f32.mrf.mxu1 }
 0x216   : > { %v1092_v5 = vmul.f32 %v4383_v34, %v860_v2  ;;  %v1093_v22 = vmul.f32 %v4385_v35, %v860_v2  ;;  %v2098_v43 = vmul.f32 0.2, %v1970_v19  ;;  %v2099_v53 = vmul.f32 0.2, %v1971_v54 }
 0x217   : > { %1437 = vperm.xlu2 %4113, %v5514_v45  }
 0x218   : > { %v1220_v21 = vadd.f32 %v1092_v5, %v702_v12  ;;  %v1221_v1 = vadd.f32 %v1093_v22, %v703_v61  ;;  %v5754_v44 = vmax.f32 %v1970_v19, %v2098_v43  ;;  %v5756_v47 = vmax.f32 %v1971_v54, %v2099_v53  ;;  %v5764_v12 = vpop.permute.xlu2 %1393 }
 0x219   : > { %v704_v5 = vmul.f32 %v4387_v36, %v5641_v49  ;;  %v705_v22 = vmul.f32 %v4389_v38, %v5641_v49 }
 0x21a   : > { %7099 = vst [vmem:[#allocation100_spill] sm:$0xff] %v5754_v44  ;;  %v1738_v4 = vadd.f32 %v1610_v18, %v1220_v21  ;;  %v1739_v2 = vadd.f32 %v1611_v59, %v1221_v1  ;;  %2503 = vmatmul.f32.gmra.mxu2 %v5754_v44  ;;  %2712 = vmatmul.f32.gmra.mxu3 %v5756_v47  ;;  %v5777_v18 = vpop.f32.mrf.mxu2  ;;  %v5779_v59 = vpop.f32.mrf.mxu3 }
 0x21b   : > { %7100 = vst [vmem:[#allocation101_spill] sm:$0xff] %v5756_v47  ;;  %919 = vperm.xlu1 %4112, %v5514_v45   ;;  %v1612_v21 = vmul.f32 %v4379_v32, %v5672_v8  ;;  %v1613_v1 = vmul.f32 %v4381_v33, %v5672_v8 }
 0x21c   : > { %v1872_v54 = vadd.f32 %v4405_v55, %v1738_v4  ;;  %v1873_v61 = vadd.f32 %v4407_v56, %v1739_v2  ;;  %7101 = vst [vmem:[#allocation102_spill] sm:$0xff] %v5777_v18  ;;  %v5781_v4 = vpop.f32.mrf.mxu0  ;;  %v5794_v44 = vpop.permute.xlu0 %444 }
 0x21d   : > { %v864_v19 = vpop.permute.xlu1 %863  ;;  %7102 = vst [vmem:[#allocation103_spill] sm:$0xff] %v5779_v59 }
 0x21e   : > { %v1094_v43 = vmul.f32 %v4383_v34, %v864_v19  ;;  %v1095_v53 = vmul.f32 %v4385_v35, %v864_v19  ;;  %v2000_v45 = vmul.f32 0.2, %v1872_v54  ;;  %v2001_v58 = vmul.f32 0.2, %v1873_v61 }
 0x21f   : > { %1441 = vperm.xlu2 %4113, %v5545_v41  }
 0x220   : > { %v1222_v2 = vadd.f32 %v1094_v43, %v704_v5  ;;  %v1223_v49 = vadd.f32 %v1095_v53, %v705_v22  ;;  %v5790_v19 = vmax.f32 %v1872_v54, %v2000_v45  ;;  %v5792_v18 = vmax.f32 %v1873_v61, %v2001_v58  ;;  %v5800_v8 = vpop.permute.xlu2 %1397 }
 0x221   : > { %v706_v22 = vmul.f32 %v4387_v36, %v5680_v3  ;;  %v707_v43 = vmul.f32 %v4389_v38, %v5680_v3 }
 0x222   : > { %v1740_v47 = vadd.f32 %v1612_v21, %v1222_v2  ;;  %v1741_v59 = vadd.f32 %v1613_v1, %v1223_v49  ;;  %2356 = vmatmul.f32.gmra.mxu0 %v5790_v19  ;;  %2565 = vmatmul.f32.gmra.mxu1 %v5792_v18  ;;  %v5816_v21 = vpop.f32.mrf.mxu2  ;;  %v5822_v2 = vpop.f32.mrf.mxu3 }
 0x223   : > { %2732 = vmatmul.f32.vlgmr.msrb.gmra.mxu2 %v4899_v0  ;;  %2941 = vmatmul.f32.vlgmr.msrb.gmra.mxu3 %v4904_v60  ;;  %7103 = vst [vmem:[#allocation104_spill] sm:$0xff] %v5816_v21 }
 0x224   : > { %923 = vperm.xlu1 %4112, %v5545_v41   ;;  %v1874_v61 = vadd.f32 %v4405_v55, %v1740_v47  ;;  %v1875_v5 = vadd.f32 %v4407_v56, %v1741_v59  ;;  %v1614_v41 = vmul.f32 %v4379_v32, %v5702_v11  ;;  %v1615_v47 = vmul.f32 %v4381_v33, %v5702_v11  ;;  %v5824_v49 = vpop.f32.mrf.mxu0  ;;  %v3396_v11 = vld [vmem:[%s6919_s5 + $0x30] sm:$0xff] }
 0x225   : > { %v868_v54 = vpop.permute.xlu1 %867  ;;  %7104 = vst [vmem:[#allocation105_spill] sm:$0xff] %v5822_v2  ;;  %3431 = vmatpush.msrb.mxu0 %v3396_v11 }
 0x226   : > { %v1096_v53 = vmul.f32 %v4383_v34, %v868_v54  ;;  %v1097_v0 = vmul.f32 %v4385_v35, %v868_v54  ;;  %v2002_v60 = vmul.f32 0.2, %v1874_v61  ;;  %v2003_v45 = vmul.f32 0.2, %v1875_v5 }
 0x227   : > { %1445 = vperm.xlu2 %4113, %v5584_v27  }
 0x228   : > { %v1224_v58 = vadd.f32 %v1096_v53, %v706_v22  ;;  %v1225_v59 = vadd.f32 %v1097_v0, %v707_v43  ;;  %v5818_v1 = vmax.f32 %v1874_v61, %v2002_v60  ;;  %v5820_v3 = vmax.f32 %v1875_v5, %v2003_v45  ;;  %v5829_v22 = vpop.f32.mrf.mxu1  ;;  %v3412_v61 = vld [vmem:[%s6919_s5 + $0xb0] sm:$0xff]  ;;  %v7107_v43 = vld [vmem:[#allocation41_spill] sm:$0xff]  ;;  %v5841_v60 = vpop.permute.xlu0 %449 }
 0x229   : > { %7105 = vst [vmem:[#allocation106_spill] sm:$0xff] %v5829_v22  ;;  %v7106_v5 = vld [vmem:[#allocation40_spill] sm:$0xff]  ;;  %v708_v0 = vmul.f32 %v4387_v36, %v5721_v48  ;;  %3640 = vmatpush.msrb.mxu1 %v3412_v61 }
 0x22a   : > { %v1742_v54 = vadd.f32 %v1614_v41, %v1224_v58  ;;  %v1743_v28 = vadd.f32 %v1615_v47, %v1225_v59  ;;  %2359 = vmatmul.f32.gmra.mxu0 %v5818_v1  ;;  %2568 = vmatmul.f32.gmra.mxu1 %v5820_v3  ;;  %v709_v47 = vmul.f32 %v4389_v38, %v5721_v48  ;;  %v5857_v48 = vpop.f32.mrf.mxu2 }
 0x22b   : > { %2735 = vmatmul.f32.gmra.mxu2 %v7106_v5  ;;  %2944 = vmatmul.f32.gmra.mxu3 %v7107_v43  ;;  %v5851_v43 = vpop.permute.xlu2 %1401  ;;  %7108 = vst [vmem:[#allocation40_spill] sm:$0xff] %v5857_v48 }
 0x22c   : > { %v1876_v53 = vadd.f32 %v4405_v55, %v1742_v54  ;;  %927 = vperm.xlu1 %4112, %v5584_v27   ;;  %v1877_v41 = vadd.f32 %v4407_v56, %v1743_v28  ;;  %v1616_v54 = vmul.f32 %v4379_v32, %v5730_v51  ;;  %v1617_v27 = vmul.f32 %v4381_v33, %v5730_v51  ;;  %v5863_v61 = vpop.f32.mrf.mxu0  ;;  %v7112_v51 = vld [vmem:[#allocation48_spill] sm:$0xff] }
 0x22d   : > { %v872_v45 = vpop.permute.xlu1 %871  ;;  %7110 = vst [vmem:[#allocation107_spill] sm:$0xff] %v5863_v61 }
 0x22e   : > { %v1098_v58 = vmul.f32 %v4383_v34, %v872_v45  ;;  %v1099_v59 = vmul.f32 %v4385_v35, %v872_v45  ;;  %v2004_v5 = vmul.f32 0.2, %v1876_v53  ;;  %v2005_v2 = vmul.f32 0.2, %v1877_v41  ;;  %v5861_v45 = vpop.f32.mrf.mxu3 }
 0x22f   : > { %7109 = vst [vmem:[#allocation41_spill] sm:$0xff] %v5861_v45 }
 0x230   : > { %v1226_v28 = vadd.f32 %v1098_v58, %v708_v0  ;;  %v1227_v11 = vadd.f32 %v1099_v59, %v709_v47  ;;  %v5855_v21 = vmax.f32 %v1876_v53, %v2004_v5  ;;  %v5859_v15 = vmax.f32 %v1877_v41, %v2005_v2  ;;  %v5865_v22 = vpop.f32.mrf.mxu1  ;;  %v7113_v53 = vld [vmem:[#allocation49_spill] sm:$0xff] }
 0x231   : > { %7111 = vst [vmem:[#allocation108_spill] sm:$0xff] %v5865_v22  ;;  %v710_v41 = vmul.f32 %v4387_v36, %v5752_v20  ;;  %v711_v58 = vmul.f32 %v4389_v38, %v5752_v20  ;;  %v3411_v22 = vld [vmem:[%s6919_s5 + $0xa8] sm:$0xff] }
 0x232   : > { %v1744_v63 = vadd.f32 %v1616_v54, %v1226_v28  ;;  %v1745_v57 = vadd.f32 %v1617_v27, %v1227_v11  ;;  %2362 = vmatmul.f32.gmra.mxu0 %v5855_v21  ;;  %2571 = vmatmul.f32.gmra.mxu1 %v5859_v15  ;;  %v5879_v27 = vpop.permute.xlu0 %454  ;;  %v1618_v28 = vmul.f32 %v4379_v32, %v5764_v12  ;;  %v5887_v45 = vpop.f32.mrf.mxu2 }
 0x233   : > { %2738 = vmatmul.f32.gmra.mxu2 %v7112_v51  ;;  %2947 = vmatmul.f32.gmra.mxu3 %v7113_v53  ;;  %7114 = vst [vmem:[#allocation48_spill] sm:$0xff] %v5887_v45  ;;  %v5889_v20 = vpop.permute.xlu2 %1405 }
 0x234   : > { %v1878_v0 = vadd.f32 %v4405_v55, %v1744_v63  ;;  %v1879_v2 = vadd.f32 %v4407_v56, %v1745_v57  ;;  %v1619_v57 = vmul.f32 %v4381_v33, %v5764_v12  ;;  %3641 = vmatpush.msrb.mxu1 %v3411_v22 }
 0x235   : > { %v876_v47 = vpop.permute.xlu1 %875 }
 0x236   : > { %v1100_v59 = vmul.f32 %v4383_v34, %v876_v47  ;;  %v1101_v5 = vmul.f32 %v4385_v35, %v876_v47  ;;  %v2006_v54 = vmul.f32 0.2, %v1878_v0  ;;  %v2007_v63 = vmul.f32 0.2, %v1879_v2  ;;  %v3395_v47 = vld [vmem:[%s6919_s5 + $0x28] sm:$0xff]  ;;  %v5899_v61 = vpop.f32.mrf.mxu3 }
 0x237   : > { %7115 = vst [vmem:[#allocation49_spill] sm:$0xff] %v5899_v61  ;;  %3432 = vmatpush.msrb.mxu0 %v3395_v47 }
 0x238   : > { %v1228_v11 = vadd.f32 %v1100_v59, %v710_v41  ;;  %v1229_v51 = vadd.f32 %v1101_v5, %v711_v58  ;;  %v5885_v53 = vmax.f32 %v1878_v0, %v2006_v54  ;;  %v5891_v48 = vmax.f32 %v1879_v2, %v2007_v63  ;;  %v5903_v0 = vpop.f32.mrf.mxu0  ;;  %v5911_v5 = vpop.f32.mrf.mxu1 }
 0x239   : > { %7116 = vst [vmem:[#allocation109_spill] sm:$0xff] %v5903_v0  ;;  %v712_v59 = vmul.f32 %v4387_v36, %v5794_v44  ;;  %v713_v54 = vmul.f32 %v4389_v38, %v5794_v44 }
 0x23a   : > { %v1746_v12 = vadd.f32 %v1618_v28, %v1228_v11  ;;  %v1747_v41 = vadd.f32 %v1619_v57, %v1229_v51  ;;  %2365 = vmatmul.f32.gmra.mxu0 %v5885_v53  ;;  %2574 = vmatmul.f32.gmra.mxu1 %v5891_v48  ;;  %7117 = vst [vmem:[#allocation110_spill] sm:$0xff] %v5911_v5  ;;  %v5925_v61 = vpop.permute.xlu0 %459 }
 0x23b   : > { %2741 = vmatmul.f32.gmra.mxu2 %v5102_v7  ;;  %2950 = vmatmul.f32.gmra.mxu3 %v5104_v46  ;;  %v1620_v46 = vmul.f32 %v4379_v32, %v5800_v8  ;;  %v1621_v11 = vmul.f32 %v4381_v33, %v5800_v8  ;;  %v5931_v0 = vpop.permute.xlu2 %1409 }
 0x23c   : > { %v1880_v2 = vadd.f32 %v4405_v55, %v1746_v12  ;;  %v1881_v58 = vadd.f32 %v4407_v56, %v1747_v41  ;;  %v5923_v41 = vpop.f32.mrf.mxu2 }
 0x23d   : > { %v880_v22 = vpop.permute.xlu1 %879  ;;  %7118 = vst [vmem:[#allocation111_spill] sm:$0xff] %v5923_v41 }
 0x23e   : > { %v1102_v28 = vmul.f32 %v4383_v34, %v880_v22  ;;  %v1103_v63 = vmul.f32 %v4385_v35, %v880_v22  ;;  %v2008_v7 = vmul.f32 0.2, %v1880_v2  ;;  %v2009_v57 = vmul.f32 0.2, %v1881_v58  ;;  %v5929_v45 = vpop.f32.mrf.mxu3 }
 0x23f   : > { %7119 = vst [vmem:[#allocation112_spill] sm:$0xff] %v5929_v45 }
 0x240   : > { %v1230_v51 = vadd.f32 %v1102_v28, %v712_v59  ;;  %v1231_v47 = vadd.f32 %v1103_v63, %v713_v54  ;;  %v5921_v12 = vmax.f32 %v1880_v2, %v2008_v7  ;;  %v5927_v44 = vmax.f32 %v1881_v58, %v2009_v57  ;;  %v5943_v28 = vpop.f32.mrf.mxu0 }
 0x241   : > { %v714_v58 = vmul.f32 %v4387_v36, %v5841_v60  ;;  %v715_v54 = vmul.f32 %v4389_v38, %v5841_v60  ;;  %7120 = vst [vmem:[#allocation113_spill] sm:$0xff] %v5943_v28  ;;  %v3394_v60 = vld [vmem:[%s6919_s5 + $0x20] sm:$0xff] }
 0x242   : > { %v1748_v22 = vadd.f32 %v1620_v46, %v1230_v51  ;;  %v1749_v5 = vadd.f32 %v1621_v11, %v1231_v47  ;;  %2368 = vmatmul.f32.gmra.mxu0 %v5921_v12  ;;  %2577 = vmatmul.f32.gmra.mxu1 %v5927_v44  ;;  %v5947_v46 = vpop.f32.mrf.mxu1  ;;  %v3410_v11 = vld [vmem:[%s6919_s5 + $0xa0] sm:$0xff]  ;;  %v5967_v28 = vpop.permute.xlu0 %464 }
 0x243   : > { %2744 = vmatmul.f32.gmra.mxu2 %v5137_v31  ;;  %2953 = vmatmul.f32.gmra.mxu3 %v5142_v39  ;;  %7121 = vst [vmem:[#allocation114_spill] sm:$0xff] %v5947_v46  ;;  %v1622_v39 = vmul.f32 %v4379_v32, %v5851_v43 }
 0x244   : > { %v1882_v8 = vadd.f32 %v4405_v55, %v1748_v22  ;;  %v1883_v2 = vadd.f32 %v4407_v56, %v1749_v5  ;;  %v1623_v5 = vmul.f32 %v4381_v33, %v5851_v43  ;;  %3433 = vmatpush.msrb.mxu0 %v3394_v60  ;;  %3642 = vmatpush.msrb.mxu1 %v3410_v11 }
 0x245   : > { %v884_v59 = vpop.permute.xlu1 %883 }
 0x246   : > { %v1104_v63 = vmul.f32 %v4383_v34, %v884_v59  ;;  %v1105_v7 = vmul.f32 %v4385_v35, %v884_v59  ;;  %v2010_v31 = vmul.f32 0.2, %v1882_v8  ;;  %v2011_v57 = vmul.f32 0.2, %v1883_v2  ;;  %v5961_v59 = vpop.f32.mrf.mxu2  ;;  %v5965_v43 = vpop.f32.mrf.mxu3 }
 0x247   : > { %7122 = vst [vmem:[#allocation115_spill] sm:$0xff] %v5961_v59 }
 0x248   : > { %v1232_v51 = vadd.f32 %v1104_v63, %v714_v58  ;;  %v1233_v47 = vadd.f32 %v1105_v7, %v715_v54  ;;  %v5959_v22 = vmax.f32 %v1882_v8, %v2010_v31  ;;  %v5963_v45 = vmax.f32 %v1883_v2, %v2011_v57  ;;  %7123 = vst [vmem:[#allocation116_spill] sm:$0xff] %v5965_v43  ;;  %v5979_v63 = vpop.permute.xlu2 %1413 }
 0x249   : > { %v716_v2 = vmul.f32 %v4387_v36, %v5879_v27  ;;  %v717_v54 = vmul.f32 %v4389_v38, %v5879_v27 }
 0x24a   : > { %v1750_v41 = vadd.f32 %v1622_v39, %v1232_v51  ;;  %v1751_v46 = vadd.f32 %v1623_v5, %v1233_v47  ;;  %2371 = vmatmul.f32.gmra.mxu0 %v5959_v22  ;;  %2580 = vmatmul.f32.gmra.mxu1 %v5963_v45  ;;  %v5993_v51 = vpop.f32.mrf.mxu1 }
 0x24b   : > { %2747 = vmatmul.f32.gmra.mxu2 %v5190_v26  ;;  %2956 = vmatmul.f32.gmra.mxu3 %v5194_v29  ;;  %v1624_v29 = vmul.f32 %v4379_v32, %v5889_v20  ;;  %7124 = vst [vmem:[#allocation117_spill] sm:$0xff] %v5993_v51 }
 0x24c   : > { %v1884_v8 = vadd.f32 %v4405_v55, %v1750_v41  ;;  %v1885_v58 = vadd.f32 %v4407_v56, %v1751_v46  ;;  %v1625_v41 = vmul.f32 %v4381_v33, %v5889_v20  ;;  %v5987_v46 = vpop.f32.mrf.mxu0 }
 0x24d   : > { %v888_v7 = vpop.permute.xlu1 %887 }
 0x24e   : > { %v1106_v31 = vmul.f32 %v4383_v34, %v888_v7  ;;  %v1107_v39 = vmul.f32 %v4385_v35, %v888_v7  ;;  %v2012_v26 = vmul.f32 0.2, %v1884_v8  ;;  %v2013_v5 = vmul.f32 0.2, %v1885_v58  ;;  %v5995_v43 = vpop.f32.mrf.mxu2  ;;  %v5999_v59 = vpop.f32.mrf.mxu3 }
 0x24f   : > { %7125 = vst [vmem:[#allocation118_spill] sm:$0xff] %v5995_v43 }
 0x250   : > { %v1234_v57 = vadd.f32 %v1106_v31, %v716_v2  ;;  %v1235_v60 = vadd.f32 %v1107_v39, %v717_v54  ;;  %v5989_v27 = vmax.f32 %v1884_v8, %v2012_v26  ;;  %v5991_v11 = vmax.f32 %v1885_v58, %v2013_v5  ;;  %7126 = vst [vmem:[#allocation119_spill] sm:$0xff] %v5999_v59  ;;  %v470_v58 = vpop.permute.xlu0 %469  ;;  %v3393_v26 = vld [vmem:[%s6919_s5 + $0x18] sm:$0xff]  ;;  %v6015_v5 = vpop.permute.xlu2 %1417 }
 0x251   : > { %v718_v2 = vmul.f32 %v4387_v36, %v5925_v61  ;;  %3434 = vmatpush.msrb.mxu0 %v3393_v26 }
 0x252   : > { %v1752_v47 = vadd.f32 %v1624_v29, %v1234_v57  ;;  %v1753_v7 = vadd.f32 %v1625_v41, %v1235_v60  ;;  %2374 = vmatmul.f32.gmra.mxu0 %v5989_v27  ;;  %2583 = vmatmul.f32.gmra.mxu1 %v5991_v11  ;;  %v6029_v51 = vpop.f32.mrf.mxu1 }
 0x253   : > { %2750 = vmatmul.f32.gmra.mxu2 %v5219_v25  ;;  %2959 = vmatmul.f32.gmra.mxu3 %v5229_v24  ;;  %v3409_v25 = vld [vmem:[%s6919_s5 + $0x98] sm:$0xff]  ;;  %v719_v24 = vmul.f32 %v4389_v38, %v5925_v61  ;;  %v1627_v61 = vmul.f32 %v4381_v33, %v5931_v0  ;;  %7128 = vst [vmem:[#allocation121_spill] sm:$0xff] %v6029_v51 }
 0x254   : > { %v1886_v20 = vadd.f32 %v4405_v55, %v1752_v47  ;;  %v1887_v8 = vadd.f32 %v4407_v56, %v1753_v7  ;;  %3643 = vmatpush.msrb.mxu1 %v3409_v25  ;;  %v1626_v47 = vmul.f32 %v4379_v32, %v5931_v0  ;;  %v6025_v43 = vpop.f32.mrf.mxu0  ;;  %v721_v25 = vmul.f32 %v4389_v38, %v5967_v28 }
 0x255   : > { %v892_v54 = vpop.permute.xlu1 %891  ;;  %7127 = vst [vmem:[#allocation120_spill] sm:$0xff] %v6025_v43 }
 0x256   : > { %v2014_v31 = vmul.f32 0.2, %v1886_v20  ;;  %v2015_v39 = vmul.f32 0.2, %v1887_v8  ;;  %v1108_v29 = vmul.f32 %v4383_v34, %v892_v54  ;;  %v1109_v41 = vmul.f32 %v4385_v35, %v892_v54  ;;  %v6035_v54 = vpop.f32.mrf.mxu2  ;;  %v6040_v0 = vpop.f32.mrf.mxu3 }
 0x257   : > { %7129 = vst [vmem:[#allocation122_spill] sm:$0xff] %v6035_v54 }
 0x258   : > { %v6019_v57 = vmax.f32 %v1886_v20, %v2014_v31  ;;  %v6021_v60 = vmax.f32 %v1887_v8, %v2015_v39  ;;  %v1236_v7 = vadd.f32 %v1108_v29, %v718_v2  ;;  %v1237_v59 = vadd.f32 %v1109_v41, %v719_v24  ;;  %7130 = vst [vmem:[#allocation123_spill] sm:$0xff] %v6040_v0  ;;  %v475_v24 = vpop.permute.xlu0 %474  ;;  %v1422_v41 = vpop.permute.xlu2 %1421 }
 0x259   : > { %v720_v31 = vmul.f32 %v4387_v36, %v5967_v28 }
 0x25a   : > { %2377 = vmatmul.f32.gmra.mxu0 %v6019_v57  ;;  %2586 = vmatmul.f32.gmra.mxu1 %v6021_v60  ;;  %v1754_v20 = vadd.f32 %v1626_v47, %v1236_v7  ;;  %v1755_v8 = vadd.f32 %v1627_v61, %v1237_v59  ;;  %v6057_v54 = vpop.f32.mrf.mxu1 }
 0x25b   : > { %2753 = vmatmul.f32.gmra.mxu2 %v5333_v9  ;;  %2962 = vmatmul.f32.gmra.mxu3 %v5335_v30  ;;  %7132 = vst [vmem:[#allocation125_spill] sm:$0xff] %v6057_v54 }
 0x25c   : > { %v1888_v2 = vadd.f32 %v4405_v55, %v1754_v20  ;;  %v1889_v26 = vadd.f32 %v4407_v56, %v1755_v8  ;;  %v6047_v61 = vpop.f32.mrf.mxu0  ;;  %v1628_v20 = vmul.f32 %v4379_v32, %v5979_v63  ;;  %v1629_v8 = vmul.f32 %v4381_v33, %v5979_v63 }
 0x25d   : > { %v896_v39 = vpop.permute.xlu1 %895  ;;  %7131 = vst [vmem:[#allocation124_spill] sm:$0xff] %v6047_v61  ;;  %v722_v63 = vmul.f32 %v4387_v36, %v470_v58 }
 0x25e   : > { %v1110_v9 = vmul.f32 %v4383_v34, %v896_v39  ;;  %v1111_v30 = vmul.f32 %v4385_v35, %v896_v39  ;;  %v2016_v59 = vmul.f32 0.2, %v1888_v2  ;;  %v2017_v29 = vmul.f32 0.2, %v1889_v26 }
 0x260   : > { %v1238_v47 = vadd.f32 %v1110_v9, %v720_v31  ;;  %v1239_v7 = vadd.f32 %v1111_v30, %v721_v25  ;;  %v6053_v0 = vmax.f32 %v1888_v2, %v2016_v59  ;;  %v6055_v28 = vmax.f32 %v1889_v26, %v2017_v29  ;;  %v6061_v25 = vpop.f32.mrf.mxu2  ;;  %v6066_v2 = vpop.f32.mrf.mxu3  ;;  %v3392_v59 = vld [vmem:[%s6919_s5 + $0x10] sm:$0xff] }
 0x261   : > { %7133 = vst [vmem:[#allocation126_spill] sm:$0xff] %v6061_v25  ;;  %v3408_v29 = vld [vmem:[%s6919_s5 + $0x90] sm:$0xff]  ;;  %3435 = vmatpush.msrb.mxu0 %v3392_v59  ;;  %v1426_v61 = vpop.permute.xlu2 %1425 }
 0x262   : > { %2380 = vmatmul.f32.gmra.mxu0 %v6053_v0  ;;  %2589 = vmatmul.f32.gmra.mxu1 %v6055_v28  ;;  %v1756_v31 = vadd.f32 %v1628_v20, %v1238_v47  ;;  %v1757_v39 = vadd.f32 %v1629_v8, %v1239_v7  ;;  %7134 = vst [vmem:[#allocation127_spill] sm:$0xff] %v6066_v2  ;;  %v480_v8 = vpop.permute.xlu0 %479 }
 0x263   : > { %2756 = vmatmul.f32.gmra.mxu2 %v5363_v16  ;;  %2965 = vmatmul.f32.gmra.mxu3 %v5371_v50  ;;  %v723_v16 = vmul.f32 %v4389_v38, %v470_v58 }
 0x264   : > { %v1890_v9 = vadd.f32 %v4405_v55, %v1756_v31  ;;  %v1891_v30 = vadd.f32 %v4407_v56, %v1757_v39  ;;  %3644 = vmatpush.msrb.mxu1 %v3408_v29  ;;  %v1630_v31 = vmul.f32 %v4379_v32, %v6015_v5  ;;  %v1631_v39 = vmul.f32 %v4381_v33, %v6015_v5  ;;  %v6087_v59 = vpop.f32.mrf.mxu0  ;;  %v6091_v29 = vpop.f32.mrf.mxu1 }
 0x265   : > { %v900_v26 = vpop.permute.xlu1 %899  ;;  %7135 = vst [vmem:[#allocation128_spill] sm:$0xff] %v6091_v29 }
 0x266   : > { %v1112_v50 = vmul.f32 %v4383_v34, %v900_v26  ;;  %v1113_v47 = vmul.f32 %v4385_v35, %v900_v26  ;;  %v2018_v7 = vmul.f32 0.2, %v1890_v9  ;;  %v2019_v20 = vmul.f32 0.2, %v1891_v30 }
 0x268   : > { %v1240_v2 = vadd.f32 %v1112_v50, %v722_v63  ;;  %v1241_v25 = vadd.f32 %v1113_v47, %v723_v16  ;;  %v6083_v54 = vmax.f32 %v1890_v9, %v2018_v7  ;;  %v6085_v58 = vmax.f32 %v1891_v30, %v2019_v20  ;;  %v6093_v43 = vpop.f32.mrf.mxu2  ;;  %v6101_v9 = vpop.f32.mrf.mxu3 }
 0x269   : > { %7136 = vst [vmem:[#allocation129_spill] sm:$0xff] %v6093_v43  ;;  %v1430_v43 = vpop.permute.xlu2 %1429 }
 0x26a   : > { %v1758_v51 = vadd.f32 %v1630_v31, %v1240_v2  ;;  %v1759_v26 = vadd.f32 %v1631_v39, %v1241_v25  ;;  %2383 = vmatmul.f32.gmra.mxu0 %v6083_v54  ;;  %2592 = vmatmul.f32.gmra.mxu1 %v6085_v58  ;;  %v724_v25 = vmul.f32 %v4387_v36, %v475_v24 }
 0x26b   : > { %2759 = vmatmul.f32.gmra.mxu2 %v5398_v10  ;;  %2968 = vmatmul.f32.gmra.mxu3 %v5400_v14  ;;  %v725_v2 = vmul.f32 %v4389_v38, %v475_v24  ;;  %7137 = vst [vmem:[#allocation130_spill] sm:$0xff] %v6101_v9  ;;  %v1632_v10 = vmul.f32 %v4379_v32, %v1422_v41  ;;  %v485_v24 = vpop.permute.xlu0 %484 }
 0x26c   : > { %v1892_v5 = vadd.f32 %v4405_v55, %v1758_v51  ;;  %v1893_v63 = vadd.f32 %v4407_v56, %v1759_v26  ;;  %v1633_v14 = vmul.f32 %v4381_v33, %v1422_v41 }
 0x26d   : > { %v904_v30 = vpop.permute.xlu1 %903 }
 0x26e   : > { %v1114_v16 = vmul.f32 %v4383_v34, %v904_v30  ;;  %v1115_v50 = vmul.f32 %v4385_v35, %v904_v30  ;;  %v2020_v47 = vmul.f32 0.2, %v1892_v5  ;;  %v2021_v7 = vmul.f32 0.2, %v1893_v63 }
 0x270   : > { %v1242_v51 = vadd.f32 %v1114_v16, %v724_v25  ;;  %v1243_v20 = vadd.f32 %v1115_v50, %v725_v2  ;;  %v6107_v31 = vmax.f32 %v1892_v5, %v2020_v47  ;;  %v6109_v39 = vmax.f32 %v1893_v63, %v2021_v7  ;;  %v6113_v30 = vpop.f32.mrf.mxu2  ;;  %v6121_v2 = vpop.f32.mrf.mxu3  ;;  %v3391_v50 = vld [vmem:[%s6919_s5 + $0x8] sm:$0xff] }
 0x271   : > { %7138 = vst [vmem:[#allocation131_spill] sm:$0xff] %v6113_v30  ;;  %v726_v63 = vmul.f32 %v4387_v36, %v480_v8  ;;  %v727_v25 = vmul.f32 %v4389_v38, %v480_v8  ;;  %3436 = vmatpush.msrb.mxu0 %v3391_v50  ;;  %v6131_v8 = vpop.f32.mrf.mxu0 }
 0x272   : > { %v1760_v26 = vadd.f32 %v1632_v10, %v1242_v51  ;;  %v1761_v9 = vadd.f32 %v1633_v14, %v1243_v20  ;;  %2386 = vmatmul.f32.gmra.mxu0 %v6107_v31  ;;  %2595 = vmatmul.f32.gmra.mxu1 %v6109_v39  ;;  %7139 = vst [vmem:[#allocation132_spill] sm:$0xff] %v6121_v2  ;;  %v6133_v10 = vpop.f32.mrf.mxu1 }
 0x273   : > { %2762 = vmatmul.f32.gmra.mxu2 %v5527_v23  ;;  %2971 = vmatmul.f32.gmra.mxu3 %v5529_v62  ;;  %v3407_v23 = vld [vmem:[%s6919_s5 + $0x88] sm:$0xff]  ;;  %7140 = vst [vmem:[#allocation133_spill] sm:$0xff] %v6133_v10  ;;  %v1634_v14 = vmul.f32 %v4379_v32, %v1426_v61  ;;  %v1635_v51 = vmul.f32 %v4381_v33, %v1426_v61  ;;  %v490_v50 = vpop.permute.xlu0 %489 }
 0x274   : > { %v1894_v41 = vadd.f32 %v4405_v55, %v1760_v26  ;;  %v1895_v5 = vadd.f32 %v4407_v56, %v1761_v9  ;;  %3645 = vmatpush.msrb.mxu1 %v3407_v23 }
 0x275   : > { %v908_v16 = vpop.permute.xlu1 %907 }
 0x276   : > { %v1116_v62 = vmul.f32 %v4383_v34, %v908_v16  ;;  %v1117_v47 = vmul.f32 %v4385_v35, %v908_v16  ;;  %v2022_v9 = vmul.f32 0.2, %v1894_v41  ;;  %v2023_v7 = vmul.f32 0.2, %v1895_v5 }
 0x278   : > { %v1244_v20 = vadd.f32 %v1116_v62, %v726_v63  ;;  %v1245_v26 = vadd.f32 %v1117_v47, %v727_v25  ;;  %v6137_v2 = vmax.f32 %v1894_v41, %v2022_v9  ;;  %v6139_v30 = vmax.f32 %v1895_v5, %v2023_v7  ;;  %v6143_v23 = vpop.f32.mrf.mxu2  ;;  %v6151_v25 = vpop.f32.mrf.mxu3 }
 0x279   : > { %7141 = vst [vmem:[#allocation134_spill] sm:$0xff] %v6143_v23  ;;  %v728_v5 = vmul.f32 %v4387_v36, %v485_v24  ;;  %v729_v63 = vmul.f32 %v4389_v38, %v485_v24  ;;  %v1434_v47 = vpop.permute.xlu2 %1433 }
 0x27a   : > { %v1762_v29 = vadd.f32 %v1634_v14, %v1244_v20  ;;  %v1763_v16 = vadd.f32 %v1635_v51, %v1245_v26  ;;  %2389 = vmatmul.f32.gmra.mxu0 %v6137_v2  ;;  %2598 = vmatmul.f32.gmra.mxu1 %v6139_v30  ;;  %7142 = vst [vmem:[#allocation135_spill] sm:$0xff] %v6151_v25  ;;  %v6155_v51 = vpop.f32.mrf.mxu0 }
 0x27b   : > { %2765 = vmatmul.f32.gmra.mxu2 %v5596_v40  ;;  %2974 = vmatmul.f32.gmra.mxu3 %v5605_v13  ;;  %7143 = vst [vmem:[#allocation136_spill] sm:$0xff] %v6155_v51  ;;  %v6157_v13 = vpop.f32.mrf.mxu1  ;;  %v1637_v20 = vmul.f32 %v4381_v33, %v1430_v43 }
 0x27c   : > { %v1896_v61 = vadd.f32 %v4405_v55, %v1762_v29  ;;  %v1897_v41 = vadd.f32 %v4407_v56, %v1763_v16  ;;  %7144 = vst [vmem:[#allocation137_spill] sm:$0xff] %v6157_v13  ;;  %v1636_v29 = vmul.f32 %v4379_v32, %v1430_v43 }
 0x27d   : > { %v912_v62 = vpop.permute.xlu1 %911 }
 0x27e   : > { %v1118_v9 = vmul.f32 %v4383_v34, %v912_v62  ;;  %v1119_v7 = vmul.f32 %v4385_v35, %v912_v62  ;;  %v2024_v14 = vmul.f32 0.2, %v1896_v61  ;;  %v2025_v40 = vmul.f32 0.2, %v1897_v41 }
 0x280   : > { %v1246_v26 = vadd.f32 %v1118_v9, %v728_v5  ;;  %v1247_v24 = vadd.f32 %v1119_v7, %v729_v63  ;;  %v6161_v16 = vmax.f32 %v1896_v61, %v2024_v14  ;;  %v6163_v25 = vmax.f32 %v1897_v41, %v2025_v40  ;;  %v6167_v62 = vpop.f32.mrf.mxu2  ;;  %v6175_v63 = vpop.f32.mrf.mxu3 }
 0x281   : > { %7146 = vst [vmem:[#allocation139_spill] sm:$0xff] %v6167_v62  ;;  %v730_v61 = vmul.f32 %v4387_v36, %v490_v50  ;;  %v731_v41 = vmul.f32 %v4389_v38, %v490_v50  ;;  %v495_v7 = vpop.permute.xlu0 %494  ;;  %v1638_v50 = vmul.f32 %v4379_v32, %v1434_v47 }
 0x282   : > { %7145 = vst [vmem:[#allocation138_spill] sm:$0xff] %v6163_v25  ;;  %v1764_v23 = vadd.f32 %v1636_v29, %v1246_v26  ;;  %v1765_v10 = vadd.f32 %v1637_v20, %v1247_v24  ;;  %2392 = vmatmul.f32.gmra.mxu0 %v6161_v16  ;;  %2601 = vmatmul.f32.gmra.mxu1 %v6163_v25  ;;  %v6187_v20 = vpop.f32.mrf.mxu0  ;;  %v1438_v24 = vpop.permute.xlu2 %1437 }
 0x283   : > { %2768 = vmatmul.f32.gmra.mxu2 %v5661_v42  ;;  %2977 = vmatmul.f32.gmra.mxu3 %v5668_v6  ;;  %7147 = vst [vmem:[#allocation140_spill] sm:$0xff] %v6175_v63  ;;  %v3390_v6 = vld [vmem:[%s6919_s5] sm:$0xff]  ;;  %v6189_v26 = vpop.f32.mrf.mxu1 }
 0x284   : > { %v1898_v43 = vadd.f32 %v4405_v55, %v1764_v23  ;;  %v1899_v5 = vadd.f32 %v4407_v56, %v1765_v10  ;;  %v3406_v10 = vld [vmem:[%s6919_s5 + $0x80] sm:$0xff]  ;;  %v1639_v23 = vmul.f32 %v4381_v33, %v1434_v47  ;;  %3437 = vmatpush.msrb.mxu0 %v3390_v6 }
 0x285   : > { %v916_v9 = vpop.permute.xlu1 %915  ;;  %3646 = vmatpush.msrb.mxu1 %v3406_v10 }
 0x286   : > { %v1120_v14 = vmul.f32 %v4383_v34, %v916_v9  ;;  %v1121_v40 = vmul.f32 %v4385_v35, %v916_v9  ;;  %v2026_v29 = vmul.f32 0.2, %v1898_v43  ;;  %v2027_v42 = vmul.f32 0.2, %v1899_v5 }
 0x288   : > { %v1248_v9 = vadd.f32 %v1120_v14, %v730_v61  ;;  %v1249_v63 = vadd.f32 %v1121_v40, %v731_v41  ;;  %v6191_v62 = vmax.f32 %v1898_v43, %v2026_v29  ;;  %v6193_v13 = vmax.f32 %v1899_v5, %v2027_v42  ;;  %v6197_v47 = vpop.f32.mrf.mxu2  ;;  %v6205_v41 = vpop.f32.mrf.mxu3 }
 0x289   : > { %7148 = vst [vmem:[#allocation141_spill] sm:$0xff] %v6197_v47  ;;  %v732_v43 = vmul.f32 %v4387_v36, %v495_v7  ;;  %v733_v5 = vmul.f32 %v4389_v38, %v495_v7 }
 0x28a   : > { %v1766_v51 = vadd.f32 %v1638_v50, %v1248_v9  ;;  %v1767_v25 = vadd.f32 %v1639_v23, %v1249_v63  ;;  %2395 = vmatmul.f32.gmra.mxu0 %v6191_v62  ;;  %2604 = vmatmul.f32.gmra.mxu1 %v6193_v13  ;;  %7149 = vst [vmem:[#allocation142_spill] sm:$0xff] %v6205_v41  ;;  %v500_v9 = vpop.permute.xlu0 %499  ;;  %v1442_v41 = vpop.permute.xlu2 %1441 }
 0x28b   : > { %2771 = vmatmul.f32.gmra.mxu2 %v5726_v17  ;;  %2980 = vmatmul.f32.gmra.mxu3 %v5728_v37  ;;  %v1640_v17 = vmul.f32 %v4379_v32, %v1438_v24  ;;  %v1641_v37 = vmul.f32 %v4381_v33, %v1438_v24 }
 0x28c   : > { %v1900_v6 = vadd.f32 %v4405_v55, %v1766_v51  ;;  %v1901_v61 = vadd.f32 %v4407_v56, %v1767_v25  ;;  %v6211_v51 = vpop.f32.mrf.mxu0  ;;  %v6213_v25 = vpop.f32.mrf.mxu1 }
 0x28d   : > { %v920_v63 = vpop.permute.xlu1 %919  ;;  %7150 = vst [vmem:[#allocation143_spill] sm:$0xff] %v6213_v25 }
 0x28e   : > { %v1122_v14 = vmul.f32 %v4383_v34, %v920_v63  ;;  %v1123_v40 = vmul.f32 %v4385_v35, %v920_v63  ;;  %v2028_v29 = vmul.f32 0.2, %v1900_v6  ;;  %v2029_v42 = vmul.f32 0.2, %v1901_v61 }
 0x290   : > { %v1250_v10 = vadd.f32 %v1122_v14, %v732_v43  ;;  %v1251_v50 = vadd.f32 %v1123_v40, %v733_v5  ;;  %v6215_v7 = vmax.f32 %v1900_v6, %v2028_v29  ;;  %v6217_v23 = vmax.f32 %v1901_v61, %v2029_v42  ;;  %v6225_v6 = vpop.f32.mrf.mxu2  ;;  %v6227_v61 = vpop.f32.mrf.mxu3 }
 0x291   : > { %7151 = vst [vmem:[#allocation144_spill] sm:$0xff] %v6225_v6  ;;  %v734_v29 = vmul.f32 %v4387_v36, %v500_v9  ;;  %v735_v42 = vmul.f32 %v4389_v38, %v500_v9  ;;  %v1643_v9 = vmul.f32 %v4381_v33, %v1442_v41 }
 0x292   : > { %v1768_v47 = vadd.f32 %v1640_v17, %v1250_v10  ;;  %v1769_v63 = vadd.f32 %v1641_v37, %v1251_v50  ;;  %2398 = vmatmul.f32.gmra.mxu0 %v6215_v7  ;;  %2607 = vmatmul.f32.gmra.mxu1 %v6217_v23  ;;  %7152 = vst [vmem:[#allocation145_spill] sm:$0xff] %v6227_v61  ;;  %v2292_v50 = vld [vmem:[%s6918_s4] sm:$0x3] }
 0x293   : > { %2774 = vmatmul.f32.gmra.mxu2 %v5790_v19  ;;  %2983 = vmatmul.f32.gmra.mxu3 %v5792_v18 }
 0x294   : > { %v1902_v24 = vadd.f32 %v4405_v55, %v1768_v47  ;;  %v1903_v43 = vadd.f32 %v4407_v56, %v1769_v63  ;;  %v6231_v17 = vpop.f32.mrf.mxu0  ;;  %v6233_v19 = vpop.f32.mrf.mxu1  ;;  %v1642_v63 = vmul.f32 %v4379_v32, %v1442_v41 }
 0x295   : > { %7153 = vst [vmem:[#allocation146_spill] sm:$0xff] %v6231_v17  ;;  %v505_v17 = vpop.permute.xlu0 %504 }
 0x296   : > { %v924_v5 = vpop.permute.xlu1 %923  ;;  %v2030_v14 = vmul.f32 0.2, %v1902_v24  ;;  %v2031_v40 = vmul.f32 0.2, %v1903_v43  ;;  %7154 = vst [vmem:[#allocation147_spill] sm:$0xff] %v6233_v19 }
 0x297   : > { %v1124_v18 = vmul.f32 %v4383_v34, %v924_v5  ;;  %v1125_v47 = vmul.f32 %v4385_v35, %v924_v5 }
 0x298   : > { %v6237_v37 = vmax.f32 %v1902_v24, %v2030_v14  ;;  %v6239_v10 = vmax.f32 %v1903_v43, %v2031_v40  ;;  %v6248_v24 = vperm.slane %v2292_v50, 0  ;;  %v1446_v43 = vpop.permute.xlu2 %1445 }
 0x299   : > { %v1252_v61 = vadd.f32 %v1124_v18, %v734_v29  ;;  %v1253_v6 = vadd.f32 %v1125_v47, %v735_v42 }
 0x29a   : > { %7155 = vst [vmem:[#allocation148_spill] sm:$0xff] %v6239_v10  ;;  %2401 = vmatmul.f32.gmra.mxu0 %v6237_v37  ;;  %2610 = vmatmul.f32.gmra.mxu1 %v6239_v10 }
 0x29b   : > { %v1770_v19 = vadd.f32 %v1642_v63, %v1252_v61  ;;  %v1771_v25 = vadd.f32 %v1643_v9, %v1253_v6  ;;  %2777 = vmatmul.f32.gmra.mxu2 %v5818_v1  ;;  %2986 = vmatmul.f32.gmra.mxu3 %v5820_v3  ;;  %v736_v61 = vmul.f32 %v4387_v36, %v505_v17 }
 0x29c   : > { %v737_v6 = vmul.f32 %v4389_v38, %v505_v17 }
 0x29d   : > { %v2504_v5 = vpop.f32.mrf.mxu2  ;;  %v2713_v14 = vpop.f32.mrf.mxu3  ;;  %v1904_v41 = vadd.f32 %v4405_v55, %v1770_v19  ;;  %v1905_v40 = vadd.f32 %v4407_v56, %v1771_v25  ;;  %v1644_v19 = vmul.f32 %v4379_v32, %v1446_v43  ;;  %v1645_v25 = vmul.f32 %v4381_v33, %v1446_v43 }
 0x29e   : > { %v928_v29 = vpop.permute.xlu1 %927  ;;  %v2505_v42 = vadd.f32 %v2504_v5, %v6248_v24  ;;  %v2316_v32 = vadd.f32 %v5781_v4, %v6248_v24 }
 0x29f   : > { %v1126_v18 = vmul.f32 %v4383_v34, %v928_v29  ;;  %v1127_v47 = vmul.f32 %v4385_v35, %v928_v29  ;;  %v6259_v1 = vpop.f32.mrf.mxu0  ;;  %v6261_v3 = vpop.f32.mrf.mxu1  ;;  %v2032_v63 = vmul.f32 0.2, %v1904_v41  ;;  %v2033_v9 = vmul.f32 0.2, %v1905_v40 }
 0x2a0   : > { %v6265_v36 = vadd.f32 %v2713_v14, %v2505_v42  ;;  %v6273_v29 = vperm.slane %v2292_v50, 1 }
 0x2a1   : > { %v1254_v38 = vadd.f32 %v1126_v18, %v736_v61  ;;  %v1255_v17 = vadd.f32 %v1127_v47, %v737_v6  ;;  %v6267_v10 = vmax.f32 %v1904_v41, %v2032_v63  ;;  %v6269_v5 = vmax.f32 %v1905_v40, %v2033_v9 }
 0x2a3   : > { %v1772_v34 = vadd.f32 %v1644_v19, %v1254_v38  ;;  %v1773_v35 = vadd.f32 %v1645_v25, %v1255_v17  ;;  %2404 = vmatmul.f32.gmra.mxu0 %v6267_v10  ;;  %2613 = vmatmul.f32.gmra.mxu1 %v6269_v5  ;;  %v7156_v17 = vld [vmem:[#allocation106_spill] sm:$0xff] }
 0x2a4   : > { %2780 = vmatmul.f32.gmra.mxu2 %v5855_v21  ;;  %2989 = vmatmul.f32.gmra.mxu3 %v5859_v15  ;;  %v2525_v21 = vadd.f32 %v5788_v52, %v2316_v32 }
 0x2a5   : > { %v1906_v33 = vadd.f32 %v4405_v55, %v1772_v34  ;;  %v1907_v43 = vadd.f32 %v4407_v56, %v1773_v35  ;;  %v2319_v56 = vadd.f32 %v5824_v49, %v6248_v24 }
 0x2a6   : > { %v2733_v14 = vpop.f32.mrf.mxu2  ;;  %v2942_v41 = vpop.f32.mrf.mxu3  ;;  %v3134_v55 = vmul.f32 0.2, %v2525_v21 }
 0x2a7   : > { %v2734_v40 = vadd.f32 %v2733_v14, %v6273_v29  ;;  %v6282_v61 = vpop.f32.mrf.mxu0  ;;  %v6284_v6 = vpop.f32.mrf.mxu1  ;;  %v2034_v50 = vmul.f32 0.2, %v1906_v33  ;;  %v2035_v42 = vmul.f32 0.2, %v1907_v43  ;;  %v2528_v34 = vadd.f32 %v7156_v17, %v2319_v56  ;;  %v7159_v56 = vld [vmem:[#allocation109_spill] sm:$0xff] }
 0x2a8   : > { %v3262_v38 = vmax.f32 %v2525_v21, %v3134_v55  ;;  %v7158_v21 = vld [vmem:[#allocation108_spill] sm:$0xff] }
 0x2a9   : > { %v2943_v15 = vadd.f32 %v2942_v41, %v2734_v40  ;;  %v6287_v18 = vmax.f32 %v1906_v33, %v2034_v50  ;;  %v6289_v4 = vmax.f32 %v1907_v43, %v2035_v42  ;;  %v3136_v49 = vmul.f32 0.2, %v2528_v34 }
 0x2ab   : > { %2407 = vmatmul.f32.gmra.mxu0 %v6287_v18  ;;  %2616 = vmatmul.f32.gmra.mxu1 %v6289_v4  ;;  %v3135_v47 = vmul.f32 0.2, %v2943_v15  ;;  %v3264_v42 = vmax.f32 %v2528_v34, %v3136_v49 }
 0x2ac   : > { %2783 = vmatmul.f32.gmra.mxu2 %v5885_v53  ;;  %2992 = vmatmul.f32.gmra.mxu3 %v5891_v48  ;;  %v7157_v48 = vld [vmem:[#allocation107_spill] sm:$0xff] }
 0x2ad   : > { %v3263_v35 = vmax.f32 %v2943_v15, %v3135_v47  ;;  %v2322_v32 = vadd.f32 %v7157_v48, %v6248_v24  ;;  %v2325_v47 = vadd.f32 %v7159_v56, %v6248_v24 }
 0x2ae   : > { %v2736_v63 = vpop.f32.mrf.mxu2  ;;  %v2945_v52 = vpop.f32.mrf.mxu3 }
 0x2af   : > { %v2737_v9 = vadd.f32 %v2736_v63, %v6273_v29  ;;  %v6298_v19 = vpop.f32.mrf.mxu0  ;;  %v6300_v25 = vpop.f32.mrf.mxu1  ;;  %v2531_v15 = vadd.f32 %v7158_v21, %v2322_v32  ;;  %v7161_v32 = vld [vmem:[#allocation113_spill] sm:$0xff] }
 0x2b1   : > { %v2946_v53 = vadd.f32 %v2945_v52, %v2737_v9 }
 0x2b3   : > { %3438 = vmatmul.f32.vlgmr.msrb.gmra.mxu0 %v3262_v38  ;;  %3647 = vmatmul.f32.vlgmr.msrb.gmra.mxu1 %v3263_v35  ;;  %v3137_v33 = vmul.f32 0.2, %v2946_v53 }
 0x2b4   : > { %2786 = vmatmul.f32.gmra.mxu2 %v5921_v12  ;;  %2995 = vmatmul.f32.gmra.mxu3 %v5927_v44  ;;  %v3138_v44 = vmul.f32 0.2, %v2531_v15 }
 0x2b5   : > { %v3265_v55 = vmax.f32 %v2946_v53, %v3137_v33  ;;  %v7160_v53 = vld [vmem:[#allocation110_spill] sm:$0xff]  ;;  %v2328_v33 = vadd.f32 %v7161_v32, %v6248_v24 }
 0x2b6   : > { %v2739_v43 = vpop.f32.mrf.mxu2  ;;  %v2948_v14 = vpop.f32.mrf.mxu3  ;;  %v3266_v35 = vmax.f32 %v2531_v15, %v3138_v44  ;;  %v2534_v49 = vadd.f32 %v7160_v53, %v2325_v47  ;;  %v2331_v47 = vadd.f32 %v5987_v46, %v6248_v24 }
 0x2b7   : > { %v2740_v41 = vadd.f32 %v2739_v43, %v6273_v29  ;;  %v6308_v40 = vpop.f32.mrf.mxu0  ;;  %v6310_v50 = vpop.f32.mrf.mxu1 }
 0x2b9   : > { %v2949_v12 = vadd.f32 %v2948_v14, %v2740_v41 }
 0x2bb   : > { %3441 = vmatmul.f32.gmra.mxu0 %v3264_v42  ;;  %3650 = vmatmul.f32.gmra.mxu1 %v3265_v55  ;;  %v3139_v63 = vmul.f32 0.2, %v2949_v12 }
 0x2bc   : > { %2789 = vmatmul.f32.gmra.mxu2 %v5959_v22  ;;  %2998 = vmatmul.f32.gmra.mxu3 %v5963_v45  ;;  %v3140_v45 = vmul.f32 0.2, %v2534_v49 }
 0x2bd   : > { %v3267_v48 = vmax.f32 %v2949_v12, %v3139_v63  ;;  %v7162_v12 = vld [vmem:[#allocation114_spill] sm:$0xff] }
 0x2be   : > { %v2742_v52 = vpop.f32.mrf.mxu2  ;;  %v2951_v9 = vpop.f32.mrf.mxu3  ;;  %v3268_v55 = vmax.f32 %v2534_v49, %v3140_v45  ;;  %v2537_v44 = vadd.f32 %v7162_v12, %v2328_v33 }
 0x2bf   : > { %v2743_v38 = vadd.f32 %v2742_v52, %v6273_v29  ;;  %v6318_v17 = vpop.f32.mrf.mxu0  ;;  %v6320_v34 = vpop.f32.mrf.mxu1 }
 0x2c1   : > { %v2952_v22 = vadd.f32 %v2951_v9, %v2743_v38 }
 0x2c3   : > { %3444 = vmatmul.f32.gmra.mxu0 %v3266_v35  ;;  %3653 = vmatmul.f32.gmra.mxu1 %v3267_v48  ;;  %v3141_v43 = vmul.f32 0.2, %v2952_v22  ;;  %v7163_v48 = vld [vmem:[#allocation117_spill] sm:$0xff] }
 0x2c4   : > { %2792 = vmatmul.f32.gmra.mxu2 %v5989_v27  ;;  %3001 = vmatmul.f32.gmra.mxu3 %v5991_v11  ;;  %v3142_v11 = vmul.f32 0.2, %v2537_v44 }
 0x2c5   : > { %v3269_v56 = vmax.f32 %v2952_v22, %v3141_v43  ;;  %v2540_v22 = vadd.f32 %v7163_v48, %v2331_v47 }
 0x2c6   : > { %v2745_v14 = vpop.f32.mrf.mxu2  ;;  %v2954_v41 = vpop.f32.mrf.mxu3  ;;  %v3270_v49 = vmax.f32 %v2537_v44, %v3142_v11  ;;  %v7165_v44 = vld [vmem:[#allocation121_spill] sm:$0xff]  ;;  %v7166_v11 = vld [vmem:[#allocation124_spill] sm:$0xff] }
 0x2c7   : > { %v2746_v42 = vadd.f32 %v2745_v14, %v6273_v29  ;;  %v6328_v21 = vpop.f32.mrf.mxu0  ;;  %v6330_v15 = vpop.f32.mrf.mxu1  ;;  %v3144_v46 = vmul.f32 0.2, %v2540_v22  ;;  %v2337_v47 = vadd.f32 %v7166_v11, %v6248_v24 }
 0x2c9   : > { %v2955_v27 = vadd.f32 %v2954_v41, %v2746_v42  ;;  %v3272_v12 = vmax.f32 %v2540_v22, %v3144_v46 }
 0x2cb   : > { %3447 = vmatmul.f32.gmra.mxu0 %v3268_v55  ;;  %3656 = vmatmul.f32.gmra.mxu1 %v3269_v56  ;;  %v3143_v63 = vmul.f32 0.2, %v2955_v27 }
 0x2cc   : > { %2795 = vmatmul.f32.gmra.mxu2 %v6019_v57  ;;  %3004 = vmatmul.f32.gmra.mxu3 %v6021_v60  ;;  %v7164_v60 = vld [vmem:[#allocation120_spill] sm:$0xff] }
 0x2cd   : > { %v3271_v45 = vmax.f32 %v2955_v27, %v3143_v63  ;;  %v2334_v32 = vadd.f32 %v7164_v60, %v6248_v24  ;;  %v2340_v60 = vadd.f32 %v6087_v59, %v6248_v24 }
 0x2ce   : > { %v2748_v52 = vpop.f32.mrf.mxu2  ;;  %v2957_v9 = vpop.f32.mrf.mxu3 }
 0x2cf   : > { %v2749_v38 = vadd.f32 %v2748_v52, %v6273_v29  ;;  %v6338_v35 = vpop.f32.mrf.mxu0  ;;  %v6340_v53 = vpop.f32.mrf.mxu1  ;;  %v2543_v56 = vadd.f32 %v7165_v44, %v2334_v32 }
 0x2d1   : > { %v2958_v57 = vadd.f32 %v2957_v9, %v2749_v38 }
 0x2d3   : > { %3450 = vmatmul.f32.gmra.mxu0 %v3270_v49  ;;  %3659 = vmatmul.f32.gmra.mxu1 %v3271_v45  ;;  %v3145_v33 = vmul.f32 0.2, %v2958_v57  ;;  %v7167_v45 = vld [vmem:[#allocation125_spill] sm:$0xff] }
 0x2d4   : > { %2798 = vmatmul.f32.gmra.mxu2 %v6053_v0  ;;  %3007 = vmatmul.f32.gmra.mxu3 %v6055_v28  ;;  %v3146_v28 = vmul.f32 0.2, %v2543_v56 }
 0x2d5   : > { %v3273_v27 = vmax.f32 %v2958_v57, %v3145_v33  ;;  %v2546_v57 = vadd.f32 %v7167_v45, %v2337_v47 }
 0x2d6   : > { %v2751_v43 = vpop.f32.mrf.mxu2  ;;  %v2960_v14 = vpop.f32.mrf.mxu3  ;;  %v3274_v22 = vmax.f32 %v2543_v56, %v3146_v28  ;;  %v7168_v56 = vld [vmem:[#allocation128_spill] sm:$0xff] }
 0x2d7   : > { %v2752_v41 = vadd.f32 %v2751_v43, %v6273_v29  ;;  %v6348_v42 = vpop.f32.mrf.mxu0  ;;  %v6350_v55 = vpop.f32.mrf.mxu1 }
 0x2d9   : > { %v2961_v0 = vadd.f32 %v2960_v14, %v2752_v41 }
 0x2db   : > { %3453 = vmatmul.f32.gmra.mxu0 %v3272_v12  ;;  %3662 = vmatmul.f32.gmra.mxu1 %v3273_v27  ;;  %v3147_v63 = vmul.f32 0.2, %v2961_v0  ;;  %v2549_v27 = vadd.f32 %v7168_v56, %v2340_v60  ;;  %v7172_v56 = vld [vmem:[#allocation137_spill] sm:$0xff] }
 0x2dc   : > { %2801 = vmatmul.f32.gmra.mxu2 %v6083_v54  ;;  %3010 = vmatmul.f32.gmra.mxu3 %v6085_v58  ;;  %v3148_v58 = vmul.f32 0.2, %v2546_v57 }
 0x2dd   : > { %v3275_v46 = vmax.f32 %v2961_v0, %v3147_v63  ;;  %v3150_v59 = vmul.f32 0.2, %v2549_v27 }
 0x2de   : > { %v2754_v52 = vpop.f32.mrf.mxu2  ;;  %v2963_v9 = vpop.f32.mrf.mxu3  ;;  %v3276_v44 = vmax.f32 %v2546_v57, %v3148_v58 }
 0x2df   : > { %v2755_v38 = vadd.f32 %v2754_v52, %v6273_v29  ;;  %v6358_v49 = vpop.f32.mrf.mxu0  ;;  %v6360_v48 = vpop.f32.mrf.mxu1 }
 0x2e1   : > { %v2964_v54 = vadd.f32 %v2963_v9, %v2755_v38  ;;  %v3278_v38 = vmax.f32 %v2549_v27, %v3150_v59  ;;  %v2349_v59 = vadd.f32 %v6187_v20, %v6248_v24  ;;  %v2352_v20 = vadd.f32 %v6211_v51, %v6248_v24 }
 0x2e3   : > { %3456 = vmatmul.f32.gmra.mxu0 %v3274_v22  ;;  %3665 = vmatmul.f32.gmra.mxu1 %v3275_v46  ;;  %v3149_v32 = vmul.f32 0.2, %v2964_v54  ;;  %v7169_v22 = vld [vmem:[#allocation133_spill] sm:$0xff]  ;;  %v7171_v46 = vld [vmem:[#allocation136_spill] sm:$0xff] }
 0x2e4   : > { %2804 = vmatmul.f32.gmra.mxu2 %v6107_v31  ;;  %3013 = vmatmul.f32.gmra.mxu3 %v6109_v39  ;;  %v2343_v39 = vadd.f32 %v6131_v8, %v6248_v24 }
 0x2e5   : > { %v3277_v0 = vmax.f32 %v2964_v54, %v3149_v32  ;;  %v2346_v54 = vadd.f32 %v7171_v46, %v6248_v24 }
 0x2e6   : > { %v2757_v33 = vpop.f32.mrf.mxu2  ;;  %v2966_v43 = vpop.f32.mrf.mxu3  ;;  %v2552_v45 = vadd.f32 %v7169_v22, %v2343_v39 }
 0x2e7   : > { %v2758_v14 = vadd.f32 %v2757_v33, %v6273_v29  ;;  %v6368_v41 = vpop.f32.mrf.mxu0  ;;  %v6370_v12 = vpop.f32.mrf.mxu1  ;;  %v2555_v27 = vadd.f32 %v7172_v56, %v2346_v54 }
 0x2e8   : > { %v3152_v8 = vmul.f32 0.2, %v2552_v45 }
 0x2e9   : > { %v2967_v31 = vadd.f32 %v2966_v43, %v2758_v14 }
 0x2eb   : > { %3459 = vmatmul.f32.gmra.mxu0 %v3276_v44  ;;  %3668 = vmatmul.f32.gmra.mxu1 %v3277_v0  ;;  %v3151_v28 = vmul.f32 0.2, %v2967_v31  ;;  %v3280_v44 = vmax.f32 %v2552_v45, %v3152_v8  ;;  %v2558_v45 = vadd.f32 %v6189_v26, %v2349_v59 }
 0x2ec   : > { %2807 = vmatmul.f32.gmra.mxu2 %v6137_v2  ;;  %3016 = vmatmul.f32.gmra.mxu3 %v6139_v30  ;;  %v7170_v30 = vld [vmem:[#allocation138_spill] sm:$0xff] }
 0x2ed   : > { %v3279_v57 = vmax.f32 %v2967_v31, %v3151_v28  ;;  %v3154_v31 = vmul.f32 0.2, %v2555_v27 }
 0x2ee   : > { %v2760_v11 = vpop.f32.mrf.mxu2  ;;  %v2969_v47 = vpop.f32.mrf.mxu3 }
 0x2ef   : > { %v2761_v63 = vadd.f32 %v2760_v11, %v6273_v29  ;;  %v6378_v52 = vpop.f32.mrf.mxu0  ;;  %v6380_v9 = vpop.f32.mrf.mxu1  ;;  %v3282_v22 = vmax.f32 %v2555_v27, %v3154_v31 }
 0x2f1   : > { %v2970_v2 = vadd.f32 %v2969_v47, %v2761_v63 }
 0x2f3   : > { %3462 = vmatmul.f32.gmra.mxu0 %v3278_v38  ;;  %3671 = vmatmul.f32.gmra.mxu1 %v3279_v57  ;;  %v3153_v58 = vmul.f32 0.2, %v2970_v2 }
 0x2f4   : > { %2810 = vmatmul.f32.gmra.mxu2 %v6161_v16  ;;  %3019 = vmatmul.f32.gmra.mxu3 %v7170_v30 }
 0x2f5   : > { %v3281_v0 = vmax.f32 %v2970_v2, %v3153_v58 }
 0x2f6   : > { %v2763_v60 = vpop.f32.mrf.mxu2  ;;  %v2972_v32 = vpop.f32.mrf.mxu3 }
 0x2f7   : > { %v2764_v33 = vadd.f32 %v2763_v60, %v6273_v29  ;;  %v6388_v43 = vpop.f32.mrf.mxu0  ;;  %v6390_v14 = vpop.f32.mrf.mxu1  ;;  %v7173_v60 = vld [vmem:[#allocation143_spill] sm:$0xff] }
 0x2f9   : > { %v2973_v16 = vadd.f32 %v2972_v32, %v2764_v33  ;;  %v2561_v32 = vadd.f32 %v7173_v60, %v2352_v20 }
 0x2fb   : > { %3465 = vmatmul.f32.gmra.mxu0 %v3280_v44  ;;  %3674 = vmatmul.f32.gmra.mxu1 %v3281_v0  ;;  %v3155_v39 = vmul.f32 0.2, %v2973_v16  ;;  %v3158_v51 = vmul.f32 0.2, %v2561_v32  ;;  %v7175_v44 = vld [vmem:[#allocation146_spill] sm:$0xff] }
 0x2fc   : > { %2813 = vmatmul.f32.gmra.mxu2 %v6191_v62  ;;  %3022 = vmatmul.f32.gmra.mxu3 %v6193_v13  ;;  %v3156_v13 = vmul.f32 0.2, %v2558_v45  ;;  %v2355_v56 = vadd.f32 %v7175_v44, %v6248_v24 }
 0x2fd   : > { %v3283_v57 = vmax.f32 %v2973_v16, %v3155_v39 }
 0x2fe   : > { %v2766_v28 = vpop.f32.mrf.mxu2  ;;  %v2975_v11 = vpop.f32.mrf.mxu3  ;;  %v3284_v58 = vmax.f32 %v2558_v45, %v3156_v13 }
 0x2ff   : > { %v2767_v47 = vadd.f32 %v2766_v28, %v6273_v29  ;;  %v6398_v63 = vpop.f32.mrf.mxu0  ;;  %v6400_v38 = vpop.f32.mrf.mxu1  ;;  %v3286_v28 = vmax.f32 %v2561_v32, %v3158_v51 }
 0x301   : > { %v2976_v62 = vadd.f32 %v2975_v11, %v2767_v47  ;;  %v7176_v11 = vld [vmem:[#allocation147_spill] sm:$0xff] }
 0x302   : > { %v2564_v47 = vadd.f32 %v7176_v11, %v2355_v56 }
 0x303   : > { %3468 = vmatmul.f32.gmra.mxu0 %v3282_v22  ;;  %3677 = vmatmul.f32.gmra.mxu1 %v3283_v57  ;;  %v3157_v2 = vmul.f32 0.2, %v2976_v62  ;;  %v2358_v57 = vadd.f32 %v6259_v1, %v6248_v24 }
 0x304   : > { %2816 = vmatmul.f32.gmra.mxu2 %v6215_v7  ;;  %3025 = vmatmul.f32.gmra.mxu3 %v6217_v23  ;;  %v7174_v23 = vld [vmem:[#allocation148_spill] sm:$0xff]  ;;  %v3160_v45 = vmul.f32 0.2, %v2564_v47 }
 0x305   : > { %v3285_v33 = vmax.f32 %v2976_v62, %v3157_v2 }
 0x306   : > { %v2769_v30 = vpop.f32.mrf.mxu2  ;;  %v2978_v8 = vpop.f32.mrf.mxu3 }
 0x307   : > { %v2770_v46 = vadd.f32 %v2769_v30, %v6273_v29  ;;  %v6408_v54 = vpop.f32.mrf.mxu0  ;;  %v6410_v26 = vpop.f32.mrf.mxu1 }
 0x309   : > { %v2979_v7 = vadd.f32 %v2978_v8, %v2770_v46  ;;  %v3288_v46 = vmax.f32 %v2564_v47, %v3160_v45 }
 0x30b   : > { %3471 = vmatmul.f32.gmra.mxu0 %v3284_v58  ;;  %3680 = vmatmul.f32.gmra.mxu1 %v3285_v33  ;;  %v3159_v27 = vmul.f32 0.2, %v2979_v7  ;;  %v2567_v58 = vadd.f32 %v6261_v3, %v2358_v57 }
 0x30c   : > { %2819 = vmatmul.f32.gmra.mxu2 %v6237_v37  ;;  %3028 = vmatmul.f32.gmra.mxu3 %v7174_v23 }
 0x30d   : > { %v3287_v22 = vmax.f32 %v2979_v7, %v3159_v27  ;;  %v3162_v1 = vmul.f32 0.2, %v2567_v58 }
 0x30e   : > { %v2772_v0 = vpop.f32.mrf.mxu2  ;;  %v2981_v16 = vpop.f32.mrf.mxu3 }
 0x30f   : > { %v2773_v31 = vadd.f32 %v2772_v0, %v6273_v29  ;;  %v6418_v59 = vpop.f32.mrf.mxu0  ;;  %v6420_v39 = vpop.f32.mrf.mxu1  ;;  %v3290_v44 = vmax.f32 %v2567_v58, %v3162_v1  ;;  %v7178_v0 = vld [vmem:[#allocation3_spill] sm:$0xff] }
 0x311   : > { %v2982_v37 = vadd.f32 %v2981_v16, %v2773_v31  ;;  %v2364_v16 = vadd.f32 %v6298_v19, %v6248_v24 }
 0x313   : > { %3474 = vmatmul.f32.gmra.mxu0 %v3286_v28  ;;  %3683 = vmatmul.f32.gmra.mxu1 %v3287_v22  ;;  %v3161_v62 = vmul.f32 0.2, %v2982_v37  ;;  %v2573_v45 = vadd.f32 %v6300_v25, %v2364_v16  ;;  %v6460_v25 = vld [vmem:[%s6920_s6] ss:$0 sm:$0xff] }
 0x314   : > { %2822 = vmatmul.f32.gmra.mxu2 %v6267_v10  ;;  %3031 = vmatmul.f32.gmra.mxu3 %v6269_v5  ;;  %v2361_v5 = vadd.f32 %v6282_v61, %v6248_v24 }
 0x315   : > { %v3289_v60 = vmax.f32 %v2982_v37, %v3161_v62  ;;  %v3166_v19 = vmul.f32 0.2, %v2573_v45 }
 0x316   : > { %v2775_v13 = vpop.f32.mrf.mxu2  ;;  %v2984_v20 = vpop.f32.mrf.mxu3  ;;  %v2570_v56 = vadd.f32 %v6284_v6, %v2361_v5 }
 0x317   : > { %v2776_v2 = vadd.f32 %v2775_v13, %v6273_v29  ;;  %v6428_v30 = vpop.f32.mrf.mxu0  ;;  %v6430_v8 = vpop.f32.mrf.mxu1  ;;  %v7179_v13 = vld [vmem:[#allocation4_spill] sm:$0xff] }
 0x318   : > { %v3164_v61 = vmul.f32 0.2, %v2570_v56 }
 0x319   : > { %v2985_v10 = vadd.f32 %v2984_v20, %v2776_v2  ;;  %v7180_v20 = vld [vmem:[#allocation5_spill] sm:$0xff]  ;;  %v2367_v2 = vadd.f32 %v6308_v40, %v6248_v24 }
 0x31a   : > { %v3292_v37 = vmax.f32 %v2570_v56, %v3164_v61  ;;  %v7181_v56 = vld [vmem:[#allocation6_spill] sm:$0xff] }
 0x31b   : > { %3477 = vmatmul.f32.gmra.mxu0 %v3288_v46  ;;  %3686 = vmatmul.f32.gmra.mxu1 %v3289_v60  ;;  %v3163_v32 = vmul.f32 0.2, %v2985_v10 }
 0x31c   : > { %2825 = vmatmul.f32.gmra.mxu2 %v6287_v18  ;;  %3034 = vmatmul.f32.gmra.mxu3 %v6289_v4  ;;  %v7177_v4 = vld [vmem:[#allocation2_spill] sm:$0xff] }
 0x31d   : > { %v3291_v27 = vmax.f32 %v2985_v10, %v3163_v32  ;;  %v3294_v32 = vmax.f32 %v2573_v45, %v3166_v19  ;;  %v2373_v19 = vadd.f32 %v6328_v21, %v6248_v24  ;;  %v7185_v21 = vld [vmem:[#allocation10_spill] sm:$0xff] }
 0x31e   : > { %v2778_v33 = vpop.f32.mrf.mxu2  ;;  %v2987_v7 = vpop.f32.mrf.mxu3 }
 0x31f   : > { %v2779_v23 = vadd.f32 %v2778_v33, %v6273_v29  ;;  %v2576_v33 = vadd.f32 %v6310_v50, %v2367_v2 }
 0x320   : > { %v6438_v51 = vpop.f32.mrf.mxu0  ;;  %v6440_v3 = vpop.f32.mrf.mxu1 }
 0x321   : > { %v2988_v18 = vadd.f32 %v2987_v7, %v2779_v23  ;;  %v3168_v50 = vmul.f32 0.2, %v2576_v33 }
 0x323   : > { %3480 = vmatmul.f32.gmra.mxu0 %v3290_v44  ;;  %3689 = vmatmul.f32.gmra.mxu1 %v3291_v27  ;;  %v3165_v31 = vmul.f32 0.2, %v2988_v18  ;;  %v7182_v27 = vld [vmem:[#allocation7_spill] sm:$0xff] }
 0x324   : > { %2828 = vmatmul.f32.gmra.mxu2 %v7177_v4  ;;  %3037 = vmatmul.f32.gmra.mxu3 %v7178_v0 }
 0x325   : > { %v3293_v57 = vmax.f32 %v2988_v18, %v3165_v31  ;;  %v2370_v18 = vadd.f32 %v6318_v17, %v6248_v24  ;;  %v7183_v17 = vld [vmem:[#allocation8_spill] sm:$0xff] }
 0x327   : > { %v2781_v28 = vpop.f32.mrf.mxu2  ;;  %v2990_v11 = vpop.f32.mrf.mxu3 }
 0x328   : > { %v2782_v47 = vadd.f32 %v2781_v28, %v6273_v29  ;;  %v6448_v22 = vpop.f32.mrf.mxu0  ;;  %v6450_v6 = vpop.f32.mrf.mxu1 }
 0x32a   : > { %v2991_v62 = vadd.f32 %v2990_v11, %v2782_v47  ;;  %v3296_v11 = vmax.f32 %v2576_v33, %v3168_v50  ;;  %v2579_v47 = vadd.f32 %v6320_v34, %v2370_v18 }
 0x32b   : > { %3483 = vmatmul.f32.gmra.mxu0 %v3292_v37  ;;  %3692 = vmatmul.f32.gmra.mxu1 %v3293_v57 }
 0x32c   : > { %2831 = vmatmul.f32.gmra.mxu2 %v7179_v13  ;;  %3040 = vmatmul.f32.gmra.mxu3 %v7180_v20  ;;  %v3167_v46 = vmul.f32 0.2, %v2991_v62  ;;  %v7184_v13 = vld [vmem:[#allocation9_spill] sm:$0xff]  ;;  %v3170_v20 = vmul.f32 0.2, %v2579_v47 }
 0x32e   : > { %v3295_v7 = vmax.f32 %v2991_v62, %v3167_v46 }
 0x32f   : > { %v2784_v58 = vpop.f32.mrf.mxu2  ;;  %v2993_v60 = vpop.f32.mrf.mxu3 }
 0x330   : > { %v2785_v10 = vadd.f32 %v2784_v58, %v6273_v29  ;;  %v3439_v1 = vpop.f32.mrf.mxu0  ;;  %v3648_v5 = vpop.f32.mrf.mxu1 }
 0x331   : > { %v3649_v23 = vadd.f32 %v3648_v5, %v3439_v1  ;;  %v3298_v1 = vmax.f32 %v2579_v47, %v3170_v20  ;;  %v2582_v5 = vadd.f32 %v6330_v15, %v2373_v19 }
 0x332   : > { %v2994_v44 = vadd.f32 %v2993_v60, %v2785_v10 }
 0x333   : > { %v3844_v40 = vadd.f32 %v6460_v25, %v3649_v23  ;;  %3486 = vmatmul.f32.gmra.mxu0 %v3294_v32  ;;  %3695 = vmatmul.f32.gmra.mxu1 %v3295_v7 }
 0x334   : > { %2834 = vmatmul.f32.gmra.mxu2 %v7181_v56  ;;  %3043 = vmatmul.f32.gmra.mxu3 %v7182_v27  ;;  %v3169_v4 = vmul.f32 0.2, %v2994_v44  ;;  %v2376_v56 = vadd.f32 %v6338_v35, %v6248_v24  ;;  %v7187_v35 = vld [vmem:[#allocation12_spill] sm:$0xff] }
 0x335   : > { %3909 = vst.msk [vmem:[%s6469_s17] sm:$0xff] %vm3908_vm0, %v3844_v40  ;;  %v3172_v40 = vmul.f32 0.2, %v2582_v5 }
 0x336   : > { %v3297_v37 = vmax.f32 %v2994_v44, %v3169_v4  ;;  %v7186_v44 = vld [vmem:[#allocation11_spill] sm:$0xff] }
 0x337   : > { %v2787_v0 = vpop.f32.mrf.mxu2  ;;  %v2996_v61 = vpop.f32.mrf.mxu3 }
 0x338   : > { %v2788_v16 = vadd.f32 %v2787_v0, %v6273_v29  ;;  %v3442_v31 = vpop.f32.mrf.mxu0  ;;  %v3651_v28 = vpop.f32.mrf.mxu1 }
 0x339   : > { %v3652_v45 = vadd.f32 %v3651_v28, %v3442_v31 }
 0x33a   : > { %v2997_v57 = vadd.f32 %v2996_v61, %v2788_v16  ;;  %v3300_v61 = vmax.f32 %v2582_v5, %v3172_v40  ;;  %v2585_v16 = vadd.f32 %v6340_v53, %v2376_v56 }
 0x33b   : > { %v3845_v62 = vadd.f32 %v6460_v25, %v3652_v45  ;;  %3489 = vmatmul.f32.gmra.mxu0 %v3296_v11  ;;  %3698 = vmatmul.f32.gmra.mxu1 %v3297_v37  ;;  %v7188_v37 = vld [vmem:[#allocation13_spill] sm:$0xff] }
 0x33c   : > { %2837 = vmatmul.f32.gmra.mxu2 %v7183_v17  ;;  %3046 = vmatmul.f32.gmra.mxu3 %v7184_v13  ;;  %v3171_v2 = vmul.f32 0.2, %v2997_v57  ;;  %v3174_v45 = vmul.f32 0.2, %v2585_v16 }
 0x33d   : > { %3910 = vst.msk [vmem:[%s6469_s17 + $0x8] sm:$0xff] %vm3908_vm0, %v3845_v62 }
 0x33e   : > { %v3299_v32 = vmax.f32 %v2997_v57, %v3171_v2  ;;  %v2379_v57 = vadd.f32 %v6348_v42, %v6248_v24  ;;  %v3302_v2 = vmax.f32 %v2585_v16, %v3174_v45  ;;  %v7189_v42 = vld [vmem:[#allocation14_spill] sm:$0xff] }
 0x33f   : > { %v2790_v46 = vpop.f32.mrf.mxu2  ;;  %v2999_v34 = vpop.f32.mrf.mxu3 }
 0x340   : > { %v2791_v58 = vadd.f32 %v2790_v46, %v6273_v29  ;;  %v3445_v60 = vpop.f32.mrf.mxu0  ;;  %v3654_v10 = vpop.f32.mrf.mxu1  ;;  %v2588_v46 = vadd.f32 %v6350_v55, %v2379_v57 }
 0x341   : > { %v3655_v33 = vadd.f32 %v3654_v10, %v3445_v60 }
 0x342   : > { %v3000_v7 = vadd.f32 %v2999_v34, %v2791_v58  ;;  %v3176_v5 = vmul.f32 0.2, %v2588_v46 }
 0x343   : > { %v3846_v23 = vadd.f32 %v6460_v25, %v3655_v33  ;;  %3492 = vmatmul.f32.gmra.mxu0 %v3298_v1  ;;  %3701 = vmatmul.f32.gmra.mxu1 %v3299_v32  ;;  %v7190_v1 = vld [vmem:[#allocation15_spill] sm:$0xff]  ;;  %v2382_v32 = vadd.f32 %v6358_v49, %v6248_v24  ;;  %v7191_v49 = vld [vmem:[#allocation16_spill] sm:$0xff] }
 0x344   : > { %2840 = vmatmul.f32.gmra.mxu2 %v7185_v21  ;;  %3049 = vmatmul.f32.gmra.mxu3 %v7186_v44  ;;  %v3173_v27 = vmul.f32 0.2, %v3000_v7  ;;  %v3304_v40 = vmax.f32 %v2588_v46, %v3176_v5 }
 0x345   : > { %3911 = vst.msk [vmem:[%s6469_s17 + $0x10] sm:$0xff] %vm3908_vm0, %v3846_v23  ;;  %v2591_v56 = vadd.f32 %v6360_v48, %v2382_v32 }
 0x346   : > { %v3301_v31 = vmax.f32 %v3000_v7, %v3173_v27 }
 0x347   : > { %v2793_v50 = vpop.f32.mrf.mxu2  ;;  %v3002_v15 = vpop.f32.mrf.mxu3 }
 0x348   : > { %v2794_v18 = vadd.f32 %v2793_v50, %v6273_v29  ;;  %v3448_v4 = vpop.f32.mrf.mxu0  ;;  %v3657_v0 = vpop.f32.mrf.mxu1 }
 0x349   : > { %v3658_v28 = vadd.f32 %v3657_v0, %v3448_v4  ;;  %v7192_v4 = vld [vmem:[#allocation17_spill] sm:$0xff]  ;;  %v3178_v0 = vmul.f32 0.2, %v2591_v56 }
 0x34a   : > { %v3003_v11 = vadd.f32 %v3002_v15, %v2794_v18 }
 0x34b   : > { %v3847_v47 = vadd.f32 %v6460_v25, %v3658_v28  ;;  %3495 = vmatmul.f32.gmra.mxu0 %v3300_v61  ;;  %3704 = vmatmul.f32.gmra.mxu1 %v3301_v31  ;;  %v2385_v61 = vadd.f32 %v6368_v41, %v6248_v24  ;;  %v7193_v41 = vld [vmem:[#allocation18_spill] sm:$0xff] }
 0x34c   : > { %2843 = vmatmul.f32.gmra.mxu2 %v7187_v35  ;;  %3052 = vmatmul.f32.gmra.mxu3 %v7188_v37  ;;  %v3175_v62 = vmul.f32 0.2, %v3003_v11  ;;  %v3306_v35 = vmax.f32 %v2591_v56, %v3178_v0  ;;  %v7198_v0 = vld [vmem:[#allocation23_spill] sm:$0xff] }
 0x34d   : > { %3912 = vst.msk [vmem:[%s6469_s17 + $0x18] sm:$0xff] %vm3908_vm0, %v3847_v47  ;;  %v2594_v37 = vadd.f32 %v6370_v12, %v2385_v61 }
 0x34e   : > { %v3303_v34 = vmax.f32 %v3003_v11, %v3175_v62 }
 0x34f   : > { %v2796_v17 = vpop.f32.mrf.mxu2  ;;  %v3005_v53 = vpop.f32.mrf.mxu3 }
 0x350   : > { %v2797_v13 = vadd.f32 %v2796_v17, %v6273_v29  ;;  %v3451_v20 = vpop.f32.mrf.mxu0  ;;  %v3660_v19 = vpop.f32.mrf.mxu1 }
 0x351   : > { %v3661_v58 = vadd.f32 %v3660_v19, %v3451_v20  ;;  %v2388_v20 = vadd.f32 %v6378_v52, %v6248_v24  ;;  %v7195_v52 = vld [vmem:[#allocation20_spill] sm:$0xff] }
 0x352   : > { %v3006_v60 = vadd.f32 %v3005_v53, %v2797_v13  ;;  %v7194_v53 = vld [vmem:[#allocation19_spill] sm:$0xff]  ;;  %v3180_v13 = vmul.f32 0.2, %v2594_v37 }
 0x353   : > { %v3848_v10 = vadd.f32 %v6460_v25, %v3661_v58  ;;  %3498 = vmatmul.f32.gmra.mxu0 %v3302_v2  ;;  %3707 = vmatmul.f32.gmra.mxu1 %v3303_v34 }
 0x354   : > { %2846 = vmatmul.f32.gmra.mxu2 %v7189_v42  ;;  %3055 = vmatmul.f32.gmra.mxu3 %v7190_v1  ;;  %v3177_v33 = vmul.f32 0.2, %v3006_v60 }
 0x355   : > { %3913 = vst.msk [vmem:[%s6469_s17 + $0x20] sm:$0xff] %vm3908_vm0, %v3848_v10  ;;  %v2597_v10 = vadd.f32 %v6380_v9, %v2388_v20 }
 0x356   : > { %v3305_v27 = vmax.f32 %v3006_v60, %v3177_v33  ;;  %v3308_v60 = vmax.f32 %v2594_v37, %v3180_v13  ;;  %v7196_v33 = vld [vmem:[#allocation21_spill] sm:$0xff]  ;;  %v2397_v13 = vadd.f32 %v6408_v54, %v6248_v24  ;;  %v7201_v54 = vld [vmem:[#allocation26_spill] sm:$0xff] }
 0x357   : > { %v2799_v7 = vpop.f32.mrf.mxu2  ;;  %v3008_v55 = vpop.f32.mrf.mxu3 }
 0x358   : > { %v2800_v23 = vadd.f32 %v2799_v7, %v6273_v29  ;;  %v3454_v21 = vpop.f32.mrf.mxu0  ;;  %v3663_v44 = vpop.f32.mrf.mxu1  ;;  %v3182_v7 = vmul.f32 0.2, %v2597_v10 }
 0x359   : > { %v3664_v50 = vadd.f32 %v3663_v44, %v3454_v21 }
 0x35a   : > { %v3009_v15 = vadd.f32 %v3008_v55, %v2800_v23  ;;  %v2391_v55 = vadd.f32 %v6388_v43, %v6248_v24  ;;  %v7197_v43 = vld [vmem:[#allocation22_spill] sm:$0xff] }
 0x35b   : > { %v3849_v18 = vadd.f32 %v6460_v25, %v3664_v50  ;;  %3501 = vmatmul.f32.gmra.mxu0 %v3304_v40  ;;  %3710 = vmatmul.f32.gmra.mxu1 %v3305_v27  ;;  %v3310_v27 = vmax.f32 %v2597_v10, %v3182_v7 }
 0x35c   : > { %2849 = vmatmul.f32.gmra.mxu2 %v7191_v49  ;;  %3058 = vmatmul.f32.gmra.mxu3 %v7192_v4  ;;  %v3179_v16 = vmul.f32 0.2, %v3009_v15  ;;  %v2600_v50 = vadd.f32 %v6390_v14, %v2391_v55 }
 0x35d   : > { %3914 = vst.msk [vmem:[%s6469_s17 + $0x28] sm:$0xff] %vm3908_vm0, %v3849_v18 }
 0x35e   : > { %v3307_v45 = vmax.f32 %v3009_v15, %v3179_v16  ;;  %v3184_v61 = vmul.f32 0.2, %v2600_v50  ;;  %v2394_v16 = vadd.f32 %v6398_v63, %v6248_v24  ;;  %v7199_v63 = vld [vmem:[#allocation24_spill] sm:$0xff] }
 0x35f   : > { %v2802_v31 = vpop.f32.mrf.mxu2  ;;  %v3011_v48 = vpop.f32.mrf.mxu3 }
 0x360   : > { %v2803_v28 = vadd.f32 %v2802_v31, %v6273_v29  ;;  %v3457_v11 = vpop.f32.mrf.mxu0  ;;  %v3666_v47 = vpop.f32.mrf.mxu1  ;;  %v2603_v37 = vadd.f32 %v6400_v38, %v2394_v16 }
 0x361   : > { %v3667_v57 = vadd.f32 %v3666_v47, %v3457_v11 }
 0x362   : > { %v3012_v62 = vadd.f32 %v3011_v48, %v2803_v28 }
 0x363   : > { %v3850_v17 = vadd.f32 %v6460_v25, %v3667_v57  ;;  %3504 = vmatmul.f32.gmra.mxu0 %v3306_v35  ;;  %3713 = vmatmul.f32.gmra.mxu1 %v3307_v45  ;;  %v3312_v35 = vmax.f32 %v2600_v50, %v3184_v61 }
 0x364   : > { %2852 = vmatmul.f32.gmra.mxu2 %v7193_v41  ;;  %3061 = vmatmul.f32.gmra.mxu3 %v7194_v53  ;;  %v3181_v19 = vmul.f32 0.2, %v3012_v62  ;;  %v7200_v41 = vld [vmem:[#allocation25_spill] sm:$0xff]  ;;  %v3186_v53 = vmul.f32 0.2, %v2603_v37 }
 0x365   : > { %3915 = vst.msk [vmem:[%s6469_s17 + $0x30] sm:$0xff] %vm3908_vm0, %v3850_v17 }
 0x366   : > { %v3309_v42 = vmax.f32 %v3012_v62, %v3181_v19 }
 0x367   : > { %v2805_v2 = vpop.f32.mrf.mxu2  ;;  %v3014_v12 = vpop.f32.mrf.mxu3 }
 0x368   : > { %v2806_v46 = vadd.f32 %v2805_v2, %v6273_v29  ;;  %v3460_v34 = vpop.f32.mrf.mxu0  ;;  %v3669_v58 = vpop.f32.mrf.mxu1 }
 0x369   : > { %v3670_v1 = vadd.f32 %v3669_v58, %v3460_v34  ;;  %v3314_v34 = vmax.f32 %v2603_v37, %v3186_v53  ;;  %v2606_v58 = vadd.f32 %v6410_v26, %v2397_v13 }
 0x36a   : > { %v3015_v5 = vadd.f32 %v3014_v12, %v2806_v46 }
 0x36b   : > { %v3851_v32 = vadd.f32 %v6460_v25, %v3670_v1  ;;  %3507 = vmatmul.f32.gmra.mxu0 %v3308_v60  ;;  %3716 = vmatmul.f32.gmra.mxu1 %v3309_v42 }
 0x36c   : > { %2855 = vmatmul.f32.gmra.mxu2 %v7195_v52  ;;  %3064 = vmatmul.f32.gmra.mxu3 %v7196_v33  ;;  %v3183_v23 = vmul.f32 0.2, %v3015_v5  ;;  %v2400_v52 = vadd.f32 %v6418_v59, %v6248_v24  ;;  %v7203_v59 = vld [vmem:[#allocation28_spill] sm:$0xff] }
 0x36d   : > { %3916 = vst.msk [vmem:[%s6469_s17 + $0x38] sm:$0xff] %vm3908_vm0, %v3851_v32  ;;  %v3188_v32 = vmul.f32 0.2, %v2606_v58 }
 0x36e   : > { %v3311_v15 = vmax.f32 %v3015_v5, %v3183_v23  ;;  %v7202_v5 = vld [vmem:[#allocation27_spill] sm:$0xff] }
 0x36f   : > { %v2808_v21 = vpop.f32.mrf.mxu2  ;;  %v3017_v9 = vpop.f32.mrf.mxu3 }
 0x370   : > { %v2809_v44 = vadd.f32 %v2808_v21, %v6273_v29  ;;  %v3463_v40 = vpop.f32.mrf.mxu0  ;;  %v3672_v56 = vpop.f32.mrf.mxu1 }
 0x371   : > { %v3673_v18 = vadd.f32 %v3672_v56, %v3463_v40 }
 0x372   : > { %v3018_v49 = vadd.f32 %v3017_v9, %v2809_v44  ;;  %v3316_v9 = vmax.f32 %v2606_v58, %v3188_v32  ;;  %v2609_v44 = vadd.f32 %v6420_v39, %v2400_v52 }
 0x373   : > { %v3852_v4 = vadd.f32 %v6460_v25, %v3673_v18  ;;  %3510 = vmatmul.f32.gmra.mxu0 %v3310_v27  ;;  %3719 = vmatmul.f32.gmra.mxu1 %v3311_v15  ;;  %v7204_v15 = vld [vmem:[#allocation29_spill] sm:$0xff] }
 0x374   : > { %2858 = vmatmul.f32.gmra.mxu2 %v7197_v43  ;;  %3067 = vmatmul.f32.gmra.mxu3 %v7198_v0  ;;  %v3185_v31 = vmul.f32 0.2, %v3018_v49  ;;  %v3190_v18 = vmul.f32 0.2, %v2609_v44 }
 0x375   : > { %3917 = vst.msk [vmem:[%s6469_s17 + $0x40] sm:$0xff] %vm3908_vm0, %v3852_v4 }
 0x376   : > { %v3313_v45 = vmax.f32 %v3018_v49, %v3185_v31  ;;  %v2403_v49 = vadd.f32 %v6428_v30, %v6248_v24  ;;  %v3318_v31 = vmax.f32 %v2609_v44, %v3190_v18  ;;  %v7205_v30 = vld [vmem:[#allocation30_spill] sm:$0xff] }
 0x377   : > { %v2811_v48 = vpop.f32.mrf.mxu2  ;;  %v3020_v14 = vpop.f32.mrf.mxu3 }
 0x378   : > { %v2812_v28 = vadd.f32 %v2811_v48, %v6273_v29  ;;  %v3466_v11 = vpop.f32.mrf.mxu0  ;;  %v3675_v47 = vpop.f32.mrf.mxu1  ;;  %v2612_v48 = vadd.f32 %v6430_v8, %v2403_v49 }
 0x379   : > { %v3676_v57 = vadd.f32 %v3675_v47, %v3466_v11 }
 0x37a   : > { %v3021_v62 = vadd.f32 %v3020_v14, %v2812_v28  ;;  %v3192_v37 = vmul.f32 0.2, %v2612_v48 }
 0x37b   : > { %v3853_v17 = vadd.f32 %v6460_v25, %v3676_v57  ;;  %3513 = vmatmul.f32.gmra.mxu0 %v3312_v35  ;;  %3722 = vmatmul.f32.gmra.mxu1 %v3313_v45  ;;  %v7206_v35 = vld [vmem:[#allocation31_spill] sm:$0xff]  ;;  %v2406_v45 = vadd.f32 %v6438_v51, %v6248_v24  ;;  %v7207_v51 = vld [vmem:[#allocation32_spill] sm:$0xff] }
 0x37c   : > { %2861 = vmatmul.f32.gmra.mxu2 %v7199_v63  ;;  %3070 = vmatmul.f32.gmra.mxu3 %v7200_v41  ;;  %v3187_v20 = vmul.f32 0.2, %v3021_v62  ;;  %v3320_v53 = vmax.f32 %v2612_v48, %v3192_v37  ;;  %v7216_v37 = vld [vmem:[#allocation51_spill] sm:$0xff] }
 0x37d   : > { %3918 = vst.msk [vmem:[%s6469_s17 + $0x48] sm:$0xff] %vm3908_vm0, %v3853_v17  ;;  %v2615_v13 = vadd.f32 %v6440_v3, %v2406_v45 }
 0x37e   : > { %v3315_v60 = vmax.f32 %v3021_v62, %v3187_v20 }
 0x37f   : > { %v2814_v19 = vpop.f32.mrf.mxu2  ;;  %v3023_v38 = vpop.f32.mrf.mxu3 }
 0x380   : > { %v2815_v2 = vadd.f32 %v2814_v19, %v6273_v29  ;;  %v3469_v12 = vpop.f32.mrf.mxu0  ;;  %v3678_v46 = vpop.f32.mrf.mxu1 }
 0x381   : > { %v3679_v10 = vadd.f32 %v3678_v46, %v3469_v12  ;;  %v7208_v12 = vld [vmem:[#allocation33_spill] sm:$0xff]  ;;  %v3194_v46 = vmul.f32 0.2, %v2615_v13 }
 0x382   : > { %v3024_v42 = vadd.f32 %v3023_v38, %v2815_v2 }
 0x383   : > { %v3854_v1 = vadd.f32 %v6460_v25, %v3679_v10  ;;  %3516 = vmatmul.f32.gmra.mxu0 %v3314_v34  ;;  %3725 = vmatmul.f32.gmra.mxu1 %v3315_v60  ;;  %v2409_v34 = vadd.f32 %v6448_v22, %v6248_v24  ;;  %v7209_v22 = vld [vmem:[#allocation34_spill] sm:$0xff] }
 0x384   : > { %2864 = vmatmul.f32.gmra.mxu2 %v7201_v54  ;;  %3073 = vmatmul.f32.gmra.mxu3 %v7202_v5  ;;  %v3189_v33 = vmul.f32 0.2, %v3024_v42  ;;  %v3322_v54 = vmax.f32 %v2615_v13, %v3194_v46  ;;  %v7219_v13 = vld [vmem:[#allocation53_spill] sm:$0xff] }
 0x385   : > { %3919 = vst.msk [vmem:[%s6469_s17 + $0x50] sm:$0xff] %vm3908_vm0, %v3854_v1  ;;  %v2618_v5 = vadd.f32 %v6450_v6, %v2409_v34 }
 0x386   : > { %v3317_v40 = vmax.f32 %v3024_v42, %v3189_v33 }
 0x387   : > { %v2817_v7 = vpop.f32.mrf.mxu2  ;;  %v3026_v26 = vpop.f32.mrf.mxu3 }
 0x388   : > { %v2818_v55 = vadd.f32 %v2817_v7, %v6273_v29  ;;  %v3472_v23 = vpop.f32.mrf.mxu0  ;;  %v3681_v21 = vpop.f32.mrf.mxu1 }
 0x389   : > { %v3682_v56 = vadd.f32 %v3681_v21, %v3472_v23  ;;  %v3196_v21 = vmul.f32 0.2, %v2618_v5 }
 0x38a   : > { %v3027_v27 = vadd.f32 %v3026_v26, %v2818_v55  ;;  %v7210_v26 = vld [vmem:[#allocation35_spill] sm:$0xff]  ;;  %v7211_v55 = vld [vmem:[#allocation46_spill] sm:$0xff] }
 0x38b   : > { %v3855_v50 = vadd.f32 %v6460_v25, %v3682_v56  ;;  %3519 = vmatmul.f32.gmra.mxu0 %v3316_v9  ;;  %3728 = vmatmul.f32.gmra.mxu1 %v3317_v40  ;;  %v2412_v23 = vadd.f32 %v7211_v55, %v6248_v24 }
 0x38c   : > { %2867 = vmatmul.f32.gmra.mxu2 %v7203_v59  ;;  %3076 = vmatmul.f32.gmra.mxu3 %v7204_v15  ;;  %v3191_v4 = vmul.f32 0.2, %v3027_v27  ;;  %v3324_v15 = vmax.f32 %v2618_v5, %v3196_v21  ;;  %v7222_v5 = vld [vmem:[#allocation43_spill] sm:$0xff] }
 0x38d   : > { %3920 = vst.msk [vmem:[%s6469_s17 + $0x58] sm:$0xff] %vm3908_vm0, %v3855_v50  ;;  %v7212_v50 = vld [vmem:[#allocation47_spill] sm:$0xff] }
 0x38e   : > { %v3319_v14 = vmax.f32 %v3027_v27, %v3191_v4  ;;  %v2621_v59 = vadd.f32 %v7212_v50, %v2412_v23 }
 0x38f   : > { %v2820_v43 = vpop.f32.mrf.mxu2  ;;  %v3029_v39 = vpop.f32.mrf.mxu3 }
 0x390   : > { %v2821_v0 = vadd.f32 %v2820_v43, %v6273_v29  ;;  %v3475_v61 = vpop.f32.mrf.mxu0  ;;  %v3684_v16 = vpop.f32.mrf.mxu1 }
 0x391   : > { %v3685_v28 = vadd.f32 %v3684_v16, %v3475_v61  ;;  %v3198_v61 = vmul.f32 0.2, %v2621_v59  ;;  %v7215_v16 = vld [vmem:[#allocation50_spill] sm:$0xff] }
 0x392   : > { %v3030_v11 = vadd.f32 %v3029_v39, %v2821_v0  ;;  %v7213_v39 = vld [vmem:[#allocation36_spill] sm:$0xff]  ;;  %v7214_v0 = vld [vmem:[#allocation37_spill] sm:$0xff] }
 0x393   : > { %v3856_v47 = vadd.f32 %v6460_v25, %v3685_v28  ;;  %3522 = vmatmul.f32.gmra.mxu0 %v3318_v31  ;;  %3731 = vmatmul.f32.gmra.mxu1 %v3319_v14  ;;  %v2415_v31 = vadd.f32 %v7215_v16, %v6248_v24 }
 0x394   : > { %2870 = vmatmul.f32.gmra.mxu2 %v7205_v30  ;;  %3079 = vmatmul.f32.gmra.mxu3 %v7206_v35  ;;  %v3193_v57 = vmul.f32 0.2, %v3030_v11  ;;  %v3326_v35 = vmax.f32 %v2621_v59, %v3198_v61  ;;  %v7225_v59 = vld [vmem:[#allocation44_spill] sm:$0xff] }
 0x395   : > { %3921 = vst.msk [vmem:[%s6469_s17 + $0x60] sm:$0xff] %vm3908_vm0, %v3856_v47  ;;  %v2624_v45 = vadd.f32 %v7216_v37, %v2415_v31  ;;  %v7229_v37 = vld [vmem:[#allocation52_spill] sm:$0xff] }
 0x396   : > { %v3321_v20 = vmax.f32 %v3030_v11, %v3193_v57 }
 0x397   : > { %v2823_v62 = vpop.f32.mrf.mxu2  ;;  %v3032_v8 = vpop.f32.mrf.mxu3 }
 0x398   : > { %v2824_v17 = vadd.f32 %v2823_v62, %v6273_v29  ;;  %v3478_v63 = vpop.f32.mrf.mxu0  ;;  %v3687_v41 = vpop.f32.mrf.mxu1 }
 0x399   : > { %v3688_v19 = vadd.f32 %v3687_v41, %v3478_v63  ;;  %v7217_v63 = vld [vmem:[#allocation38_spill] sm:$0xff]  ;;  %v7218_v41 = vld [vmem:[#allocation39_spill] sm:$0xff] }
 0x39a   : > { %v3033_v38 = vadd.f32 %v3032_v8, %v2824_v17 }
 0x39b   : > { %v3857_v2 = vadd.f32 %v6460_v25, %v3688_v19  ;;  %3525 = vmatmul.f32.gmra.mxu0 %v3320_v53  ;;  %3734 = vmatmul.f32.gmra.mxu1 %v3321_v20  ;;  %v3200_v53 = vmul.f32 0.2, %v2624_v45  ;;  %v2418_v20 = vadd.f32 %v7219_v13, %v6248_v24 }
 0x39c   : > { %2873 = vmatmul.f32.gmra.mxu2 %v7207_v51  ;;  %3082 = vmatmul.f32.gmra.mxu3 %v7208_v12  ;;  %v3195_v58 = vmul.f32 0.2, %v3033_v38 }
 0x39d   : > { %3922 = vst.msk [vmem:[%s6469_s17 + $0x68] sm:$0xff] %vm3908_vm0, %v3857_v2  ;;  %v3328_v34 = vmax.f32 %v2624_v45, %v3200_v53  ;;  %v7230_v45 = vld [vmem:[#allocation54_spill] sm:$0xff] }
 0x39e   : > { %v3323_v32 = vmax.f32 %v3033_v38, %v3195_v58  ;;  %v7220_v58 = vld [vmem:[#allocation55_spill] sm:$0xff] }
 0x39f   : > { %v2826_v60 = vpop.f32.mrf.mxu2  ;;  %v3035_v3 = vpop.f32.mrf.mxu3 }
 0x3a0   : > { %v2827_v10 = vadd.f32 %v2826_v60, %v6273_v29  ;;  %v3481_v42 = vpop.f32.mrf.mxu0  ;;  %v3690_v1 = vpop.f32.mrf.mxu1  ;;  %v2627_v60 = vadd.f32 %v7220_v58, %v2418_v20  ;;  %v7233_v58 = vld [vmem:[#allocation56_spill] sm:$0xff] }
 0x3a1   : > { %v3691_v52 = vadd.f32 %v3690_v1, %v3481_v42 }
 0x3a2   : > { %v3036_v33 = vadd.f32 %v3035_v3, %v2827_v10 }
 0x3a3   : > { %v3858_v7 = vadd.f32 %v6460_v25, %v3691_v52  ;;  %3528 = vmatmul.f32.gmra.mxu0 %v3322_v54  ;;  %3737 = vmatmul.f32.gmra.mxu1 %v3323_v32  ;;  %v7221_v54 = vld [vmem:[#allocation42_spill] sm:$0xff]  ;;  %v3202_v32 = vmul.f32 0.2, %v2627_v60 }
 0x3a4   : > { %2876 = vmatmul.f32.gmra.mxu2 %v7209_v22  ;;  %3085 = vmatmul.f32.gmra.mxu3 %v7210_v26  ;;  %v3197_v9 = vmul.f32 0.2, %v3036_v33  ;;  %v7223_v52 = vld [vmem:[#allocation58_spill] sm:$0xff] }
 0x3a5   : > { %3923 = vst.msk [vmem:[%s6469_s17 + $0x70] sm:$0xff] %vm3908_vm0, %v3858_v7 }
 0x3a6   : > { %v3325_v18 = vmax.f32 %v3036_v33, %v3197_v9  ;;  %v2421_v33 = vadd.f32 %v7223_v52, %v6248_v24  ;;  %v3330_v9 = vmax.f32 %v2627_v60, %v3202_v32  ;;  %v7234_v60 = vld [vmem:[#allocation57_spill] sm:$0xff] }
 0x3a7   : > { %v2829_v44 = vpop.f32.mrf.mxu2  ;;  %v3038_v6 = vpop.f32.mrf.mxu3 }
 0x3a8   : > { %v2830_v40 = vadd.f32 %v2829_v44, %v6273_v29  ;;  %v3484_v56 = vpop.f32.mrf.mxu0  ;;  %v3693_v27 = vpop.f32.mrf.mxu1  ;;  %v7224_v44 = vld [vmem:[#allocation59_spill] sm:$0xff] }
 0x3a9   : > { %v3694_v49 = vadd.f32 %v3693_v27, %v3484_v56 }
 0x3aa   : > { %v3039_v4 = vadd.f32 %v3038_v6, %v2830_v40  ;;  %v2630_v6 = vadd.f32 %v7224_v44, %v2421_v33  ;;  %v7237_v44 = vld [vmem:[#allocation60_spill] sm:$0xff] }
 0x3ab   : > { %v3859_v43 = vadd.f32 %v6460_v25, %v3694_v49  ;;  %3531 = vmatmul.f32.gmra.mxu0 %v3324_v15  ;;  %3740 = vmatmul.f32.gmra.mxu1 %v3325_v18  ;;  %v7226_v15 = vld [vmem:[#allocation45_spill] sm:$0xff]  ;;  %v7227_v49 = vld [vmem:[#allocation62_spill] sm:$0xff] }
 0x3ac   : > { %2879 = vmatmul.f32.gmra.mxu2 %v7213_v39  ;;  %3088 = vmatmul.f32.gmra.mxu3 %v7214_v0  ;;  %v3199_v48 = vmul.f32 0.2, %v3039_v4  ;;  %v3204_v18 = vmul.f32 0.2, %v2630_v6 }
 0x3ad   : > { %3924 = vst.msk [vmem:[%s6469_s17 + $0x78] sm:$0xff] %vm3908_vm0, %v3859_v43 }
 0x3ae   : > { %v3327_v57 = vmax.f32 %v3039_v4, %v3199_v48  ;;  %v2424_v4 = vadd.f32 %v7227_v49, %v6248_v24  ;;  %v3332_v48 = vmax.f32 %v2630_v6, %v3204_v18  ;;  %v7238_v6 = vld [vmem:[#allocation61_spill] sm:$0xff] }
 0x3af   : > { %v2832_v14 = vpop.f32.mrf.mxu2  ;;  %v3041_v28 = vpop.f32.mrf.mxu3 }
 0x3b0   : > { %v2833_v11 = vadd.f32 %v2832_v14, %v6273_v29  ;;  %v3487_v47 = vpop.f32.mrf.mxu0  ;;  %v3696_v30 = vpop.f32.mrf.mxu1  ;;  %v7228_v14 = vld [vmem:[#allocation63_spill] sm:$0xff] }
 0x3b1   : > { %v3697_v62 = vadd.f32 %v3696_v30, %v3487_v47 }
 0x3b2   : > { %v3042_v8 = vadd.f32 %v3041_v28, %v2833_v11  ;;  %v2633_v28 = vadd.f32 %v7228_v14, %v2424_v4  ;;  %v7241_v14 = vld [vmem:[#allocation64_spill] sm:$0xff] }
 0x3b3   : > { %v3860_v17 = vadd.f32 %v6460_v25, %v3697_v62  ;;  %3534 = vmatmul.f32.gmra.mxu0 %v3326_v35  ;;  %3743 = vmatmul.f32.gmra.mxu1 %v3327_v57  ;;  %v7231_v62 = vld [vmem:[#allocation66_spill] sm:$0xff] }
 0x3b4   : > { %2882 = vmatmul.f32.gmra.mxu2 %v7217_v63  ;;  %3091 = vmatmul.f32.gmra.mxu3 %v7218_v41  ;;  %v3201_v19 = vmul.f32 0.2, %v3042_v8  ;;  %v3206_v57 = vmul.f32 0.2, %v2633_v28 }
 0x3b5   : > { %3925 = vst.msk [vmem:[%s6469_s17 + $0x80] sm:$0xff] %vm3908_vm0, %v3860_v17 }
 0x3b6   : > { %v3329_v3 = vmax.f32 %v3042_v8, %v3201_v19  ;;  %v2427_v8 = vadd.f32 %v7231_v62, %v6248_v24  ;;  %v3334_v19 = vmax.f32 %v2633_v28, %v3206_v57  ;;  %v7242_v28 = vld [vmem:[#allocation65_spill] sm:$0xff] }
 0x3b7   : > { %v2835_v38 = vpop.f32.mrf.mxu2  ;;  %v3044_v2 = vpop.f32.mrf.mxu3 }
 0x3b8   : > { %v2836_v51 = vadd.f32 %v2835_v38, %v6273_v29  ;;  %v3490_v12 = vpop.f32.mrf.mxu0  ;;  %v3699_v46 = vpop.f32.mrf.mxu1  ;;  %v7232_v38 = vld [vmem:[#allocation67_spill] sm:$0xff] }
 0x3b9   : > { %v3700_v10 = vadd.f32 %v3699_v46, %v3490_v12 }
 0x3ba   : > { %v3045_v42 = vadd.f32 %v3044_v2, %v2836_v51  ;;  %v2636_v2 = vadd.f32 %v7232_v38, %v2427_v8  ;;  %v7245_v38 = vld [vmem:[#allocation69_spill] sm:$0xff] }
 0x3bb   : > { %v3861_v1 = vadd.f32 %v6460_v25, %v3700_v10  ;;  %3537 = vmatmul.f32.gmra.mxu0 %v3328_v34  ;;  %3746 = vmatmul.f32.gmra.mxu1 %v3329_v3  ;;  %v7235_v10 = vld [vmem:[#allocation68_spill] sm:$0xff] }
 0x3bc   : > { %2885 = vmatmul.f32.gmra.mxu2 %v7221_v54  ;;  %3094 = vmatmul.f32.gmra.mxu3 %v7222_v5  ;;  %v3203_v7 = vmul.f32 0.2, %v3045_v42  ;;  %v3208_v3 = vmul.f32 0.2, %v2636_v2 }
 0x3bd   : > { %3926 = vst.msk [vmem:[%s6469_s17 + $0x88] sm:$0xff] %vm3908_vm0, %v3861_v1 }
 0x3be   : > { %v3331_v40 = vmax.f32 %v3045_v42, %v3203_v7  ;;  %v2430_v42 = vadd.f32 %v7235_v10, %v6248_v24  ;;  %v3336_v7 = vmax.f32 %v2636_v2, %v3208_v3  ;;  %v7246_v2 = vld [vmem:[#allocation71_spill] sm:$0xff] }
 0x3bf   : > { %v2838_v22 = vpop.f32.mrf.mxu2  ;;  %v3047_v26 = vpop.f32.mrf.mxu3 }
 0x3c0   : > { %v2839_v55 = vadd.f32 %v2838_v22, %v6273_v29  ;;  %v3493_v23 = vpop.f32.mrf.mxu0  ;;  %v3702_v21 = vpop.f32.mrf.mxu1  ;;  %v7236_v22 = vld [vmem:[#allocation70_spill] sm:$0xff] }
 0x3c1   : > { %v3703_v56 = vadd.f32 %v3702_v21, %v3493_v23 }
 0x3c2   : > { %v3048_v27 = vadd.f32 %v3047_v26, %v2839_v55  ;;  %v2639_v26 = vadd.f32 %v7236_v22, %v2430_v42  ;;  %v7249_v22 = vld [vmem:[#allocation74_spill] sm:$0xff] }
 0x3c3   : > { %v3862_v50 = vadd.f32 %v6460_v25, %v3703_v56  ;;  %3540 = vmatmul.f32.gmra.mxu0 %v3330_v9  ;;  %3749 = vmatmul.f32.gmra.mxu1 %v3331_v40  ;;  %v7239_v56 = vld [vmem:[#allocation72_spill] sm:$0xff] }
 0x3c4   : > { %2888 = vmatmul.f32.gmra.mxu2 %v7225_v59  ;;  %3097 = vmatmul.f32.gmra.mxu3 %v7226_v15  ;;  %v3205_v43 = vmul.f32 0.2, %v3048_v27  ;;  %v3210_v40 = vmul.f32 0.2, %v2639_v26 }
 0x3c5   : > { %3927 = vst.msk [vmem:[%s6469_s17 + $0x90] sm:$0xff] %vm3908_vm0, %v3862_v50 }
 0x3c6   : > { %v3333_v11 = vmax.f32 %v3048_v27, %v3205_v43  ;;  %v2433_v27 = vadd.f32 %v7239_v56, %v6248_v24  ;;  %v3338_v43 = vmax.f32 %v2639_v26, %v3210_v40  ;;  %v7250_v26 = vld [vmem:[#allocation75_spill] sm:$0xff] }
 0x3c7   : > { %v2841_v39 = vpop.f32.mrf.mxu2  ;;  %v3050_v0 = vpop.f32.mrf.mxu3 }
 0x3c8   : > { %v2842_v61 = vadd.f32 %v2841_v39, %v6273_v29  ;;  %v3496_v16 = vpop.f32.mrf.mxu0  ;;  %v3705_v31 = vpop.f32.mrf.mxu1  ;;  %v7240_v39 = vld [vmem:[#allocation73_spill] sm:$0xff] }
 0x3c9   : > { %v3706_v47 = vadd.f32 %v3705_v31, %v3496_v16 }
 0x3ca   : > { %v3051_v30 = vadd.f32 %v3050_v0, %v2842_v61  ;;  %v2642_v0 = vadd.f32 %v7240_v39, %v2433_v27  ;;  %v7253_v39 = vld [vmem:[#allocation78_spill] sm:$0xff] }
 0x3cb   : > { %v3863_v35 = vadd.f32 %v6460_v25, %v3706_v47  ;;  %3543 = vmatmul.f32.gmra.mxu0 %v3332_v48  ;;  %3752 = vmatmul.f32.gmra.mxu1 %v3333_v11  ;;  %v7243_v47 = vld [vmem:[#allocation76_spill] sm:$0xff] }
 0x3cc   : > { %2891 = vmatmul.f32.gmra.mxu2 %v7229_v37  ;;  %3100 = vmatmul.f32.gmra.mxu3 %v7230_v45  ;;  %v3207_v17 = vmul.f32 0.2, %v3051_v30  ;;  %v3212_v11 = vmul.f32 0.2, %v2642_v0 }
 0x3cd   : > { %3928 = vst.msk [vmem:[%s6469_s17 + $0x98] sm:$0xff] %vm3908_vm0, %v3863_v35 }
 0x3ce   : > { %v3335_v51 = vmax.f32 %v3051_v30, %v3207_v17  ;;  %v2436_v30 = vadd.f32 %v7243_v47, %v6248_v24  ;;  %v3340_v17 = vmax.f32 %v2642_v0, %v3212_v11  ;;  %v7254_v0 = vld [vmem:[#allocation79_spill] sm:$0xff] }
 0x3cf   : > { %v2844_v63 = vpop.f32.mrf.mxu2  ;;  %v3053_v41 = vpop.f32.mrf.mxu3 }
 0x3d0   : > { %v2845_v53 = vadd.f32 %v2844_v63, %v6273_v29  ;;  %v3499_v13 = vpop.f32.mrf.mxu0  ;;  %v3708_v20 = vpop.f32.mrf.mxu1  ;;  %v7244_v63 = vld [vmem:[#allocation77_spill] sm:$0xff] }
 0x3d1   : > { %v3709_v12 = vadd.f32 %v3708_v20, %v3499_v13 }
 0x3d2   : > { %v3054_v46 = vadd.f32 %v3053_v41, %v2845_v53  ;;  %v2645_v41 = vadd.f32 %v7244_v63, %v2436_v30  ;;  %v7257_v63 = vld [vmem:[#allocation84_spill] sm:$0xff] }
 0x3d3   : > { %v3864_v34 = vadd.f32 %v6460_v25, %v3709_v12  ;;  %3546 = vmatmul.f32.gmra.mxu0 %v3334_v19  ;;  %3755 = vmatmul.f32.gmra.mxu1 %v3335_v51  ;;  %v7247_v12 = vld [vmem:[#allocation80_spill] sm:$0xff] }
 0x3d4   : > { %2894 = vmatmul.f32.gmra.mxu2 %v7233_v58  ;;  %3103 = vmatmul.f32.gmra.mxu3 %v7234_v60  ;;  %v3209_v1 = vmul.f32 0.2, %v3054_v46  ;;  %v3214_v51 = vmul.f32 0.2, %v2645_v41 }
 0x3d5   : > { %3929 = vst.msk [vmem:[%s6469_s17 + $0xa0] sm:$0xff] %vm3908_vm0, %v3864_v34 }
 0x3d6   : > { %v3337_v55 = vmax.f32 %v3054_v46, %v3209_v1  ;;  %v2439_v46 = vadd.f32 %v7247_v12, %v6248_v24  ;;  %v3342_v1 = vmax.f32 %v2645_v41, %v3214_v51  ;;  %v7258_v41 = vld [vmem:[#allocation85_spill] sm:$0xff] }
 0x3d7   : > { %v2847_v54 = vpop.f32.mrf.mxu2  ;;  %v3056_v5 = vpop.f32.mrf.mxu3 }
 0x3d8   : > { %v2848_v32 = vadd.f32 %v2847_v54, %v6273_v29  ;;  %v3502_v52 = vpop.f32.mrf.mxu0  ;;  %v3711_v33 = vpop.f32.mrf.mxu1  ;;  %v7248_v54 = vld [vmem:[#allocation81_spill] sm:$0xff] }
 0x3d9   : > { %v3712_v23 = vadd.f32 %v3711_v33, %v3502_v52 }
 0x3da   : > { %v3057_v21 = vadd.f32 %v3056_v5, %v2848_v32  ;;  %v2648_v5 = vadd.f32 %v7248_v54, %v2439_v46  ;;  %v7261_v54 = vld [vmem:[#allocation90_spill] sm:$0xff] }
 0x3db   : > { %v3865_v9 = vadd.f32 %v6460_v25, %v3712_v23  ;;  %3549 = vmatmul.f32.gmra.mxu0 %v3336_v7  ;;  %3758 = vmatmul.f32.gmra.mxu1 %v3337_v55  ;;  %v7251_v23 = vld [vmem:[#allocation82_spill] sm:$0xff] }
 0x3dc   : > { %2897 = vmatmul.f32.gmra.mxu2 %v7237_v44  ;;  %3106 = vmatmul.f32.gmra.mxu3 %v7238_v6  ;;  %v3211_v50 = vmul.f32 0.2, %v3057_v21  ;;  %v3216_v55 = vmul.f32 0.2, %v2648_v5 }
 0x3dd   : > { %3930 = vst.msk [vmem:[%s6469_s17 + $0xa8] sm:$0xff] %vm3908_vm0, %v3865_v9 }
 0x3de   : > { %v3339_v61 = vmax.f32 %v3057_v21, %v3211_v50  ;;  %v2442_v21 = vadd.f32 %v7251_v23, %v6248_v24  ;;  %v3344_v50 = vmax.f32 %v2648_v5, %v3216_v55  ;;  %v7262_v5 = vld [vmem:[#allocation91_spill] sm:$0xff] }
 0x3df   : > { %v2850_v59 = vpop.f32.mrf.mxu2  ;;  %v3059_v15 = vpop.f32.mrf.mxu3 }
 0x3e0   : > { %v2851_v18 = vadd.f32 %v2850_v59, %v6273_v29  ;;  %v3505_v49 = vpop.f32.mrf.mxu0  ;;  %v3714_v4 = vpop.f32.mrf.mxu1  ;;  %v7252_v59 = vld [vmem:[#allocation83_spill] sm:$0xff] }
 0x3e1   : > { %v3715_v16 = vadd.f32 %v3714_v4, %v3505_v49 }
 0x3e2   : > { %v3060_v31 = vadd.f32 %v3059_v15, %v2851_v18  ;;  %v2651_v15 = vadd.f32 %v7252_v59, %v2442_v21  ;;  %v7265_v59 = vld [vmem:[#allocation94_spill] sm:$0xff] }
 0x3e3   : > { %v3866_v48 = vadd.f32 %v6460_v25, %v3715_v16  ;;  %3552 = vmatmul.f32.gmra.mxu0 %v3338_v43  ;;  %3761 = vmatmul.f32.gmra.mxu1 %v3339_v61  ;;  %v7255_v16 = vld [vmem:[#allocation86_spill] sm:$0xff] }
 0x3e4   : > { %2900 = vmatmul.f32.gmra.mxu2 %v7241_v14  ;;  %3109 = vmatmul.f32.gmra.mxu3 %v7242_v28  ;;  %v3213_v35 = vmul.f32 0.2, %v3060_v31  ;;  %v3218_v61 = vmul.f32 0.2, %v2651_v15 }
 0x3e5   : > { %3931 = vst.msk [vmem:[%s6469_s17 + $0xb0] sm:$0xff] %vm3908_vm0, %v3866_v48 }
 0x3e6   : > { %v3341_v53 = vmax.f32 %v3060_v31, %v3213_v35  ;;  %v2445_v31 = vadd.f32 %v7255_v16, %v6248_v24  ;;  %v3346_v35 = vmax.f32 %v2651_v15, %v3218_v61  ;;  %v7266_v15 = vld [vmem:[#allocation95_spill] sm:$0xff] }
 0x3e7   : > { %v2853_v37 = vpop.f32.mrf.mxu2  ;;  %v3062_v45 = vpop.f32.mrf.mxu3 }
 0x3e8   : > { %v2854_v57 = vadd.f32 %v2853_v37, %v6273_v29  ;;  %v3508_v62 = vpop.f32.mrf.mxu0  ;;  %v3717_v8 = vpop.f32.mrf.mxu1  ;;  %v7256_v37 = vld [vmem:[#allocation87_spill] sm:$0xff] }
 0x3e9   : > { %v3718_v13 = vadd.f32 %v3717_v8, %v3508_v62 }
 0x3ea   : > { %v3063_v20 = vadd.f32 %v3062_v45, %v2854_v57  ;;  %v2654_v45 = vadd.f32 %v7256_v37, %v2445_v31  ;;  %v7269_v37 = vld [vmem:[#allocation100_spill] sm:$0xff] }
 0x3eb   : > { %v3867_v19 = vadd.f32 %v6460_v25, %v3718_v13  ;;  %3555 = vmatmul.f32.gmra.mxu0 %v3340_v17  ;;  %3764 = vmatmul.f32.gmra.mxu1 %v3341_v53  ;;  %v7259_v13 = vld [vmem:[#allocation88_spill] sm:$0xff] }
 0x3ec   : > { %2903 = vmatmul.f32.gmra.mxu2 %v7245_v38  ;;  %3112 = vmatmul.f32.gmra.mxu3 %v7246_v2  ;;  %v3215_v34 = vmul.f32 0.2, %v3063_v20  ;;  %v3220_v53 = vmul.f32 0.2, %v2654_v45 }
 0x3ed   : > { %3932 = vst.msk [vmem:[%s6469_s17 + $0xb8] sm:$0xff] %vm3908_vm0, %v3867_v19 }
 0x3ee   : > { %v3343_v32 = vmax.f32 %v3063_v20, %v3215_v34  ;;  %v2448_v20 = vadd.f32 %v7259_v13, %v6248_v24  ;;  %v3348_v46 = vmax.f32 %v2654_v45, %v3220_v53  ;;  %v7260_v34 = vld [vmem:[#allocation89_spill] sm:$0xff] }
 0x3ef   : > { %v2856_v58 = vpop.f32.mrf.mxu2  ;;  %v3065_v60 = vpop.f32.mrf.mxu3  ;;  %v7270_v45 = vld [vmem:[#allocation101_spill] sm:$0xff] }
 0x3f0   : > { %v2857_v3 = vadd.f32 %v2856_v58, %v6273_v29  ;;  %v3511_v10 = vpop.f32.mrf.mxu0  ;;  %v3720_v42 = vpop.f32.mrf.mxu1  ;;  %v2657_v58 = vadd.f32 %v7260_v34, %v2448_v20 }
 0x3f1   : > { %v3721_v52 = vadd.f32 %v3720_v42, %v3511_v10  ;;  %v6717_v42 = vld [vmem:[%s6920_s6] ss:$0 sm:$0xff] }
 0x3f2   : > { %v3066_v33 = vadd.f32 %v3065_v60, %v2857_v3 }
 0x3f3   : > { %v3868_v7 = vadd.f32 %v6460_v25, %v3721_v52  ;;  %3558 = vmatmul.f32.gmra.mxu0 %v3342_v1  ;;  %3767 = vmatmul.f32.gmra.mxu1 %v3343_v32  ;;  %v3222_v32 = vmul.f32 0.2, %v2657_v58  ;;  %v7263_v52 = vld [vmem:[#allocation92_spill] sm:$0xff] }
 0x3f4   : > { %2906 = vmatmul.f32.gmra.mxu2 %v7249_v22  ;;  %3115 = vmatmul.f32.gmra.mxu3 %v7250_v26  ;;  %v3217_v9 = vmul.f32 0.2, %v3066_v33 }
 0x3f5   : > { %3933 = vst.msk [vmem:[%s6469_s17 + $0xc0] sm:$0xff] %vm3908_vm0, %v3868_v7 }
 0x3f6   : > { %v3345_v18 = vmax.f32 %v3066_v33, %v3217_v9  ;;  %v2451_v33 = vadd.f32 %v7263_v52, %v6248_v24  ;;  %v3350_v9 = vmax.f32 %v2657_v58, %v3222_v32  ;;  %v7273_v58 = vld [vmem:[#allocation102_spill] sm:$0xff] }
 0x3f7   : > { %v2859_v44 = vpop.f32.mrf.mxu2  ;;  %v3068_v6 = vpop.f32.mrf.mxu3 }
 0x3f8   : > { %v2860_v40 = vadd.f32 %v2859_v44, %v6273_v29  ;;  %v3514_v56 = vpop.f32.mrf.mxu0  ;;  %v3723_v27 = vpop.f32.mrf.mxu1  ;;  %v7264_v44 = vld [vmem:[#allocation93_spill] sm:$0xff] }
 0x3f9   : > { %v3724_v49 = vadd.f32 %v3723_v27, %v3514_v56 }
 0x3fa   : > { %v3069_v4 = vadd.f32 %v3068_v6, %v2860_v40  ;;  %v2660_v6 = vadd.f32 %v7264_v44, %v2451_v33  ;;  %v7274_v33 = vld [vmem:[#allocation103_spill] sm:$0xff] }
 0x3fb   : > { %v3869_v43 = vadd.f32 %v6460_v25, %v3724_v49  ;;  %3561 = vmatmul.f32.gmra.mxu0 %v3344_v50  ;;  %3770 = vmatmul.f32.gmra.mxu1 %v3345_v18  ;;  %v7267_v49 = vld [vmem:[#allocation96_spill] sm:$0xff] }
 0x3fc   : > { %2909 = vmatmul.f32.gmra.mxu2 %v7253_v39  ;;  %3118 = vmatmul.f32.gmra.mxu3 %v7254_v0  ;;  %v3219_v48 = vmul.f32 0.2, %v3069_v4  ;;  %v3224_v18 = vmul.f32 0.2, %v2660_v6 }
 0x3fd   : > { %3934 = vst.msk [vmem:[%s6469_s17 + $0xc8] sm:$0xff] %vm3908_vm0, %v3869_v43 }
 0x3fe   : > { %v3347_v57 = vmax.f32 %v3069_v4, %v3219_v48  ;;  %v2454_v4 = vadd.f32 %v7267_v49, %v6248_v24  ;;  %v3352_v48 = vmax.f32 %v2660_v6, %v3224_v18  ;;  %v7276_v18 = vld [vmem:[#allocation105_spill] sm:$0xff] }
 0x3ff   : > { %v2862_v14 = vpop.f32.mrf.mxu2  ;;  %v3071_v28 = vpop.f32.mrf.mxu3 }
 0x400   : > { %v2863_v11 = vadd.f32 %v2862_v14, %v6273_v29  ;;  %v3517_v47 = vpop.f32.mrf.mxu0  ;;  %v3726_v30 = vpop.f32.mrf.mxu1  ;;  %v7268_v14 = vld [vmem:[#allocation97_spill] sm:$0xff] }
 0x401   : > { %v3727_v62 = vadd.f32 %v3726_v30, %v3517_v47 }
 0x402   : > { %v3072_v8 = vadd.f32 %v3071_v28, %v2863_v11  ;;  %v2663_v28 = vadd.f32 %v7268_v14, %v2454_v4 }
 0x403   : > { %v3870_v17 = vadd.f32 %v6460_v25, %v3727_v62  ;;  %3564 = vmatmul.f32.gmra.mxu0 %v3346_v35  ;;  %3773 = vmatmul.f32.gmra.mxu1 %v3347_v57  ;;  %v7271_v62 = vld [vmem:[#allocation98_spill] sm:$0xff] }
 0x404   : > { %2912 = vmatmul.f32.gmra.mxu2 %v7257_v63  ;;  %3121 = vmatmul.f32.gmra.mxu3 %v7258_v41  ;;  %v3221_v19 = vmul.f32 0.2, %v3072_v8  ;;  %v3226_v57 = vmul.f32 0.2, %v2663_v28 }
 0x405   : > { %3935 = vst.msk [vmem:[%s6469_s17 + $0xd0] sm:$0xff] %vm3908_vm0, %v3870_v17 }
 0x406   : > { %v3349_v60 = vmax.f32 %v3072_v8, %v3221_v19  ;;  %v2457_v8 = vadd.f32 %v7271_v62, %v6248_v24  ;;  %v3354_v19 = vmax.f32 %v2663_v28, %v3226_v57 }
 0x407   : > { %v2865_v38 = vpop.f32.mrf.mxu2  ;;  %v3074_v2 = vpop.f32.mrf.mxu3 }
 0x408   : > { %v2866_v51 = vadd.f32 %v2865_v38, %v6273_v29  ;;  %v3520_v12 = vpop.f32.mrf.mxu0  ;;  %v3729_v25 = vpop.f32.mrf.mxu1  ;;  %v7272_v38 = vld [vmem:[#allocation99_spill] sm:$0xff] }
 0x409   : > { %v3730_v3 = vadd.f32 %v3729_v25, %v3520_v12 }
 0x40a   : > { %v3075_v10 = vadd.f32 %v3074_v2, %v2866_v51  ;;  %v2666_v2 = vadd.f32 %v7272_v38, %v2457_v8 }
 0x40b   : > { %v3871_v1 = vadd.f32 %v6717_v42, %v3730_v3  ;;  %3567 = vmatmul.f32.gmra.mxu0 %v3348_v46  ;;  %3776 = vmatmul.f32.gmra.mxu1 %v3349_v60  ;;  %v2460_v60 = vadd.f32 %v7273_v58, %v6248_v24 }
 0x40c   : > { %2915 = vmatmul.f32.gmra.mxu2 %v7261_v54  ;;  %3124 = vmatmul.f32.gmra.mxu3 %v7262_v5  ;;  %v3223_v7 = vmul.f32 0.2, %v3075_v10  ;;  %v3228_v34 = vmul.f32 0.2, %v2666_v2 }
 0x40d   : > { %3936 = vst.msk [vmem:[%s6469_s17 + $0xd8] sm:$0xff] %vm3908_vm0, %v3871_v1 }
 0x40e   : > { %v3351_v40 = vmax.f32 %v3075_v10, %v3223_v7  ;;  %v3356_v52 = vmax.f32 %v2666_v2, %v3228_v34  ;;  %v2669_v7 = vadd.f32 %v7274_v33, %v2460_v60 }
 0x40f   : > { %v2868_v22 = vpop.f32.mrf.mxu2  ;;  %v3077_v26 = vpop.f32.mrf.mxu3 }
 0x410   : > { %v2869_v55 = vadd.f32 %v2868_v22, %v6273_v29  ;;  %v3523_v23 = vpop.f32.mrf.mxu0  ;;  %v3732_v21 = vpop.f32.mrf.mxu1 }
 0x411   : > { %v3733_v56 = vadd.f32 %v3732_v21, %v3523_v23  ;;  %v3230_v21 = vmul.f32 0.2, %v2669_v7 }
 0x412   : > { %v3078_v27 = vadd.f32 %v3077_v26, %v2869_v55 }
 0x413   : > { %v3872_v50 = vadd.f32 %v6717_v42, %v3733_v56  ;;  %3570 = vmatmul.f32.gmra.mxu0 %v3350_v9  ;;  %3779 = vmatmul.f32.gmra.mxu1 %v3351_v40  ;;  %v7275_v9 = vld [vmem:[#allocation104_spill] sm:$0xff] }
 0x414   : > { %2918 = vmatmul.f32.gmra.mxu2 %v7265_v59  ;;  %3127 = vmatmul.f32.gmra.mxu3 %v7266_v15  ;;  %v3225_v43 = vmul.f32 0.2, %v3078_v27  ;;  %v2463_v44 = vadd.f32 %v7275_v9, %v6248_v24  ;;  %v3358_v15 = vmax.f32 %v2669_v7, %v3230_v21 }
 0x415   : > { %3937 = vst.msk [vmem:[%s6469_s17 + $0xe0] sm:$0xff] %vm3908_vm0, %v3872_v50 }
 0x416   : > { %v3353_v11 = vmax.f32 %v3078_v27, %v3225_v43  ;;  %v2672_v49 = vadd.f32 %v7276_v18, %v2463_v44 }
 0x417   : > { %v2871_v39 = vpop.f32.mrf.mxu2  ;;  %v3080_v0 = vpop.f32.mrf.mxu3 }
 0x418   : > { %v2872_v61 = vadd.f32 %v2871_v39, %v6273_v29  ;;  %v3526_v16 = vpop.f32.mrf.mxu0  ;;  %v3735_v31 = vpop.f32.mrf.mxu1 }
 0x419   : > { %v3736_v47 = vadd.f32 %v3735_v31, %v3526_v16  ;;  %v7277_v16 = vld [vmem:[#allocation40_spill] sm:$0xff] }
 0x41a   : > { %v3081_v30 = vadd.f32 %v3080_v0, %v2872_v61  ;;  %v3232_v61 = vmul.f32 0.2, %v2672_v49  ;;  %v2466_v31 = vadd.f32 %v7277_v16, %v6248_v24 }
 0x41b   : > { %v3873_v35 = vadd.f32 %v6717_v42, %v3736_v47  ;;  %3573 = vmatmul.f32.gmra.mxu0 %v3352_v48  ;;  %3782 = vmatmul.f32.gmra.mxu1 %v3353_v11 }
 0x41c   : > { %2921 = vmatmul.f32.gmra.mxu2 %v7269_v37  ;;  %3130 = vmatmul.f32.gmra.mxu3 %v7270_v45  ;;  %v3227_v17 = vmul.f32 0.2, %v3081_v30  ;;  %v7278_v37 = vld [vmem:[#allocation41_spill] sm:$0xff] }
 0x41d   : > { %3938 = vst.msk [vmem:[%s6469_s17 + $0xe8] sm:$0xff] %vm3908_vm0, %v3873_v35  ;;  %v3360_v35 = vmax.f32 %v2672_v49, %v3232_v61  ;;  %v2675_v45 = vadd.f32 %v7278_v37, %v2466_v31 }
 0x41e   : > { %v3355_v51 = vmax.f32 %v3081_v30, %v3227_v17 }
 0x41f   : > { %v2874_v63 = vpop.f32.mrf.mxu2  ;;  %v3083_v41 = vpop.f32.mrf.mxu3 }
 0x420   : > { %v2875_v53 = vadd.f32 %v2874_v63, %v6273_v29  ;;  %v3529_v13 = vpop.f32.mrf.mxu0  ;;  %v3738_v20 = vpop.f32.mrf.mxu1  ;;  %v3234_v63 = vmul.f32 0.2, %v2675_v45 }
 0x421   : > { %v3739_v12 = vadd.f32 %v3738_v20, %v3529_v13 }
 0x422   : > { %v3084_v25 = vadd.f32 %v3083_v41, %v2875_v53  ;;  %v7279_v41 = vld [vmem:[#allocation48_spill] sm:$0xff] }
 0x423   : > { %v3874_v46 = vadd.f32 %v6717_v42, %v3739_v12  ;;  %3576 = vmatmul.f32.gmra.mxu0 %v3354_v19  ;;  %3785 = vmatmul.f32.gmra.mxu1 %v3355_v51  ;;  %v2469_v53 = vadd.f32 %v7279_v41, %v6248_v24  ;;  %v3362_v12 = vmax.f32 %v2675_v45, %v3234_v63 }
 0x424   : > { %v3229_v3 = vmul.f32 0.2, %v3084_v25 }
 0x425   : > { %3939 = vst.msk [vmem:[%s6469_s17 + $0xf0] sm:$0xff] %vm3908_vm0, %v3874_v46 }
 0x426   : > { %v3357_v22 = vmax.f32 %v3084_v25, %v3229_v3  ;;  %v7280_v25 = vld [vmem:[#allocation49_spill] sm:$0xff] }
 0x427   : > { %v2877_v10 = vpop.f32.mrf.mxu2  ;;  %v3086_v1 = vpop.f32.mrf.mxu3  ;;  %v2678_v46 = vadd.f32 %v7280_v25, %v2469_v53 }
 0x428   : > { %v2878_v54 = vadd.f32 %v2877_v10, %v6273_v29  ;;  %v3532_v5 = vpop.f32.mrf.mxu0  ;;  %v3741_v32 = vpop.f32.mrf.mxu1 }
 0x429   : > { %v3742_v26 = vadd.f32 %v3741_v32, %v3532_v5  ;;  %v3236_v10 = vmul.f32 0.2, %v2678_v46 }
 0x42a   : > { %v3087_v55 = vadd.f32 %v3086_v1, %v2878_v54  ;;  %v7281_v1 = vld [vmem:[#allocation111_spill] sm:$0xff] }
 0x42b   : > { %v3875_v23 = vadd.f32 %v6717_v42, %v3742_v26  ;;  %3579 = vmatmul.f32.gmra.mxu0 %v3356_v52  ;;  %3788 = vmatmul.f32.gmra.mxu1 %v3357_v22  ;;  %v2472_v54 = vadd.f32 %v7281_v1, %v6248_v24  ;;  %v3364_v26 = vmax.f32 %v2678_v46, %v3236_v10 }
 0x42c   : > { %v3231_v6 = vmul.f32 0.2, %v3087_v55 }
 0x42d   : > { %3940 = vst.msk [vmem:[%s6469_s17 + $0xf8] sm:$0xff] %vm3908_vm0, %v3875_v23 }
 0x42e   : > { %v3359_v4 = vmax.f32 %v3087_v55, %v3231_v6  ;;  %v7282_v55 = vld [vmem:[#allocation112_spill] sm:$0xff] }
 0x42f   : > { %v2880_v40 = vpop.f32.mrf.mxu2  ;;  %v3089_v56 = vpop.f32.mrf.mxu3  ;;  %v2681_v23 = vadd.f32 %v7282_v55, %v2472_v54 }
 0x430   : > { %v2881_v27 = vadd.f32 %v2880_v40, %v6273_v29  ;;  %v3535_v50 = vpop.f32.mrf.mxu0  ;;  %v3744_v59 = vpop.f32.mrf.mxu1 }
 0x431   : > { %v3745_v43 = vadd.f32 %v3744_v59, %v3535_v50  ;;  %v3238_v40 = vmul.f32 0.2, %v2681_v23 }
 0x432   : > { %v3090_v39 = vadd.f32 %v3089_v56, %v2881_v27  ;;  %v7283_v56 = vld [vmem:[#allocation115_spill] sm:$0xff] }
 0x433   : > { %v3876_v0 = vadd.f32 %v6717_v42, %v3745_v43  ;;  %3582 = vmatmul.f32.gmra.mxu0 %v3358_v15  ;;  %3791 = vmatmul.f32.gmra.mxu1 %v3359_v4  ;;  %v2475_v27 = vadd.f32 %v7283_v56, %v6248_v24  ;;  %v3366_v43 = vmax.f32 %v2681_v23, %v3238_v40 }
 0x434   : > { %v3233_v48 = vmul.f32 0.2, %v3090_v39 }
 0x435   : > { %3941 = vst.msk [vmem:[%s6469_s17 + $0x100] sm:$0xff] %vm3908_vm0, %v3876_v0 }
 0x436   : > { %v3361_v57 = vmax.f32 %v3090_v39, %v3233_v48  ;;  %v7284_v39 = vld [vmem:[#allocation116_spill] sm:$0xff] }
 0x437   : > { %v2883_v14 = vpop.f32.mrf.mxu2  ;;  %v3092_v28 = vpop.f32.mrf.mxu3  ;;  %v2684_v0 = vadd.f32 %v7284_v39, %v2475_v27 }
 0x438   : > { %v2884_v11 = vadd.f32 %v2883_v14, %v6273_v29  ;;  %v3538_v47 = vpop.f32.mrf.mxu0  ;;  %v3747_v30 = vpop.f32.mrf.mxu1 }
 0x439   : > { %v3748_v62 = vadd.f32 %v3747_v30, %v3538_v47  ;;  %v3240_v14 = vmul.f32 0.2, %v2684_v0 }
 0x43a   : > { %v3093_v8 = vadd.f32 %v3092_v28, %v2884_v11  ;;  %v7285_v28 = vld [vmem:[#allocation118_spill] sm:$0xff] }
 0x43b   : > { %v3877_v17 = vadd.f32 %v6717_v42, %v3748_v62  ;;  %3585 = vmatmul.f32.gmra.mxu0 %v3360_v35  ;;  %3794 = vmatmul.f32.gmra.mxu1 %v3361_v57  ;;  %v2478_v11 = vadd.f32 %v7285_v28, %v6248_v24  ;;  %v3368_v62 = vmax.f32 %v2684_v0, %v3240_v14 }
 0x43c   : > { %v3235_v13 = vmul.f32 0.2, %v3093_v8 }
 0x43d   : > { %3942 = vst.msk [vmem:[%s6469_s17 + $0x108] sm:$0xff] %vm3908_vm0, %v3877_v17 }
 0x43e   : > { %v3363_v34 = vmax.f32 %v3093_v8, %v3235_v13  ;;  %v7286_v8 = vld [vmem:[#allocation119_spill] sm:$0xff] }
 0x43f   : > { %v2886_v20 = vpop.f32.mrf.mxu2  ;;  %v3095_v19 = vpop.f32.mrf.mxu3  ;;  %v2687_v17 = vadd.f32 %v7286_v8, %v2478_v11 }
 0x440   : > { %v2887_v38 = vadd.f32 %v2886_v20, %v6273_v29  ;;  %v3541_v2 = vpop.f32.mrf.mxu0  ;;  %v3750_v51 = vpop.f32.mrf.mxu1 }
 0x441   : > { %v3751_v58 = vadd.f32 %v3750_v51, %v3541_v2  ;;  %v3242_v20 = vmul.f32 0.2, %v2687_v17 }
 0x442   : > { %v3096_v60 = vadd.f32 %v3095_v19, %v2887_v38  ;;  %v7287_v19 = vld [vmem:[#allocation122_spill] sm:$0xff] }
 0x443   : > { %v3878_v3 = vadd.f32 %v6717_v42, %v3751_v58  ;;  %3588 = vmatmul.f32.gmra.mxu0 %v3362_v12  ;;  %3797 = vmatmul.f32.gmra.mxu1 %v3363_v34  ;;  %v2481_v38 = vadd.f32 %v7287_v19, %v6248_v24  ;;  %v3370_v58 = vmax.f32 %v2687_v17, %v3242_v20 }
 0x444   : > { %v3237_v5 = vmul.f32 0.2, %v3096_v60 }
 0x445   : > { %3943 = vst.msk [vmem:[%s6469_s17 + $0x110] sm:$0xff] %vm3908_vm0, %v3878_v3 }
 0x446   : > { %v3365_v21 = vmax.f32 %v3096_v60, %v3237_v5  ;;  %v7288_v60 = vld [vmem:[#allocation123_spill] sm:$0xff] }
 0x447   : > { %v2889_v32 = vpop.f32.mrf.mxu2  ;;  %v3098_v52 = vpop.f32.mrf.mxu3  ;;  %v2690_v3 = vadd.f32 %v7288_v60, %v2481_v38 }
 0x448   : > { %v2890_v33 = vadd.f32 %v2889_v32, %v6273_v29  ;;  %v3544_v7 = vpop.f32.mrf.mxu0  ;;  %v3753_v22 = vpop.f32.mrf.mxu1 }
 0x449   : > { %v3754_v9 = vadd.f32 %v3753_v22, %v3544_v7  ;;  %v3244_v32 = vmul.f32 0.2, %v2690_v3 }
 0x44a   : > { %v3099_v44 = vadd.f32 %v3098_v52, %v2890_v33  ;;  %v7289_v52 = vld [vmem:[#allocation126_spill] sm:$0xff] }
 0x44b   : > { %v3879_v6 = vadd.f32 %v6717_v42, %v3754_v9  ;;  %3591 = vmatmul.f32.gmra.mxu0 %v3364_v26  ;;  %3800 = vmatmul.f32.gmra.mxu1 %v3365_v21  ;;  %v2484_v33 = vadd.f32 %v7289_v52, %v6248_v24  ;;  %v3372_v9 = vmax.f32 %v2690_v3, %v3244_v32 }
 0x44c   : > { %v3239_v50 = vmul.f32 0.2, %v3099_v44 }
 0x44d   : > { %3944 = vst.msk [vmem:[%s6469_s17 + $0x118] sm:$0xff] %vm3908_vm0, %v3879_v6 }
 0x44e   : > { %v3367_v61 = vmax.f32 %v3099_v44, %v3239_v50  ;;  %v7290_v44 = vld [vmem:[#allocation127_spill] sm:$0xff] }
 0x44f   : > { %v2892_v59 = vpop.f32.mrf.mxu2  ;;  %v3101_v15 = vpop.f32.mrf.mxu3  ;;  %v2693_v6 = vadd.f32 %v7290_v44, %v2484_v33 }
 0x450   : > { %v2893_v18 = vadd.f32 %v2892_v59, %v6273_v29  ;;  %v3547_v49 = vpop.f32.mrf.mxu0  ;;  %v3756_v4 = vpop.f32.mrf.mxu1 }
 0x451   : > { %v3757_v16 = vadd.f32 %v3756_v4, %v3547_v49  ;;  %v3246_v59 = vmul.f32 0.2, %v2693_v6 }
 0x452   : > { %v3102_v31 = vadd.f32 %v3101_v15, %v2893_v18  ;;  %v7291_v15 = vld [vmem:[#allocation129_spill] sm:$0xff] }
 0x453   : > { %v3880_v48 = vadd.f32 %v6717_v42, %v3757_v16  ;;  %3594 = vmatmul.f32.gmra.mxu0 %v3366_v43  ;;  %3803 = vmatmul.f32.gmra.mxu1 %v3367_v61  ;;  %v2487_v18 = vadd.f32 %v7291_v15, %v6248_v24  ;;  %v3374_v16 = vmax.f32 %v2693_v6, %v3246_v59 }
 0x454   : > { %v3241_v47 = vmul.f32 0.2, %v3102_v31 }
 0x455   : > { %3945 = vst.msk [vmem:[%s6469_s17 + $0x120] sm:$0xff] %vm3908_vm0, %v3880_v48 }
 0x456   : > { %v3369_v63 = vmax.f32 %v3102_v31, %v3241_v47  ;;  %v7292_v31 = vld [vmem:[#allocation130_spill] sm:$0xff] }
 0x457   : > { %v2895_v30 = vpop.f32.mrf.mxu2  ;;  %v3104_v35 = vpop.f32.mrf.mxu3  ;;  %v2696_v48 = vadd.f32 %v7292_v31, %v2487_v18 }
 0x458   : > { %v2896_v37 = vadd.f32 %v2895_v30, %v6273_v29  ;;  %v3550_v45 = vpop.f32.mrf.mxu0  ;;  %v3759_v57 = vpop.f32.mrf.mxu1 }
 0x459   : > { %v3760_v41 = vadd.f32 %v3759_v57, %v3550_v45  ;;  %v3248_v30 = vmul.f32 0.2, %v2696_v48 }
 0x45a   : > { %v3105_v53 = vadd.f32 %v3104_v35, %v2896_v37  ;;  %v7293_v35 = vld [vmem:[#allocation131_spill] sm:$0xff] }
 0x45b   : > { %v3881_v13 = vadd.f32 %v6717_v42, %v3760_v41  ;;  %3597 = vmatmul.f32.gmra.mxu0 %v3368_v62  ;;  %3806 = vmatmul.f32.gmra.mxu1 %v3369_v63  ;;  %v2490_v37 = vadd.f32 %v7293_v35, %v6248_v24  ;;  %v3376_v41 = vmax.f32 %v2696_v48, %v3248_v30 }
 0x45c   : > { %v3243_v2 = vmul.f32 0.2, %v3105_v53 }
 0x45d   : > { %3946 = vst.msk [vmem:[%s6469_s17 + $0x128] sm:$0xff] %vm3908_vm0, %v3881_v13 }
 0x45e   : > { %v3371_v10 = vmax.f32 %v3105_v53, %v3243_v2  ;;  %v7294_v53 = vld [vmem:[#allocation132_spill] sm:$0xff] }
 0x45f   : > { %v2898_v51 = vpop.f32.mrf.mxu2  ;;  %v3107_v12 = vpop.f32.mrf.mxu3  ;;  %v2699_v13 = vadd.f32 %v7294_v53, %v2490_v37 }
 0x460   : > { %v2899_v25 = vadd.f32 %v2898_v51, %v6273_v29  ;;  %v3553_v46 = vpop.f32.mrf.mxu0  ;;  %v3762_v34 = vpop.f32.mrf.mxu1 }
 0x461   : > { %v3763_v1 = vadd.f32 %v3762_v34, %v3553_v46  ;;  %v3250_v51 = vmul.f32 0.2, %v2699_v13 }
 0x462   : > { %v3108_v54 = vadd.f32 %v3107_v12, %v2899_v25  ;;  %v7295_v12 = vld [vmem:[#allocation134_spill] sm:$0xff] }
 0x463   : > { %v3882_v5 = vadd.f32 %v6717_v42, %v3763_v1  ;;  %3600 = vmatmul.f32.gmra.mxu0 %v3370_v58  ;;  %3809 = vmatmul.f32.gmra.mxu1 %v3371_v10  ;;  %v2493_v25 = vadd.f32 %v7295_v12, %v6248_v24  ;;  %v3378_v1 = vmax.f32 %v2699_v13, %v3250_v51 }
 0x464   : > { %v3245_v7 = vmul.f32 0.2, %v3108_v54 }
 0x465   : > { %3947 = vst.msk [vmem:[%s6469_s17 + $0x130] sm:$0xff] %vm3908_vm0, %v3882_v5 }
 0x466   : > { %v3373_v40 = vmax.f32 %v3108_v54, %v3245_v7  ;;  %v7296_v54 = vld [vmem:[#allocation135_spill] sm:$0xff] }
 0x467   : > { %v2901_v22 = vpop.f32.mrf.mxu2  ;;  %v3110_v26 = vpop.f32.mrf.mxu3  ;;  %v2702_v5 = vadd.f32 %v7296_v54, %v2493_v25 }
 0x468   : > { %v2902_v55 = vadd.f32 %v2901_v22, %v6273_v29  ;;  %v3556_v23 = vpop.f32.mrf.mxu0  ;;  %v3765_v21 = vpop.f32.mrf.mxu1 }
 0x469   : > { %v3766_v56 = vadd.f32 %v3765_v21, %v3556_v23  ;;  %v3252_v22 = vmul.f32 0.2, %v2702_v5 }
 0x46a   : > { %v3111_v27 = vadd.f32 %v3110_v26, %v2902_v55  ;;  %v7297_v26 = vld [vmem:[#allocation139_spill] sm:$0xff] }
 0x46b   : > { %v3883_v50 = vadd.f32 %v6717_v42, %v3766_v56  ;;  %3603 = vmatmul.f32.gmra.mxu0 %v3372_v9  ;;  %3812 = vmatmul.f32.gmra.mxu1 %v3373_v40  ;;  %v2496_v55 = vadd.f32 %v7297_v26, %v6248_v24  ;;  %v3380_v56 = vmax.f32 %v2702_v5, %v3252_v22 }
 0x46c   : > { %v3247_v49 = vmul.f32 0.2, %v3111_v27 }
 0x46d   : > { %3948 = vst.msk [vmem:[%s6469_s17 + $0x138] sm:$0xff] %vm3908_vm0, %v3883_v50 }
 0x46e   : > { %v3375_v14 = vmax.f32 %v3111_v27, %v3247_v49  ;;  %v7298_v27 = vld [vmem:[#allocation140_spill] sm:$0xff] }
 0x46f   : > { %v2904_v4 = vpop.f32.mrf.mxu2  ;;  %v3113_v43 = vpop.f32.mrf.mxu3  ;;  %v2705_v50 = vadd.f32 %v7298_v27, %v2496_v55 }
 0x470   : > { %v2905_v39 = vadd.f32 %v2904_v4, %v6273_v29  ;;  %v3559_v0 = vpop.f32.mrf.mxu0  ;;  %v3768_v61 = vpop.f32.mrf.mxu1 }
 0x471   : > { %v3769_v28 = vadd.f32 %v3768_v61, %v3559_v0  ;;  %v3254_v4 = vmul.f32 0.2, %v2705_v50 }
 0x472   : > { %v3114_v11 = vadd.f32 %v3113_v43, %v2905_v39  ;;  %v7299_v43 = vld [vmem:[#allocation141_spill] sm:$0xff] }
 0x473   : > { %v3884_v47 = vadd.f32 %v6717_v42, %v3769_v28  ;;  %3606 = vmatmul.f32.gmra.mxu0 %v3374_v16  ;;  %3815 = vmatmul.f32.gmra.mxu1 %v3375_v14  ;;  %v2499_v39 = vadd.f32 %v7299_v43, %v6248_v24  ;;  %v3382_v28 = vmax.f32 %v2705_v50, %v3254_v4 }
 0x474   : > { %v3249_v45 = vmul.f32 0.2, %v3114_v11 }
 0x475   : > { %3949 = vst.msk [vmem:[%s6469_s17 + $0x140] sm:$0xff] %vm3908_vm0, %v3884_v47 }
 0x476   : > { %v3377_v20 = vmax.f32 %v3114_v11, %v3249_v45  ;;  %v7300_v11 = vld [vmem:[#allocation142_spill] sm:$0xff] }
 0x477   : > { %v2907_v57 = vpop.f32.mrf.mxu2  ;;  %v3116_v62 = vpop.f32.mrf.mxu3  ;;  %v2708_v47 = vadd.f32 %v7300_v11, %v2499_v39 }
 0x478   : > { %v2908_v8 = vadd.f32 %v2907_v57, %v6273_v29  ;;  %v3562_v17 = vpop.f32.mrf.mxu0  ;;  %v3771_v63 = vpop.f32.mrf.mxu1 }
 0x479   : > { %v3772_v19 = vadd.f32 %v3771_v63, %v3562_v17  ;;  %v3256_v57 = vmul.f32 0.2, %v2708_v47 }
 0x47a   : > { %v3117_v38 = vadd.f32 %v3116_v62, %v2908_v8  ;;  %v7301_v62 = vld [vmem:[#allocation144_spill] sm:$0xff] }
 0x47b   : > { %v3885_v2 = vadd.f32 %v6717_v42, %v3772_v19  ;;  %3609 = vmatmul.f32.gmra.mxu0 %v3376_v41  ;;  %3818 = vmatmul.f32.gmra.mxu1 %v3377_v20  ;;  %v2502_v8 = vadd.f32 %v7301_v62, %v6248_v24  ;;  %v3384_v19 = vmax.f32 %v2708_v47, %v3256_v57 }
 0x47c   : > { %v3251_v46 = vmul.f32 0.2, %v3117_v38 }
 0x47d   : > { %3950 = vst.msk [vmem:[%s6469_s17 + $0x148] sm:$0xff] %vm3908_vm0, %v3885_v2 }
 0x47e   : > { %v3379_v32 = vmax.f32 %v3117_v38, %v3251_v46  ;;  %v7302_v38 = vld [vmem:[#allocation145_spill] sm:$0xff] }
 0x47f   : > { %v2910_v34 = vpop.f32.mrf.mxu2  ;;  %v3119_v58 = vpop.f32.mrf.mxu3  ;;  %v2711_v2 = vadd.f32 %v7302_v38, %v2502_v8 }
 0x480   : > { %v2911_v60 = vadd.f32 %v2910_v34, %v6273_v29  ;;  %v3565_v3 = vpop.f32.mrf.mxu0  ;;  %v3774_v10 = vpop.f32.mrf.mxu1 }
 0x481   : > { %v3775_v52 = vadd.f32 %v3774_v10, %v3565_v3  ;;  %v3258_v24 = vmul.f32 0.2, %v2711_v2 }
 0x482   : > { %v3120_v33 = vadd.f32 %v3119_v58, %v2911_v60 }
 0x483   : > { %v3886_v7 = vadd.f32 %v6717_v42, %v3775_v52  ;;  %3612 = vmatmul.f32.gmra.mxu0 %v3378_v1  ;;  %3821 = vmatmul.f32.gmra.mxu1 %v3379_v32  ;;  %v3386_v1 = vmax.f32 %v2711_v2, %v3258_v24 }
 0x484   : > { %v3253_v23 = vmul.f32 0.2, %v3120_v33 }
 0x485   : > { %3951 = vst.msk [vmem:[%s6469_s17 + $0x150] sm:$0xff] %vm3908_vm0, %v3886_v7  ;;  %v3260_v7 = vmul.f32 0.2, %v6265_v36 }
 0x486   : > { %v3381_v59 = vmax.f32 %v3120_v33, %v3253_v23 }
 0x487   : > { %v2913_v21 = vpop.f32.mrf.mxu2  ;;  %v3122_v9 = vpop.f32.mrf.mxu3  ;;  %v3388_v55 = vmax.f32 %v6265_v36, %v3260_v7 }
 0x488   : > { %v2914_v44 = vadd.f32 %v2913_v21, %v6273_v29  ;;  %v3568_v6 = vpop.f32.mrf.mxu0  ;;  %v3777_v40 = vpop.f32.mrf.mxu1 }
 0x489   : > { %v3778_v15 = vadd.f32 %v3777_v40, %v3568_v6 }
 0x48a   : > { %v3123_v18 = vadd.f32 %v3122_v9, %v2914_v44 }
 0x48b   : > { %v3887_v49 = vadd.f32 %v6717_v42, %v3778_v15  ;;  %3615 = vmatmul.f32.gmra.mxu0 %v3380_v56  ;;  %3824 = vmatmul.f32.gmra.mxu1 %v3381_v59 }
 0x48c   : > { %v3255_v0 = vmul.f32 0.2, %v3123_v18 }
 0x48d   : > { %3952 = vst.msk [vmem:[%s6469_s17 + $0x158] sm:$0xff] %vm3908_vm0, %v3887_v49 }
 0x48e   : > { %v3383_v30 = vmax.f32 %v3123_v18, %v3255_v0 }
 0x48f   : > { %v2916_v61 = vpop.f32.mrf.mxu2  ;;  %v3125_v16 = vpop.f32.mrf.mxu3 }
 0x490   : > { %v2917_v31 = vadd.f32 %v2916_v61, %v6273_v29  ;;  %v3571_v48 = vpop.f32.mrf.mxu0  ;;  %v3780_v14 = vpop.f32.mrf.mxu1 }
 0x491   : > { %v3781_v35 = vadd.f32 %v3780_v14, %v3571_v48 }
 0x492   : > { %v3126_v37 = vadd.f32 %v3125_v16, %v2917_v31 }
 0x493   : > { %v3888_v45 = vadd.f32 %v6717_v42, %v3781_v35  ;;  %3618 = vmatmul.f32.gmra.mxu0 %v3382_v28  ;;  %3827 = vmatmul.f32.gmra.mxu1 %v3383_v30 }
 0x494   : > { %v3257_v17 = vmul.f32 0.2, %v3126_v37 }
 0x495   : > { %3953 = vst.msk [vmem:[%s6469_s17 + $0x160] sm:$0xff] %vm3908_vm0, %v3888_v45 }
 0x496   : > { %v3385_v51 = vmax.f32 %v3126_v37, %v3257_v17 }
 0x497   : > { %v2919_v63 = vpop.f32.mrf.mxu2  ;;  %v3128_v41 = vpop.f32.mrf.mxu3 }
 0x498   : > { %v2920_v53 = vadd.f32 %v2919_v63, %v6273_v29  ;;  %v3574_v13 = vpop.f32.mrf.mxu0  ;;  %v3783_v20 = vpop.f32.mrf.mxu1 }
 0x499   : > { %v3784_v12 = vadd.f32 %v3783_v20, %v3574_v13 }
 0x49a   : > { %v3129_v25 = vadd.f32 %v3128_v41, %v2920_v53 }
 0x49b   : > { %v3889_v46 = vadd.f32 %v6717_v42, %v3784_v12  ;;  %3621 = vmatmul.f32.gmra.mxu0 %v3384_v19  ;;  %3830 = vmatmul.f32.gmra.mxu1 %v3385_v51 }
 0x49c   : > { %v3259_v34 = vmul.f32 0.2, %v3129_v25 }
 0x49d   : > { %3954 = vst.msk [vmem:[%s6469_s17 + $0x168] sm:$0xff] %vm3908_vm0, %v3889_v46 }
 0x49e   : > { %v3387_v54 = vmax.f32 %v3129_v25, %v3259_v34 }
 0x49f   : > { %v2922_v58 = vpop.f32.mrf.mxu2  ;;  %v3131_v5 = vpop.f32.mrf.mxu3 }
 0x4a0   : > { %v2923_v60 = vadd.f32 %v2922_v58, %v6273_v29  ;;  %v3577_v3 = vpop.f32.mrf.mxu0  ;;  %v3786_v10 = vpop.f32.mrf.mxu1 }
 0x4a1   : > { %v3787_v32 = vadd.f32 %v3786_v10, %v3577_v3 }
 0x4a2   : > { %v3132_v52 = vadd.f32 %v3131_v5, %v2923_v60 }
 0x4a3   : > { %v3890_v33 = vadd.f32 %v6717_v42, %v3787_v32  ;;  %3624 = vmatmul.f32.gmra.mxu0 %v3386_v1  ;;  %3833 = vmatmul.f32.gmra.mxu1 %v3387_v54 }
 0x4a4   : > { %v3261_v22 = vmul.f32 0.2, %v3132_v52 }
 0x4a5   : > { %3955 = vst.msk [vmem:[%s6469_s17 + $0x170] sm:$0xff] %vm3908_vm0, %v3890_v33 }
 0x4a6   : > { %v3389_v23 = vmax.f32 %v3132_v52, %v3261_v22 }
 0x4a8   : > { %v3580_v26 = vpop.f32.mrf.mxu0  ;;  %v3789_v29 = vpop.f32.mrf.mxu1 }
 0x4a9   : > { %v3790_v21 = vadd.f32 %v3789_v29, %v3580_v26 }
 0x4ab   : > { %v3891_v9 = vadd.f32 %v6717_v42, %v3790_v21  ;;  %3627 = vmatmul.f32.gmra.mxu0 %v3388_v55  ;;  %3836 = vmatmul.f32.gmra.mxu1 %v3389_v23 }
 0x4ad   : > { %3956 = vst.msk [vmem:[%s6469_s17 + $0x178] sm:$0xff] %vm3908_vm0, %v3891_v9 }
 0x4b0   : > { %v3583_v44 = vpop.f32.mrf.mxu0  ;;  %v3792_v6 = vpop.f32.mrf.mxu1 }
 0x4b1   : > { %v3793_v40 = vadd.f32 %v3792_v6, %v3583_v44 }
 0x4b3   : > { %v3892_v56 = vadd.f32 %v6717_v42, %v3793_v40 }
 0x4b5   : > { %3957 = vst.msk [vmem:[%s6469_s17 + $0x180] sm:$0xff] %vm3908_vm0, %v3892_v56 }
 0x4b8   : > { %v3586_v27 = vpop.f32.mrf.mxu0  ;;  %v3795_v36 = vpop.f32.mrf.mxu1 }
 0x4b9   : > { %v3796_v50 = vadd.f32 %v3795_v36, %v3586_v27 }
 0x4bb   : > { %v3893_v59 = vadd.f32 %v6717_v42, %v3796_v50 }
 0x4bd   : > { %3958 = vst.msk [vmem:[%s6469_s17 + $0x188] sm:$0xff] %vm3908_vm0, %v3893_v59 }
 0x4c0   : > { %v3589_v15 = vpop.f32.mrf.mxu0  ;;  %v3798_v18 = vpop.f32.mrf.mxu1 }
 0x4c1   : > { %v3799_v49 = vadd.f32 %v3798_v18, %v3589_v15 }
 0x4c3   : > { %v3894_v4 = vadd.f32 %v6717_v42, %v3799_v49 }
 0x4c5   : > { %3959 = vst.msk [vmem:[%s6469_s17 + $0x190] sm:$0xff] %vm3908_vm0, %v3894_v4 }
 0x4c8   : > { %v3592_v43 = vpop.f32.mrf.mxu0  ;;  %v3801_v39 = vpop.f32.mrf.mxu1 }
 0x4c9   : > { %v3802_v0 = vadd.f32 %v3801_v39, %v3592_v43 }
 0x4cb   : > { %v3895_v61 = vadd.f32 %v6717_v42, %v3802_v0 }
 0x4cd   : > { %3960 = vst.msk [vmem:[%s6469_s17 + $0x198] sm:$0xff] %vm3908_vm0, %v3895_v61 }
 0x4d0   : > { %v3595_v16 = vpop.f32.mrf.mxu0  ;;  %v3804_v31 = vpop.f32.mrf.mxu1 }
 0x4d1   : > { %v3805_v48 = vadd.f32 %v3804_v31, %v3595_v16 }
 0x4d3   : > { %v3896_v14 = vadd.f32 %v6717_v42, %v3805_v48 }
 0x4d5   : > { %3961 = vst.msk [vmem:[%s6469_s17 + $0x1a0] sm:$0xff] %vm3908_vm0, %v3896_v14 }
 0x4d8   : > { %v3598_v28 = vpop.f32.mrf.mxu0  ;;  %v3807_v11 = vpop.f32.mrf.mxu1 }
 0x4d9   : > { %v3808_v47 = vadd.f32 %v3807_v11, %v3598_v28 }
 0x4db   : > { %v3897_v30 = vadd.f32 %v6717_v42, %v3808_v47 }
 0x4dd   : > { %3962 = vst.msk [vmem:[%s6469_s17 + $0x1a8] sm:$0xff] %vm3908_vm0, %v3897_v30 }
 0x4e0   : > { %v3601_v35 = vpop.f32.mrf.mxu0  ;;  %v3810_v37 = vpop.f32.mrf.mxu1 }
 0x4e1   : > { %v3811_v45 = vadd.f32 %v3810_v37, %v3601_v35 }
 0x4e3   : > { %v3898_v57 = vadd.f32 %v6717_v42, %v3811_v45 }
 0x4e5   : > { %3963 = vst.msk [vmem:[%s6469_s17 + $0x1b0] sm:$0xff] %vm3908_vm0, %v3898_v57 }
 0x4e8   : > { %v3604_v62 = vpop.f32.mrf.mxu0  ;;  %v3813_v8 = vpop.f32.mrf.mxu1 }
 0x4e9   : > { %v3814_v17 = vadd.f32 %v3813_v8, %v3604_v62 }
 0x4eb   : > { %v3899_v63 = vadd.f32 %v6717_v42, %v3814_v17 }
 0x4ed   : > { %3964 = vst.msk [vmem:[%s6469_s17 + $0x1b8] sm:$0xff] %vm3908_vm0, %v3899_v63 }
 0x4f0   : > { %v3607_v41 = vpop.f32.mrf.mxu0  ;;  %v3816_v53 = vpop.f32.mrf.mxu1 }
 0x4f1   : > { %v3817_v13 = vadd.f32 %v3816_v53, %v3607_v41 }
 0x4f3   : > { %v3900_v20 = vadd.f32 %v6717_v42, %v3817_v13 }
 0x4f5   : > { %3965 = vst.msk [vmem:[%s6469_s17 + $0x1c0] sm:$0xff] %vm3908_vm0, %v3900_v20 }
 0x4f8   : > { %v3610_v19 = vpop.f32.mrf.mxu0  ;;  %v3819_v38 = vpop.f32.mrf.mxu1 }
 0x4f9   : > { %v3820_v2 = vadd.f32 %v3819_v38, %v3610_v19 }
 0x4fb   : > { %v3901_v51 = vadd.f32 %v6717_v42, %v3820_v2 }
 0x4fd   : > { %3966 = vst.msk [vmem:[%s6469_s17 + $0x1c8] sm:$0xff] %vm3908_vm0, %v3901_v51 }
 0x500   : > { %v3613_v12 = vpop.f32.mrf.mxu0  ;;  %v3822_v25 = vpop.f32.mrf.mxu1 }
 0x501   : > { %v3823_v46 = vadd.f32 %v3822_v25, %v3613_v12 }
 0x503   : > { %v3902_v24 = vadd.f32 %v6717_v42, %v3823_v46 }
 0x505   : > { %3967 = vst.msk [vmem:[%s6469_s17 + $0x1d0] sm:$0xff] %vm3908_vm0, %v3902_v24 }
 0x508   : > { %v3616_v34 = vpop.f32.mrf.mxu0  ;;  %v3825_v58 = vpop.f32.mrf.mxu1 }
 0x509   : > { %v3826_v60 = vadd.f32 %v3825_v58, %v3616_v34 }
 0x50b   : > { %v3903_v3 = vadd.f32 %v6717_v42, %v3826_v60 }
 0x50d   : > { %3968 = vst.msk [vmem:[%s6469_s17 + $0x1d8] sm:$0xff] %vm3908_vm0, %v3903_v3 }
 0x510   : > { %v3619_v10 = vpop.f32.mrf.mxu0  ;;  %v3828_v1 = vpop.f32.mrf.mxu1 }
 0x511   : > { %v3829_v54 = vadd.f32 %v3828_v1, %v3619_v10 }
 0x513   : > { %v3904_v5 = vadd.f32 %v6717_v42, %v3829_v54 }
 0x515   : > { %3969 = vst.msk [vmem:[%s6469_s17 + $0x1e0] sm:$0xff] %vm3908_vm0, %v3904_v5 }
 0x518   : > { %v3622_v32 = vpop.f32.mrf.mxu0  ;;  %v3831_v52 = vpop.f32.mrf.mxu1 }
 0x519   : > { %v3832_v33 = vadd.f32 %v3831_v52, %v3622_v32 }
 0x51b   : > { %v3905_v7 = vadd.f32 %v6717_v42, %v3832_v33 }
 0x51d   : > { %3970 = vst.msk [vmem:[%s6469_s17 + $0x1e8] sm:$0xff] %vm3908_vm0, %v3905_v7 }
 0x520   : > { %v3625_v22 = vpop.f32.mrf.mxu0  ;;  %v3834_v26 = vpop.f32.mrf.mxu1 }
 0x521   : > { %v3835_v29 = vadd.f32 %v3834_v26, %v3625_v22 }
 0x523   : > { %v3906_v55 = vadd.f32 %v6717_v42, %v3835_v29 }
 0x525   : > { %3971 = vst.msk [vmem:[%s6469_s17 + $0x1f0] sm:$0xff] %vm3908_vm0, %v3906_v55 }
 0x528   : > { %v3628_v23 = vpop.f32.mrf.mxu0  ;;  %v3837_v21 = vpop.f32.mrf.mxu1 }
 0x529   : > { %v3838_v9 = vadd.f32 %v3837_v21, %v3628_v23 }
 0x52b   : > { %v3907_v44 = vadd.f32 %v6717_v42, %v3838_v9 }
 0x52d   : > { %3972 = vst.msk [vmem:[%s6469_s17 + $0x1f8] sm:$0xff] %vm3908_vm0, %v3907_v44 }
 0x52e PF: > { %s17_s24 = sadd.s32 1, %s4134_s24  }
 0x52f   : > { %p14_p4 = scmp.ge.s32.totalorder %s17_s24, 4  }
 0x531   :  { %16 = sbr.rel (!%p14_p4) target bundleno = 1 (0x1), region = 78 }

</bundles_post_ra>
